<compile_context>
chip_gen: v7x
topology: tpu7x:2x2x1
jax: 0.10.0
libtpu: 0.0.40
codegen_flags: <defaults>
</compile_context>

<pallas_src>
import jax
import jax.numpy as jnp
from jax.experimental import pallas as pl
from jax.experimental.pallas import tpu as pltpu

_EPS = 1e-5
_LANES = 128


def _round_up(v, m):
    return (v + m - 1) // m * m


def _vmem_limit_bytes():
    """Per-generation scoped-VMEM limit (conservative for unknown parts)."""
    try:
        kind = jax.devices()[0].device_kind.lower()
    except Exception:
        kind = ""
    if "v5" in kind or "v6" in kind:
        return 96 * 1024 * 1024          # 128 MiB physical on v5e/v6e
    if "v7" in kind:
        return 48 * 1024 * 1024          # 64 MiB physical on v7x
    return 32 * 1024 * 1024


def _pick_kc(cp):
    """Cin chunk (multiple of 128, divides Cp, <= 512) for weight residency."""
    if cp <= 512:
        return cp
    for kc in (512, 384, 256, 128):
        if cp % kc == 0:
            return kc
    return 128


def _choose_hb(h, w, kc, coutp, budget):
    """Largest row block whose (double-buffered) working set fits the budget."""
    def need(hb):
        in_blk = 2 * hb * (w + 2) * kc * 2            # main input block
        halo = 2 * 2 * (w + 2) * kc * 2               # 2-row halo block
        w_blk = 2 * 16 * kc * coutp * 2               # folded phase weights
        out_blk = 2 * hb * w * 4 * coutp * 4          # f32 phase-conv output
        tmp = (3 * (hb + 2) * w * kc * 2              # shifted window copies
               + hb * w * coutp * 4                   # one phase accumulator
               + hb * w * kc * 2)                     # one patch
        return in_blk + halo + w_blk + out_blk + tmp + (2 << 20)
    best = 1
    for hb in range(1, h + 1):
        if need(hb) <= budget:
            best = hb
    return best


# Row/col tap grouping of the 3x3 kernel under nearest x2 upsampling:
# phase 0 -> window offsets {0:(dy=0), 1:(dy=1,2)}, phase 1 -> {0:(dy=0,1), 1:(dy=2)}
_GROUPS = {0: ((0,), (1, 2)), 1: ((0, 1), (2,))}


def _fold_phase_weights(w_hwio):
    """Fold Upsample(x2, nearest) + Conv3x3 into 4 phase kernels.

    Returns (16, Cin, Cout), index = ((pi*2+pj)*2 + r)*2 + s, such that
    y[2*ii+pi, 2*jj+pj] = sum_{r,s in {0,1}} x_pad[ii+pi+r, jj+pj+s] @ w[idx]
    where x_pad is the original-resolution input zero-padded by 1.
    """
    mats = []
    for pi in range(2):
        for pj in range(2):
            for r in range(2):
                for s in range(2):
                    acc = jnp.zeros_like(w_hwio[0, 0])
                    for dy in _GROUPS[pi][r]:
                        for dx in _GROUPS[pj][s]:
                            acc = acc + w_hwio[dy, dx]
                    mats.append(acc)
    return jnp.stack(mats, axis=0)


def _make_conv_kernel(n_kc):
    single_k = (n_kc == 1)

    def kernel(main_ref, halo_ref, w_ref, yo_ref, st_ref):
        # main_ref: (1, hb, W+2, kc)     bf16  padded rows [b*hb, b*hb+hb)
        # halo_ref: (1, 1, 2, W+2, kc)   bf16  padded rows {b*hb+hb, b*hb+hb+1}
        # w_ref:    (16, kc, CoutP)      bf16  folded phase weights [pi,pj,r,s]
        # yo_ref:   (1, 1, hb, W, 4*CoutP) f32 conv pre-activation (phases on lanes)
        # st_ref:   (1, 1, 2, CoutP)     f32   per-block [sum, sum-of-squares]
        hb = yo_ref.shape[2]
        wid = yo_ref.shape[3]
        kc = main_ref.shape[3]
        coutp = st_ref.shape[3]
        k = pl.program_id(2)

        if not single_k:
            @pl.when(k == 0)
            def _():
                yo_ref[...] = jnp.zeros_like(yo_ref)

        main = main_ref[0]           # (hb, W+2, kc)
        halo = halo_ref[0, 0]        # (2,  W+2, kc)

        # Three column-shifted copies of the (hb+2)-row window (one per dx
        # offset), reused by every phase / row tap.
        # TODO(synk): on v6e/v7x pack tap pairs along the contraction dim
        # (K = 2*kc) to fill the 256-deep MXU; skip K-padding for tiny Cin.
        xs = [jnp.concatenate(
                  [main[:, b:b + wid, :], halo[:, b:b + wid, :]], axis=0)
              for b in range(3)]      # each (hb+2, W, kc)

        accs = []
        for pi in range(2):
            for pj in range(2):
                acc = None
                for r in range(2):
                    for s in range(2):
                        idx = ((pi * 2 + pj) * 2 + r) * 2 + s
                        patch = xs[pj + s][pi + r:pi + r + hb].reshape(hb * wid, kc)
                        t = jnp.dot(patch, w_ref[idx],
                                    preferred_element_type=jnp.float32)
                        acc = t if acc is None else acc + t
                p = pi * 2 + pj
                sl = slice(p * coutp, (p + 1) * coutp)
                if single_k:
                    yo_ref[0, 0, :, :, sl] = acc.reshape(hb, wid, coutp)
                else:
                    yo_ref[0, 0, :, :, sl] += acc.reshape(hb, wid, coutp)
                accs.append(acc)

        # Per-block per-channel sum / sum-of-squares (all 4 phases) for the
        # global training-mode BN statistics.
        # TODO(synk): per-block (count, mean, M2) + Chan combine would avoid
        # E[x^2]-E[x]^2 cancellation at very large spatial extents.
        def _stats(vals):
            ssum = jnp.zeros((1, coutp), jnp.float32)
            ssq = jnp.zeros((1, coutp), jnp.float32)
            for v in vals:
                ssum = ssum + jnp.sum(v, axis=0, keepdims=True)
                ssq = ssq + jnp.sum(v * v, axis=0, keepdims=True)
            st_ref[0, 0, 0:1, :] = ssum
            st_ref[0, 0, 1:2, :] = ssq

        if single_k:
            _stats(accs)
        else:
            @pl.when(k == n_kc - 1)
            def _():
                _stats([yo_ref[0, 0, :, :, p * coutp:(p + 1) * coutp]
                        .reshape(hb * wid, coutp) for p in range(4)])

    return kernel


def up_conv_forward(x_nchw, params):
    """up_conv forward (Upsample x2 -> Conv3x3+bias -> train-mode BN -> ReLU).

    Input / output NCHW float32.
    """
    w_hwio = params["w"]                              # (3, 3, Cin, Cout)
    gamma, beta = params["gamma"], params["beta"]
    N, Cin, H, W = x_nchw.shape
    Cout = w_hwio.shape[-1]
    Cp = _round_up(Cin, _LANES)
    CoutP = _round_up(Cout, _LANES)
    kc = _pick_kc(Cp)
    n_kc = Cp // kc

    vmem_limit = _vmem_limit_bytes()
    hb = _choose_hb(H, W, kc, CoutP, int(0.7 * vmem_limit))
    nHB = pl.cdiv(H, hb)
    Hp = nHB * hb                                     # extra rows are zeros

    # ---- input prep (fused XLA producer: transpose / pad / cast) -------------
    # NOTE: best layouts assume W % 8 == 0 (else in-kernel reshapes relayout).
    xh = jnp.transpose(x_nchw, (0, 2, 3, 1))                         # NHWC
    xh = jnp.pad(xh, ((0, 0), (1, 1 + (Hp - H)), (1, 1), (0, Cp - Cin)))
    xh = xh.astype(jnp.bfloat16)                                     # (N,Hp+2,W+2,Cp)
    main = xh[:, :Hp]                                                # (N,Hp,  W+2,Cp)
    starts = jnp.arange(nHB) * hb + hb
    rows = jnp.stack([starts, starts + 1], axis=1)                   # (nHB, 2)
    halo = xh[:, rows]                                               # (N,nHB,2,W+2,Cp)

    # Folded phase weights.  Conv bias deliberately dropped: cancelled exactly
    # by the training-mode BN mean subtraction.
    wp = _fold_phase_weights(w_hwio)                                 # (16,Cin,Cout)
    wp = jnp.pad(wp, ((0, 0), (0, Cp - Cin), (0, CoutP - Cout)))
    wp = wp.astype(jnp.bfloat16)                                     # (16,Cp,CoutP)

    # ---- Pallas: phase-decomposed conv + per-block per-channel stats ---------
    flops = 2 * 16 * N * Hp * W * Cp * CoutP
    bytes_accessed = (main.size * 2 + halo.size * 2 + wp.size * 2
                      + N * nHB * hb * W * 4 * CoutP * 4 + N * nHB * 2 * CoutP * 4)
    yo, st = pl.pallas_call(
        _make_conv_kernel(n_kc),
        out_shape=(
            jax.ShapeDtypeStruct((N, nHB, hb, W, 4 * CoutP), jnp.float32),
            jax.ShapeDtypeStruct((N, nHB, 2, CoutP), jnp.float32),
        ),
        grid=(N, nHB, n_kc),
        in_specs=[
            pl.BlockSpec((1, hb, W + 2, kc), lambda n, b, k: (n, b, 0, k)),
            pl.BlockSpec((1, 1, 2, W + 2, kc), lambda n, b, k: (n, b, 0, 0, k)),
            pl.BlockSpec((16, kc, CoutP), lambda n, b, k: (0, k, 0)),
        ],
        out_specs=(
            pl.BlockSpec((1, 1, hb, W, 4 * CoutP), lambda n, b, k: (n, b, 0, 0, 0)),
            pl.BlockSpec((1, 1, 2, CoutP), lambda n, b, k: (n, b, 0, 0)),
        ),
        compiler_params=pltpu.CompilerParams(
            dimension_semantics=("parallel", "parallel", "arbitrary"),
            vmem_limit_bytes=vmem_limit),
        cost_estimate=pl.CostEstimate(
            flops=flops, transcendentals=0, bytes_accessed=bytes_accessed),
    )(main, halo, wp)

    # ---- tiny global BN reduction (scalar-sized JAX) --------------------------
    cnt = jnp.float32(N * (2 * H) * (2 * W))          # padded rows contribute 0
    tot = jnp.sum(st, axis=(0, 1))                    # (2, CoutP)
    mean = tot[0, :Cout] / cnt
    var = jnp.maximum(tot[1, :Cout] / cnt - mean * mean, 0.0)
    scale = gamma.astype(jnp.float32) * jax.lax.rsqrt(var + _EPS)
    shift = beta.astype(jnp.float32) - mean * scale

    # ---- single fused XLA epilogue: BN affine + ReLU + phase interleave +
    # channel slice + NHWC -> NCHW (replaces the old memory-bound Pallas pass 2)
    y = yo.reshape(N, Hp, W, 2, 2, CoutP)[:, :H, :, :, :, :Cout]
    y = jnp.maximum(y * scale + shift, 0.0)
    out = jnp.transpose(y, (0, 5, 1, 3, 2, 4)).reshape(N, Cout, 2 * H, 2 * W)
    return out


def init_params(key, in_ch, out_ch):
    """Parameters matching the PyTorch module (weights stored HWIO)."""
    k1, k2, k3, k4 = jax.random.split(key, 4)
    w_oihw = jax.random.normal(k1, (out_ch, in_ch, 3, 3), jnp.float32) * 0.1
    params = {
        "w": jnp.transpose(w_oihw, (2, 3, 1, 0)),                   # HWIO
        "b": jax.random.normal(k2, (out_ch,), jnp.float32) * 0.1,   # cancelled by BN
        "gamma": 1.0 + 0.1 * jax.random.normal(k3, (out_ch,), jnp.float32),
        "beta": 0.1 * jax.random.normal(k4, (out_ch,), jnp.float32),
    }
    return params, w_oihw


def _ref_up_conv(x_nchw, w_oihw, bias, gamma, beta):
    """Pure-JAX reference of the PyTorch module (bf16-rounded operands)."""
    xb = x_nchw.astype(jnp.bfloat16).astype(jnp.float32)
    wb = w_oihw.astype(jnp.bfloat16).astype(jnp.float32)
    xu = jnp.repeat(jnp.repeat(xb, 2, axis=2), 2, axis=3)
    y = jax.lax.conv_general_dilated(
        xu, wb, window_strides=(1, 1), padding=((1, 1), (1, 1)),
        dimension_numbers=("NCHW", "OIHW", "NCHW"))
    y = y + bias[None, :, None, None]
    mean = jnp.mean(y, axis=(0, 2, 3), keepdims=True)
    var = jnp.mean((y - mean) ** 2, axis=(0, 2, 3), keepdims=True)
    y = (y - mean) * jax.lax.rsqrt(var + _EPS)
    y = y * gamma[None, :, None, None] + beta[None, :, None, None]
    return jnp.maximum(y, 0.0)


if __name__ == "__main__":
    key = jax.random.PRNGKey(0)
    kx, kp = jax.random.split(key)

    N, in_ch, out_ch, H, W = 2, 4, 8, 16, 16
    x = jax.random.normal(kx, (N, in_ch, H, W), jnp.float32)
    params, w_oihw = init_params(kp, in_ch, out_ch)

    out = jax.jit(up_conv_forward)(x, params)
    out = jax.block_until_ready(out)
    assert out.shape == (N, out_ch, 2 * H, 2 * W), out.shape

    ref = _ref_up_conv(x, w_oihw, params["b"], params["gamma"], params["beta"])
    max_err = float(jnp.max(jnp.abs(out - ref)))
    # bf16 operands plus the single extra bf16 rounding of the folded phase
    # weights bound the post-BN error well below 2e-2 at these shapes.
    assert max_err < 2e-2, max_err

    print("KERNEL_OK")
</pallas_src>

<mosaic_0001>
module attributes {stable_mosaic.version = 11 : i64} {
  func.func @kernel(%arg0: i32, %arg1: i32, %arg2: i32, %arg3: memref<1x16x18x128xbf16, #tpu.memory_space<vmem>>, %arg4: memref<1x1x2x18x128xbf16, #tpu.memory_space<vmem>>, %arg5: memref<16x128x128xbf16, #tpu.memory_space<vmem>>, %arg6: memref<1x1x16x16x512xf32, #tpu.memory_space<vmem>>, %arg7: memref<1x1x2x128xf32, #tpu.memory_space<vmem>>) attributes {dimension_semantics = [#tpu.dimension_semantics<parallel>, #tpu.dimension_semantics<parallel>, #tpu.dimension_semantics<arbitrary>], iteration_bounds = array<i64: 2, 1, 1>, scalar_prefetch = 0 : i64, scratch_operands = 0 : i64, tpu.core_type = #tpu.core_type<tc>, window_params = [{transform_indices = @transform_0, window_bounds = array<i64: 1, 16, 18, 128>}, {transform_indices = @transform_1, window_bounds = array<i64: 1, 1, 2, 18, 128>}, {transform_indices = @transform_2, window_bounds = array<i64: 16, 128, 128>}, {transform_indices = @transform_3, window_bounds = array<i64: 1, 1, 16, 16, 512>}, {transform_indices = @transform_4, window_bounds = array<i64: 1, 1, 2, 128>}]} {
    %c0 = arith.constant 0 : index
    %c0_0 = arith.constant 0 : index
    %c0_1 = arith.constant 0 : index
    %c0_2 = arith.constant 0 : index
    %0 = vector.load %arg3[%c0, %c0_0, %c0_1, %c0_2] : memref<1x16x18x128xbf16, #tpu.memory_space<vmem>>, vector<1x16x18x128xbf16>
    %1 = vector.shape_cast %0 : vector<1x16x18x128xbf16> to vector<16x18x128xbf16>
    %c0_3 = arith.constant 0 : index
    %c0_4 = arith.constant 0 : index
    %c0_5 = arith.constant 0 : index
    %c0_6 = arith.constant 0 : index
    %c0_7 = arith.constant 0 : index
    %2 = vector.load %arg4[%c0_3, %c0_4, %c0_5, %c0_6, %c0_7] : memref<1x1x2x18x128xbf16, #tpu.memory_space<vmem>>, vector<1x1x2x18x128xbf16>
    %3 = vector.shape_cast %2 : vector<1x1x2x18x128xbf16> to vector<2x18x128xbf16>
    %4 = vector.extract_strided_slice %1 {offsets = [0, 0, 0], sizes = [16, 16, 128], strides = [1, 1, 1]} : vector<16x18x128xbf16> to vector<16x16x128xbf16>
    %5 = vector.extract_strided_slice %3 {offsets = [0, 0, 0], sizes = [2, 16, 128], strides = [1, 1, 1]} : vector<2x18x128xbf16> to vector<2x16x128xbf16>
    %6 = tpu.concatenate %4, %5 in 0 : vector<16x16x128xbf16>, vector<2x16x128xbf16> -> vector<18x16x128xbf16>
    %7 = vector.extract_strided_slice %1 {offsets = [0, 1, 0], sizes = [16, 16, 128], strides = [1, 1, 1]} : vector<16x18x128xbf16> to vector<16x16x128xbf16>
    %8 = vector.extract_strided_slice %3 {offsets = [0, 1, 0], sizes = [2, 16, 128], strides = [1, 1, 1]} : vector<2x18x128xbf16> to vector<2x16x128xbf16>
    %9 = tpu.concatenate %7, %8 in 0 : vector<16x16x128xbf16>, vector<2x16x128xbf16> -> vector<18x16x128xbf16>
    %10 = vector.extract_strided_slice %1 {offsets = [0, 2, 0], sizes = [16, 16, 128], strides = [1, 1, 1]} : vector<16x18x128xbf16> to vector<16x16x128xbf16>
    %11 = vector.extract_strided_slice %3 {offsets = [0, 2, 0], sizes = [2, 16, 128], strides = [1, 1, 1]} : vector<2x18x128xbf16> to vector<2x16x128xbf16>
    %12 = tpu.concatenate %10, %11 in 0 : vector<16x16x128xbf16>, vector<2x16x128xbf16> -> vector<18x16x128xbf16>
    %13 = vector.extract_strided_slice %6 {offsets = [0, 0, 0], sizes = [16, 16, 128], strides = [1, 1, 1]} : vector<18x16x128xbf16> to vector<16x16x128xbf16>
    %14 = vector.shape_cast %13 : vector<16x16x128xbf16> to vector<256x128xbf16>
    %c0_8 = arith.constant 0 : index
    %c0_9 = arith.constant 0 : index
    %c0_10 = arith.constant 0 : index
    %15 = vector.load %arg5[%c0_8, %c0_9, %c0_10] : memref<16x128x128xbf16, #tpu.memory_space<vmem>>, vector<1x128x128xbf16>
    %16 = vector.shape_cast %15 : vector<1x128x128xbf16> to vector<128x128xbf16>
    %cst = arith.constant dense<0.000000e+00> : vector<256x128xf32>
    %17 = tpu.matmul %14, %16, %cst {dimension_numbers = #tpu.dot_dimension_numbers<[1], [0], [0], [1], [0, 0, 1, 1], [], []>} : vector<256x128xbf16>, vector<128x128xbf16>, vector<256x128xf32> -> vector<256x128xf32>
    %18 = vector.extract_strided_slice %9 {offsets = [0, 0, 0], sizes = [16, 16, 128], strides = [1, 1, 1]} : vector<18x16x128xbf16> to vector<16x16x128xbf16>
    %19 = vector.shape_cast %18 : vector<16x16x128xbf16> to vector<256x128xbf16>
    %c1 = arith.constant 1 : index
    %c0_11 = arith.constant 0 : index
    %c0_12 = arith.constant 0 : index
    %20 = vector.load %arg5[%c1, %c0_11, %c0_12] : memref<16x128x128xbf16, #tpu.memory_space<vmem>>, vector<1x128x128xbf16>
    %21 = vector.shape_cast %20 : vector<1x128x128xbf16> to vector<128x128xbf16>
    %cst_13 = arith.constant dense<0.000000e+00> : vector<256x128xf32>
    %22 = tpu.matmul %19, %21, %cst_13 {dimension_numbers = #tpu.dot_dimension_numbers<[1], [0], [0], [1], [0, 0, 1, 1], [], []>} : vector<256x128xbf16>, vector<128x128xbf16>, vector<256x128xf32> -> vector<256x128xf32>
    %23 = arith.addf %17, %22 : vector<256x128xf32>
    %24 = vector.extract_strided_slice %6 {offsets = [1, 0, 0], sizes = [16, 16, 128], strides = [1, 1, 1]} : vector<18x16x128xbf16> to vector<16x16x128xbf16>
    %25 = vector.shape_cast %24 : vector<16x16x128xbf16> to vector<256x128xbf16>
    %c2 = arith.constant 2 : index
    %c0_14 = arith.constant 0 : index
    %c0_15 = arith.constant 0 : index
    %26 = vector.load %arg5[%c2, %c0_14, %c0_15] : memref<16x128x128xbf16, #tpu.memory_space<vmem>>, vector<1x128x128xbf16>
    %27 = vector.shape_cast %26 : vector<1x128x128xbf16> to vector<128x128xbf16>
    %cst_16 = arith.constant dense<0.000000e+00> : vector<256x128xf32>
    %28 = tpu.matmul %25, %27, %cst_16 {dimension_numbers = #tpu.dot_dimension_numbers<[1], [0], [0], [1], [0, 0, 1, 1], [], []>} : vector<256x128xbf16>, vector<128x128xbf16>, vector<256x128xf32> -> vector<256x128xf32>
    %29 = arith.addf %23, %28 : vector<256x128xf32>
    %30 = vector.extract_strided_slice %9 {offsets = [1, 0, 0], sizes = [16, 16, 128], strides = [1, 1, 1]} : vector<18x16x128xbf16> to vector<16x16x128xbf16>
    %31 = vector.shape_cast %30 : vector<16x16x128xbf16> to vector<256x128xbf16>
    %c3 = arith.constant 3 : index
    %c0_17 = arith.constant 0 : index
    %c0_18 = arith.constant 0 : index
    %32 = vector.load %arg5[%c3, %c0_17, %c0_18] : memref<16x128x128xbf16, #tpu.memory_space<vmem>>, vector<1x128x128xbf16>
    %33 = vector.shape_cast %32 : vector<1x128x128xbf16> to vector<128x128xbf16>
    %cst_19 = arith.constant dense<0.000000e+00> : vector<256x128xf32>
    %34 = tpu.matmul %31, %33, %cst_19 {dimension_numbers = #tpu.dot_dimension_numbers<[1], [0], [0], [1], [0, 0, 1, 1], [], []>} : vector<256x128xbf16>, vector<128x128xbf16>, vector<256x128xf32> -> vector<256x128xf32>
    %35 = arith.addf %29, %34 : vector<256x128xf32>
    %36 = vector.shape_cast %35 : vector<256x128xf32> to vector<16x16x128xf32>
    %c0_20 = arith.constant 0 : index
    %c0_21 = arith.constant 0 : index
    %c0_22 = arith.constant 0 : index
    %c0_23 = arith.constant 0 : index
    %c0_24 = arith.constant 0 : index
    %37 = vector.load %arg6[%c0_20, %c0_21, %c0_22, %c0_23, %c0_24] : memref<1x1x16x16x512xf32, #tpu.memory_space<vmem>>, vector<1x1x16x16x128xf32>
    %38 = vector.shape_cast %37 : vector<1x1x16x16x128xf32> to vector<16x16x128xf32>
    %39 = vector.shape_cast %36 : vector<16x16x128xf32> to vector<1x1x16x16x128xf32>
    tpu.vector_store %arg6[%c0_20, %c0_21, %c0_22, %c0_23, %c0_24], %39 {strides = array<i32>} : memref<1x1x16x16x512xf32, #tpu.memory_space<vmem>>, vector<1x1x16x16x128xf32>,
    %40 = vector.extract_strided_slice %9 {offsets = [0, 0, 0], sizes = [16, 16, 128], strides = [1, 1, 1]} : vector<18x16x128xbf16> to vector<16x16x128xbf16>
    %41 = vector.shape_cast %40 : vector<16x16x128xbf16> to vector<256x128xbf16>
    %c4 = arith.constant 4 : index
    %c0_25 = arith.constant 0 : index
    %c0_26 = arith.constant 0 : index
    %42 = vector.load %arg5[%c4, %c0_25, %c0_26] : memref<16x128x128xbf16, #tpu.memory_space<vmem>>, vector<1x128x128xbf16>
    %43 = vector.shape_cast %42 : vector<1x128x128xbf16> to vector<128x128xbf16>
    %cst_27 = arith.constant dense<0.000000e+00> : vector<256x128xf32>
    %44 = tpu.matmul %41, %43, %cst_27 {dimension_numbers = #tpu.dot_dimension_numbers<[1], [0], [0], [1], [0, 0, 1, 1], [], []>} : vector<256x128xbf16>, vector<128x128xbf16>, vector<256x128xf32> -> vector<256x128xf32>
    %45 = vector.extract_strided_slice %12 {offsets = [0, 0, 0], sizes = [16, 16, 128], strides = [1, 1, 1]} : vector<18x16x128xbf16> to vector<16x16x128xbf16>
    %46 = vector.shape_cast %45 : vector<16x16x128xbf16> to vector<256x128xbf16>
    %c5 = arith.constant 5 : index
    %c0_28 = arith.constant 0 : index
    %c0_29 = arith.constant 0 : index
    %47 = vector.load %arg5[%c5, %c0_28, %c0_29] : memref<16x128x128xbf16, #tpu.memory_space<vmem>>, vector<1x128x128xbf16>
    %48 = vector.shape_cast %47 : vector<1x128x128xbf16> to vector<128x128xbf16>
    %cst_30 = arith.constant dense<0.000000e+00> : vector<256x128xf32>
    %49 = tpu.matmul %46, %48, %cst_30 {dimension_numbers = #tpu.dot_dimension_numbers<[1], [0], [0], [1], [0, 0, 1, 1], [], []>} : vector<256x128xbf16>, vector<128x128xbf16>, vector<256x128xf32> -> vector<256x128xf32>
    %50 = arith.addf %44, %49 : vector<256x128xf32>
    %51 = vector.extract_strided_slice %9 {offsets = [1, 0, 0], sizes = [16, 16, 128], strides = [1, 1, 1]} : vector<18x16x128xbf16> to vector<16x16x128xbf16>
    %52 = vector.shape_cast %51 : vector<16x16x128xbf16> to vector<256x128xbf16>
    %c6 = arith.constant 6 : index
    %c0_31 = arith.constant 0 : index
    %c0_32 = arith.constant 0 : index
    %53 = vector.load %arg5[%c6, %c0_31, %c0_32] : memref<16x128x128xbf16, #tpu.memory_space<vmem>>, vector<1x128x128xbf16>
    %54 = vector.shape_cast %53 : vector<1x128x128xbf16> to vector<128x128xbf16>
    %cst_33 = arith.constant dense<0.000000e+00> : vector<256x128xf32>
    %55 = tpu.matmul %52, %54, %cst_33 {dimension_numbers = #tpu.dot_dimension_numbers<[1], [0], [0], [1], [0, 0, 1, 1], [], []>} : vector<256x128xbf16>, vector<128x128xbf16>, vector<256x128xf32> -> vector<256x128xf32>
    %56 = arith.addf %50, %55 : vector<256x128xf32>
    %57 = vector.extract_strided_slice %12 {offsets = [1, 0, 0], sizes = [16, 16, 128], strides = [1, 1, 1]} : vector<18x16x128xbf16> to vector<16x16x128xbf16>
    %58 = vector.shape_cast %57 : vector<16x16x128xbf16> to vector<256x128xbf16>
    %c7 = arith.constant 7 : index
    %c0_34 = arith.constant 0 : index
    %c0_35 = arith.constant 0 : index
    %59 = vector.load %arg5[%c7, %c0_34, %c0_35] : memref<16x128x128xbf16, #tpu.memory_space<vmem>>, vector<1x128x128xbf16>
    %60 = vector.shape_cast %59 : vector<1x128x128xbf16> to vector<128x128xbf16>
    %cst_36 = arith.constant dense<0.000000e+00> : vector<256x128xf32>
    %61 = tpu.matmul %58, %60, %cst_36 {dimension_numbers = #tpu.dot_dimension_numbers<[1], [0], [0], [1], [0, 0, 1, 1], [], []>} : vector<256x128xbf16>, vector<128x128xbf16>, vector<256x128xf32> -> vector<256x128xf32>
    %62 = arith.addf %56, %61 : vector<256x128xf32>
    %63 = vector.shape_cast %62 : vector<256x128xf32> to vector<16x16x128xf32>
    %c0_37 = arith.constant 0 : index
    %c0_38 = arith.constant 0 : index
    %c0_39 = arith.constant 0 : index
    %c0_40 = arith.constant 0 : index
    %c128 = arith.constant 128 : index
    %64 = vector.load %arg6[%c0_37, %c0_38, %c0_39, %c0_40, %c128] : memref<1x1x16x16x512xf32, #tpu.memory_space<vmem>>, vector<1x1x16x16x128xf32>
    %65 = vector.shape_cast %64 : vector<1x1x16x16x128xf32> to vector<16x16x128xf32>
    %66 = vector.shape_cast %63 : vector<16x16x128xf32> to vector<1x1x16x16x128xf32>
    tpu.vector_store %arg6[%c0_37, %c0_38, %c0_39, %c0_40, %c128], %66 {strides = array<i32>} : memref<1x1x16x16x512xf32, #tpu.memory_space<vmem>>, vector<1x1x16x16x128xf32>,
    %67 = vector.extract_strided_slice %6 {offsets = [1, 0, 0], sizes = [16, 16, 128], strides = [1, 1, 1]} : vector<18x16x128xbf16> to vector<16x16x128xbf16>
    %68 = vector.shape_cast %67 : vector<16x16x128xbf16> to vector<256x128xbf16>
    %c8 = arith.constant 8 : index
    %c0_41 = arith.constant 0 : index
    %c0_42 = arith.constant 0 : index
    %69 = vector.load %arg5[%c8, %c0_41, %c0_42] : memref<16x128x128xbf16, #tpu.memory_space<vmem>>, vector<1x128x128xbf16>
    %70 = vector.shape_cast %69 : vector<1x128x128xbf16> to vector<128x128xbf16>
    %cst_43 = arith.constant dense<0.000000e+00> : vector<256x128xf32>
    %71 = tpu.matmul %68, %70, %cst_43 {dimension_numbers = #tpu.dot_dimension_numbers<[1], [0], [0], [1], [0, 0, 1, 1], [], []>} : vector<256x128xbf16>, vector<128x128xbf16>, vector<256x128xf32> -> vector<256x128xf32>
    %72 = vector.extract_strided_slice %9 {offsets = [1, 0, 0], sizes = [16, 16, 128], strides = [1, 1, 1]} : vector<18x16x128xbf16> to vector<16x16x128xbf16>
    %73 = vector.shape_cast %72 : vector<16x16x128xbf16> to vector<256x128xbf16>
    %c9 = arith.constant 9 : index
    %c0_44 = arith.constant 0 : index
    %c0_45 = arith.constant 0 : index
    %74 = vector.load %arg5[%c9, %c0_44, %c0_45] : memref<16x128x128xbf16, #tpu.memory_space<vmem>>, vector<1x128x128xbf16>
    %75 = vector.shape_cast %74 : vector<1x128x128xbf16> to vector<128x128xbf16>
    %cst_46 = arith.constant dense<0.000000e+00> : vector<256x128xf32>
    %76 = tpu.matmul %73, %75, %cst_46 {dimension_numbers = #tpu.dot_dimension_numbers<[1], [0], [0], [1], [0, 0, 1, 1], [], []>} : vector<256x128xbf16>, vector<128x128xbf16>, vector<256x128xf32> -> vector<256x128xf32>
    %77 = arith.addf %71, %76 : vector<256x128xf32>
    %78 = vector.extract_strided_slice %6 {offsets = [2, 0, 0], sizes = [16, 16, 128], strides = [1, 1, 1]} : vector<18x16x128xbf16> to vector<16x16x128xbf16>
    %79 = vector.shape_cast %78 : vector<16x16x128xbf16> to vector<256x128xbf16>
    %c10 = arith.constant 10 : index
    %c0_47 = arith.constant 0 : index
    %c0_48 = arith.constant 0 : index
    %80 = vector.load %arg5[%c10, %c0_47, %c0_48] : memref<16x128x128xbf16, #tpu.memory_space<vmem>>, vector<1x128x128xbf16>
    %81 = vector.shape_cast %80 : vector<1x128x128xbf16> to vector<128x128xbf16>
    %cst_49 = arith.constant dense<0.000000e+00> : vector<256x128xf32>
    %82 = tpu.matmul %79, %81, %cst_49 {dimension_numbers = #tpu.dot_dimension_numbers<[1], [0], [0], [1], [0, 0, 1, 1], [], []>} : vector<256x128xbf16>, vector<128x128xbf16>, vector<256x128xf32> -> vector<256x128xf32>
    %83 = arith.addf %77, %82 : vector<256x128xf32>
    %84 = vector.extract_strided_slice %9 {offsets = [2, 0, 0], sizes = [16, 16, 128], strides = [1, 1, 1]} : vector<18x16x128xbf16> to vector<16x16x128xbf16>
    %85 = vector.shape_cast %84 : vector<16x16x128xbf16> to vector<256x128xbf16>
    %c11 = arith.constant 11 : index
    %c0_50 = arith.constant 0 : index
    %c0_51 = arith.constant 0 : index
    %86 = vector.load %arg5[%c11, %c0_50, %c0_51] : memref<16x128x128xbf16, #tpu.memory_space<vmem>>, vector<1x128x128xbf16>
    %87 = vector.shape_cast %86 : vector<1x128x128xbf16> to vector<128x128xbf16>
    %cst_52 = arith.constant dense<0.000000e+00> : vector<256x128xf32>
    %88 = tpu.matmul %85, %87, %cst_52 {dimension_numbers = #tpu.dot_dimension_numbers<[1], [0], [0], [1], [0, 0, 1, 1], [], []>} : vector<256x128xbf16>, vector<128x128xbf16>, vector<256x128xf32> -> vector<256x128xf32>
    %89 = arith.addf %83, %88 : vector<256x128xf32>
    %90 = vector.shape_cast %89 : vector<256x128xf32> to vector<16x16x128xf32>
    %c0_53 = arith.constant 0 : index
    %c0_54 = arith.constant 0 : index
    %c0_55 = arith.constant 0 : index
    %c0_56 = arith.constant 0 : index
    %c256 = arith.constant 256 : index
    %91 = vector.load %arg6[%c0_53, %c0_54, %c0_55, %c0_56, %c256] : memref<1x1x16x16x512xf32, #tpu.memory_space<vmem>>, vector<1x1x16x16x128xf32>
    %92 = vector.shape_cast %91 : vector<1x1x16x16x128xf32> to vector<16x16x128xf32>
    %93 = vector.shape_cast %90 : vector<16x16x128xf32> to vector<1x1x16x16x128xf32>
    tpu.vector_store %arg6[%c0_53, %c0_54, %c0_55, %c0_56, %c256], %93 {strides = array<i32>} : memref<1x1x16x16x512xf32, #tpu.memory_space<vmem>>, vector<1x1x16x16x128xf32>,
    %94 = vector.extract_strided_slice %9 {offsets = [1, 0, 0], sizes = [16, 16, 128], strides = [1, 1, 1]} : vector<18x16x128xbf16> to vector<16x16x128xbf16>
    %95 = vector.shape_cast %94 : vector<16x16x128xbf16> to vector<256x128xbf16>
    %c12 = arith.constant 12 : index
    %c0_57 = arith.constant 0 : index
    %c0_58 = arith.constant 0 : index
    %96 = vector.load %arg5[%c12, %c0_57, %c0_58] : memref<16x128x128xbf16, #tpu.memory_space<vmem>>, vector<1x128x128xbf16>
    %97 = vector.shape_cast %96 : vector<1x128x128xbf16> to vector<128x128xbf16>
    %cst_59 = arith.constant dense<0.000000e+00> : vector<256x128xf32>
    %98 = tpu.matmul %95, %97, %cst_59 {dimension_numbers = #tpu.dot_dimension_numbers<[1], [0], [0], [1], [0, 0, 1, 1], [], []>} : vector<256x128xbf16>, vector<128x128xbf16>, vector<256x128xf32> -> vector<256x128xf32>
    %99 = vector.extract_strided_slice %12 {offsets = [1, 0, 0], sizes = [16, 16, 128], strides = [1, 1, 1]} : vector<18x16x128xbf16> to vector<16x16x128xbf16>
    %100 = vector.shape_cast %99 : vector<16x16x128xbf16> to vector<256x128xbf16>
    %c13 = arith.constant 13 : index
    %c0_60 = arith.constant 0 : index
    %c0_61 = arith.constant 0 : index
    %101 = vector.load %arg5[%c13, %c0_60, %c0_61] : memref<16x128x128xbf16, #tpu.memory_space<vmem>>, vector<1x128x128xbf16>
    %102 = vector.shape_cast %101 : vector<1x128x128xbf16> to vector<128x128xbf16>
    %cst_62 = arith.constant dense<0.000000e+00> : vector<256x128xf32>
    %103 = tpu.matmul %100, %102, %cst_62 {dimension_numbers = #tpu.dot_dimension_numbers<[1], [0], [0], [1], [0, 0, 1, 1], [], []>} : vector<256x128xbf16>, vector<128x128xbf16>, vector<256x128xf32> -> vector<256x128xf32>
    %104 = arith.addf %98, %103 : vector<256x128xf32>
    %105 = vector.extract_strided_slice %9 {offsets = [2, 0, 0], sizes = [16, 16, 128], strides = [1, 1, 1]} : vector<18x16x128xbf16> to vector<16x16x128xbf16>
    %106 = vector.shape_cast %105 : vector<16x16x128xbf16> to vector<256x128xbf16>
    %c14 = arith.constant 14 : index
    %c0_63 = arith.constant 0 : index
    %c0_64 = arith.constant 0 : index
    %107 = vector.load %arg5[%c14, %c0_63, %c0_64] : memref<16x128x128xbf16, #tpu.memory_space<vmem>>, vector<1x128x128xbf16>
    %108 = vector.shape_cast %107 : vector<1x128x128xbf16> to vector<128x128xbf16>
    %cst_65 = arith.constant dense<0.000000e+00> : vector<256x128xf32>
    %109 = tpu.matmul %106, %108, %cst_65 {dimension_numbers = #tpu.dot_dimension_numbers<[1], [0], [0], [1], [0, 0, 1, 1], [], []>} : vector<256x128xbf16>, vector<128x128xbf16>, vector<256x128xf32> -> vector<256x128xf32>
    %110 = arith.addf %104, %109 : vector<256x128xf32>
    %111 = vector.extract_strided_slice %12 {offsets = [2, 0, 0], sizes = [16, 16, 128], strides = [1, 1, 1]} : vector<18x16x128xbf16> to vector<16x16x128xbf16>
    %112 = vector.shape_cast %111 : vector<16x16x128xbf16> to vector<256x128xbf16>
    %c15 = arith.constant 15 : index
    %c0_66 = arith.constant 0 : index
    %c0_67 = arith.constant 0 : index
    %113 = vector.load %arg5[%c15, %c0_66, %c0_67] : memref<16x128x128xbf16, #tpu.memory_space<vmem>>, vector<1x128x128xbf16>
    %114 = vector.shape_cast %113 : vector<1x128x128xbf16> to vector<128x128xbf16>
    %cst_68 = arith.constant dense<0.000000e+00> : vector<256x128xf32>
    %115 = tpu.matmul %112, %114, %cst_68 {dimension_numbers = #tpu.dot_dimension_numbers<[1], [0], [0], [1], [0, 0, 1, 1], [], []>} : vector<256x128xbf16>, vector<128x128xbf16>, vector<256x128xf32> -> vector<256x128xf32>
    %116 = arith.addf %110, %115 : vector<256x128xf32>
    %117 = vector.shape_cast %116 : vector<256x128xf32> to vector<16x16x128xf32>
    %c0_69 = arith.constant 0 : index
    %c0_70 = arith.constant 0 : index
    %c0_71 = arith.constant 0 : index
    %c0_72 = arith.constant 0 : index
    %c384 = arith.constant 384 : index
    %118 = vector.load %arg6[%c0_69, %c0_70, %c0_71, %c0_72, %c384] : memref<1x1x16x16x512xf32, #tpu.memory_space<vmem>>, vector<1x1x16x16x128xf32>
    %119 = vector.shape_cast %118 : vector<1x1x16x16x128xf32> to vector<16x16x128xf32>
    %120 = vector.shape_cast %117 : vector<16x16x128xf32> to vector<1x1x16x16x128xf32>
    tpu.vector_store %arg6[%c0_69, %c0_70, %c0_71, %c0_72, %c384], %120 {strides = array<i32>} : memref<1x1x16x16x512xf32, #tpu.memory_space<vmem>>, vector<1x1x16x16x128xf32>,
    %cst_73 = arith.constant 0.000000e+00 : f32
    %121 = vector.broadcast %cst_73 : f32 to vector<1x128xf32>
    %cst_74 = arith.constant 0.000000e+00 : f32
    %122 = vector.broadcast %cst_74 : f32 to vector<1x128xf32>
    %cst_75 = arith.constant dense<0.000000e+00> : vector<128xf32>
    %123 = vector.multi_reduction <add>, %35, %cst_75 [0] : vector<256x128xf32> to vector<128xf32>
    %124 = vector.shape_cast %123 : vector<128xf32> to vector<1x128xf32>
    %125 = arith.addf %121, %124 : vector<1x128xf32>
    %126 = arith.mulf %35, %35 : vector<256x128xf32>
    %cst_76 = arith.constant dense<0.000000e+00> : vector<128xf32>
    %127 = vector.multi_reduction <add>, %126, %cst_76 [0] : vector<256x128xf32> to vector<128xf32>
    %128 = vector.shape_cast %127 : vector<128xf32> to vector<1x128xf32>
    %129 = arith.addf %122, %128 : vector<1x128xf32>
    %cst_77 = arith.constant dense<0.000000e+00> : vector<128xf32>
    %130 = vector.multi_reduction <add>, %62, %cst_77 [0] : vector<256x128xf32> to vector<128xf32>
    %131 = vector.shape_cast %130 : vector<128xf32> to vector<1x128xf32>
    %132 = arith.addf %125, %131 : vector<1x128xf32>
    %133 = arith.mulf %62, %62 : vector<256x128xf32>
    %cst_78 = arith.constant dense<0.000000e+00> : vector<128xf32>
    %134 = vector.multi_reduction <add>, %133, %cst_78 [0] : vector<256x128xf32> to vector<128xf32>
    %135 = vector.shape_cast %134 : vector<128xf32> to vector<1x128xf32>
    %136 = arith.addf %129, %135 : vector<1x128xf32>
    %cst_79 = arith.constant dense<0.000000e+00> : vector<128xf32>
    %137 = vector.multi_reduction <add>, %89, %cst_79 [0] : vector<256x128xf32> to vector<128xf32>
    %138 = vector.shape_cast %137 : vector<128xf32> to vector<1x128xf32>
    %139 = arith.addf %132, %138 : vector<1x128xf32>
    %140 = arith.mulf %89, %89 : vector<256x128xf32>
    %cst_80 = arith.constant dense<0.000000e+00> : vector<128xf32>
    %141 = vector.multi_reduction <add>, %140, %cst_80 [0] : vector<256x128xf32> to vector<128xf32>
    %142 = vector.shape_cast %141 : vector<128xf32> to vector<1x128xf32>
    %143 = arith.addf %136, %142 : vector<1x128xf32>
    %cst_81 = arith.constant dense<0.000000e+00> : vector<128xf32>
    %144 = vector.multi_reduction <add>, %116, %cst_81 [0] : vector<256x128xf32> to vector<128xf32>
    %145 = vector.shape_cast %144 : vector<128xf32> to vector<1x128xf32>
    %146 = arith.addf %139, %145 : vector<1x128xf32>
    %147 = arith.mulf %116, %116 : vector<256x128xf32>
    %cst_82 = arith.constant dense<0.000000e+00> : vector<128xf32>
    %148 = vector.multi_reduction <add>, %147, %cst_82 [0] : vector<256x128xf32> to vector<128xf32>
    %149 = vector.shape_cast %148 : vector<128xf32> to vector<1x128xf32>
    %150 = arith.addf %143, %149 : vector<1x128xf32>
    %c0_83 = arith.constant 0 : index
    %c0_84 = arith.constant 0 : index
    %c0_85 = arith.constant 0 : index
    %c0_86 = arith.constant 0 : index
    %151 = vector.load %arg7[%c0_83, %c0_84, %c0_85, %c0_86] : memref<1x1x2x128xf32, #tpu.memory_space<vmem>>, vector<1x1x1x128xf32>
    %152 = vector.shape_cast %151 : vector<1x1x1x128xf32> to vector<1x128xf32>
    %153 = vector.shape_cast %146 : vector<1x128xf32> to vector<1x1x1x128xf32>
    tpu.vector_store %arg7[%c0_83, %c0_84, %c0_85, %c0_86], %153 {strides = array<i32>} : memref<1x1x2x128xf32, #tpu.memory_space<vmem>>, vector<1x1x1x128xf32>,
    %c0_87 = arith.constant 0 : index
    %c0_88 = arith.constant 0 : index
    %c1_89 = arith.constant 1 : index
    %c0_90 = arith.constant 0 : index
    %154 = vector.load %arg7[%c0_87, %c0_88, %c1_89, %c0_90] : memref<1x1x2x128xf32, #tpu.memory_space<vmem>>, vector<1x1x1x128xf32>
    %155 = vector.shape_cast %154 : vector<1x1x1x128xf32> to vector<1x128xf32>
    %156 = vector.shape_cast %150 : vector<1x128xf32> to vector<1x1x1x128xf32>
    tpu.vector_store %arg7[%c0_87, %c0_88, %c1_89, %c0_90], %156 {strides = array<i32>} : memref<1x1x2x128xf32, #tpu.memory_space<vmem>>, vector<1x1x1x128xf32>,
    return
  }
  func.func @transform_0(%arg0: i32, %arg1: i32, %arg2: i32) -> (i32, i32, i32, i32) {
    %c0_i32 = arith.constant 0 : i32
    %c0_i32_0 = arith.constant 0 : i32
    return %arg0, %arg1, %c0_i32, %arg2 : i32, i32, i32, i32
  }
  func.func @transform_1(%arg0: i32, %arg1: i32, %arg2: i32) -> (i32, i32, i32, i32, i32) {
    %c0_i32 = arith.constant 0 : i32
    %c0_i32_0 = arith.constant 0 : i32
    %c0_i32_1 = arith.constant 0 : i32
    return %arg0, %arg1, %c0_i32, %c0_i32_0, %arg2 : i32, i32, i32, i32, i32
  }
  func.func @transform_2(%arg0: i32, %arg1: i32, %arg2: i32) -> (i32, i32, i32) {
    %c0_i32 = arith.constant 0 : i32
    %c0_i32_0 = arith.constant 0 : i32
    %c0_i32_1 = arith.constant 0 : i32
    return %c0_i32, %arg2, %c0_i32_0 : i32, i32, i32
  }
  func.func @transform_3(%arg0: i32, %arg1: i32, %arg2: i32) -> (i32, i32, i32, i32, i32) {
    %c0_i32 = arith.constant 0 : i32
    %c0_i32_0 = arith.constant 0 : i32
    %c0_i32_1 = arith.constant 0 : i32
    %c0_i32_2 = arith.constant 0 : i32
    return %arg0, %arg1, %c0_i32, %c0_i32_0, %c0_i32_1 : i32, i32, i32, i32, i32
  }
  func.func @transform_4(%arg0: i32, %arg1: i32, %arg2: i32) -> (i32, i32, i32, i32) {
    %c0_i32 = arith.constant 0 : i32
    %c0_i32_0 = arith.constant 0 : i32
    %c0_i32_1 = arith.constant 0 : i32
    return %arg0, %arg1, %c0_i32, %c0_i32_0 : i32, i32, i32, i32
  }
}

</mosaic_0001>

<bundles_post_ra>
// kernel: up_conv_forward.1
= control target key start
LH: loop header
LB: loop body
LE: loop exit
PB: predicated region body
PF: predicated region fallthrough
CT: control target
= control target key end

     0   :  { %s8067_s15 = smov 0   ;;  %s8069_s16 = smov 0   ;;  %s9404_s0 = inlined_call_operand.vmem [shape: bf16[2,16,18,128], index: 0, kind: input, shape index: {}]   ;;  %s9405_s1 = inlined_call_operand.vmem [shape: bf16[2,1,2,18,128], index: 1, kind: input, shape index: {}]   ;;  %s9406_s2 = inlined_call_operand.vmem [shape: bf16[16,128,128], index: 2, kind: input, shape index: {}]   ;;  %s9407_s3 = inlined_call_operand.vmem [shape: f32[2,1,16,16,512], index: 3, kind: output, shape index: {0}]   ;;  %s9408_s4 = inlined_call_operand.vmem [shape: f32[2,1,2,128], index: 4, kind: output, shape index: {1}]  }
   0x1   :  { %s8071_s17 = smov 0  }
   0x2 LB: > { %s34_s18 = sadd.s32 1, %s8036_s16  ;;  %p5849_p0 = scmp.ge.s32.totalorder %s8040_s17, 1  ;;  %s8040_s17 = sphi %s8071_s17, %s15_s17   ;;  %s8036_s16 = sphi %s8069_s16, %s9473_s16   ;;  %s8032_s15 = sphi %s8067_s15, %s9472_s15  }
   0x3   : > { %p36_p1 = scmp.ge.s32.totalorder %s34_s18, 2  ;;  %p233_p2 = scmp.lt.s32.totalorder %s8040_s17, 3 }
   0x5   : > { %s9475_s18 = smov (%p36_p1, %s34_s18), 0  ;;  %p234_p3 = pnand %p5849_p0, %p233_p2 }
   0x7   : > { %237 = sbr.rel (%p234_p3) target bundleno = 810 (0x32a), region = 32 }
   0xe   : > { %v7860_v0 = vld [vmem:[%s9406_s2 + $0x40] sm:$0xff]   ;;  %p296_p4 = scmp.lt.s32.totalorder %s8032_s15, 1  ;;  %v7862_v2 = vld [vmem:[%s9406_s2 + $0x48] sm:$0xff]   ;;  %v7864_v4 = vld [vmem:[%s9406_s2 + $0x50] sm:$0xff]   ;;  %vm2011_vm0 = vcmask 1042432   ;;  %vm2012_vm1 = vcmask 1046532  }
   0xf   : > { %v7861_v1 = vld [vmem:[%s9406_s2 + $0x140] sm:$0xff]   ;;  %6682 = vmatprep.subr.bf16.mxu0 %v7860_v0  ;;  %v7863_v3 = vld [vmem:[%s9406_s2 + $0x148] sm:$0xff]   ;;  %v7865_v5 = vld [vmem:[%s9406_s2 + $0x150] sm:$0xff]   ;;  %vm414_vm2 = vsmask.f32 3328  ;;  %v9437_v21 = vmov 0 }
  0x10   : > { %6874 = vmatprep.subr.bf16.mxu1 %v7861_v1  ;;  %6683 = vmatpush3.bf16.msra.mxu0 %v7860_v0  ;;  %s9477_s15 = smov (!%p296_p4, %s8032_s15), 1  ;;  %v7866_v6 = vld [vmem:[%s9406_s2 + $0x58] sm:$0xff]   ;;  %v7868_v8 = vld [vmem:[%s9406_s2 + $0x60] sm:$0xff]   ;;  %v7870_v10 = vld [vmem:[%s9406_s2 + $0x68] sm:$0xff]   ;;  %vm415_vm3 = vsmask.f32 7440 }
  0x11   : > { %6875 = vmatpush3.bf16.msra.mxu1 %v7861_v1  ;;  %6684 = vmatprep.subr.bf16.mxu0 %v7862_v2  ;;  %v7867_v7 = vld [vmem:[%s9406_s2 + $0x158] sm:$0xff]   ;;  %s7834_s9 = smul.u32 192, %s9477_s15  ;;  %v7869_v9 = vld [vmem:[%s9406_s2 + $0x160] sm:$0xff]   ;;  %v7871_v11 = vld [vmem:[%s9406_s2 + $0x168] sm:$0xff]  }
  0x12   : > { %6876 = vmatprep.subr.bf16.mxu1 %v7863_v3  ;;  %v7872_v17 = vld [vmem:[%s9406_s2 + $0x70] sm:$0xff]   ;;  %vm8137_vm4 = vmor %vm2011_vm0, %vm2012_vm1  ;;  %v7874_v48 = vld [vmem:[%s9406_s2 + $0x78] sm:$0xff]   ;;  %s7835_s11 = smul.u32 24, %s9477_s15 }
  0x13   : > { %s8121_s20 = scalar_lea.vmem %s9404_s0, %s7834_s9  ;;  %v9438_v21 = vsel %vm8137_vm4, 4294967295, %v9437_v21  ;;  %v7873_v24 = vld [vmem:[%s9406_s2 + $0x170] sm:$0xff]   ;;  %vm8151_vm5 = vmor %vm414_vm2, %vm415_vm3  ;;  %v7875_v54 = vld [vmem:[%s9406_s2 + $0x178] sm:$0xff]  }
  0x14   : > { %6685 = vmatpush3.bf16.msra.mxu0 %v7862_v2  ;;  %v344_v12 = vld [vmem:[%s8121_s20] sm:$0xf]  ;;  %v345_v13 = vld [vmem:[%s8121_s20 + $0x4] sm:$0xf]  ;;  %v346_v14 = vld [vmem:[%s8121_s20 + $0x8] sm:$0x1]  ;;  %s8747_s14 = scalar_lea.vmem %s9405_s1, %s7835_s11 }
  0x15   : > { %6877 = vmatpush3.bf16.msra.mxu1 %v7863_v3  ;;  %6686 = vmatprep.subr.bf16.mxu0 %v7864_v4  ;;  %v418_v15 = vshrl.u32 %v344_v12, 16  ;;  %v421_v16 = vshll.u32 %v344_v12, 16  ;;  %v427_v18 = vshll.u32 %v345_v13, 16  ;;  %v431_v19 = vshrl.u32 %v345_v13, 16  ;;  %9439 = vst [vmem:[#allocation2_spill] sm:$0xff] %v9438_v21  ;;  %s6297_s11 = sshll.u32 %s9477_s15, 10 }
  0x16   : > { %6878 = vmatprep.subr.bf16.mxu1 %v7865_v5  ;;  %v437_v20 = vshll.u32 %v346_v14, 16  ;;  %v5985_v22 = vrot.slane %v344_v12, 9  ;;  %v347_v23 = vld [vmem:[%s8121_s20 + $0xc] sm:$0xf]  ;;  %v2016_v27 = vrot.slane %v345_v13, 5  ;;  %v2019_v28 = vrot.slane %v346_v14, 5  ;;  %s9154_s24 = scalar_lea.vmem %s9407_s3, %s6297_s11 }
  0x17   : > { %v420_v25 = vrot.slane %v418_v15, 4  ;;  %v423_v26 = vrot.slane %v421_v16, 5  ;;  %v348_v29 = vld [vmem:[%s8121_s20 + $0x10] sm:$0xf]  ;;  %v429_v30 = vrot.slane %v427_v18, 5  ;;  %v433_v31 = vrot.slane %v431_v19, 4 }
  0x18   : > { %6687 = vmatpush3.bf16.msra.mxu0 %v7864_v4  ;;  %v439_v32 = vrot.slane %v437_v20, 5  ;;  %v349_v33 = vld [vmem:[%s8121_s20 + $0x14] sm:$0x1]  ;;  %v442_v34 = vshrl.u32 %v347_v23, 16  ;;  %v2017_v36 = vsel %vm8137_vm4, %v5985_v22, %v2016_v27  ;;  %v2018_v37 = vrot.slane %v2016_v27, 4  ;;  %v7877_v12 = vld [vmem:[%s9406_s2 + $0x100] sm:$0xff]  }
  0x19   : > { %6879 = vmatpush3.bf16.msra.mxu1 %v7865_v5  ;;  %6688 = vmatprep.subr.bf16.mxu0 %v7866_v6  ;;  %v424_v35 = vor.u32 %v423_v26, %v420_v25  ;;  %v445_v38 = vshll.u32 %v347_v23, 16  ;;  %v434_v40 = vor.u32 %v433_v31, %v429_v30  ;;  %v451_v42 = vshll.u32 %v348_v29, 16  ;;  %v350_v53 = vld [vmem:[%s8121_s20 + $0x18] sm:$0xf]  ;;  %v351_v59 = vld [vmem:[%s8121_s20 + $0x1c] sm:$0xf] }
  0x1a   : > { %6880 = vmatprep.subr.bf16.mxu1 %v7867_v7  ;;  %v444_v41 = vrot.slane %v442_v34, 4  ;;  %v455_v43 = vshrl.u32 %v348_v29, 16  ;;  %v2020_v45 = vsel %vm8137_vm4, %v2018_v37, %v2019_v28  ;;  %v461_v47 = vshll.u32 %v349_v33, 16  ;;  %v352_v2 = vld [vmem:[%s8121_s20 + $0x20] sm:$0x1] }
  0x1b   : > { %v425_v44 = vrot.slane %v424_v35, 4  ;;  %v447_v46 = vrot.slane %v445_v38, 5  ;;  %v435_v49 = vrot.slane %v434_v40, 4  ;;  %v6017_v50 = vcombine.low %v2017_v36, %v2020_v45  ;;  %v354_v25 = vld [vmem:[%s8121_s20 + $0x28] sm:$0xf] }
  0x1c   : > { %6689 = vmatpush3.bf16.msra.mxu0 %v7866_v6  ;;  %v453_v51 = vrot.slane %v451_v42, 5  ;;  %v457_v52 = vrot.slane %v455_v43, 4  ;;  %v463_v57 = vrot.slane %v461_v47, 5  ;;  %v5986_v58 = vrot.slane %v347_v23, 9  ;;  %v7876_v6 = vld [vmem:[%s9406_s2] sm:$0xff]   ;;  %v7879_v36 = vld [vmem:[%s9406_s2 + $0x108] sm:$0xff]  }
  0x1d   : > { %6881 = vmatpush3.bf16.msra.mxu1 %v7867_v7  ;;  %6690 = vmatprep.subr.bf16.mxu0 %v7868_v8  ;;  %v430_v55 = vsel %vm8151_vm5, %v425_v44, %v429_v30  ;;  %v448_v56 = vor.u32 %v447_v46, %v444_v41  ;;  %v440_v60 = vsel %vm8151_vm5, %v435_v49, %v439_v32  ;;  %v2023_v62 = vrot.slane %v348_v29, 5  ;;  %v7878_v30 = vld [vmem:[%s9406_s2 + $0x8] sm:$0xff]   ;;  %v8208_v42 = vld [vmem:[%s8121_s20 + $0x30] sm:$0xf]  ;;  %v8214_v47 = vld [vmem:[%s8121_s20 + $0x34] sm:$0xf] }
  0x1e   : > { %6882 = vmatprep.subr.bf16.mxu1 %v7869_v9  ;;  %6890 = vmatprep.mubr.bf16.mxu1 %v6017_v50  ;;  %v458_v61 = vor.u32 %v457_v52, %v453_v51  ;;  %v2026_v63 = vrot.slane %v349_v33, 5  ;;  %v8169_v0 = vcombine.low %v430_v55, %v440_v60  ;;  %v466_v3 = vshrl.u32 %v350_v53, 16  ;;  %v355_v33 = vld [vmem:[%s8121_s20 + $0x2c] sm:$0x1]  ;;  %v7880_v52 = vld [vmem:[%s9406_s2 + $0x10] sm:$0xff]  }
  0x1f   : > { %v449_v1 = vrot.slane %v448_v56, 4  ;;  %v469_v4 = vshll.u32 %v350_v53, 16  ;;  %v2024_v7 = vsel %vm8137_vm4, %v5986_v58, %v2023_v62  ;;  %v479_v15 = vshrl.u32 %v351_v59, 16 }
  0x20   : > { %6691 = vmatpush3.bf16.msra.mxu0 %v7868_v8  ;;  %v459_v5 = vrot.slane %v458_v61, 4  ;;  %v2025_v8 = vrot.slane %v2023_v62, 4  ;;  %6698 = vmatprep.mubr.bf16.mxu0 %v8169_v0  ;;  %v468_v13 = vrot.slane %v466_v3, 4  ;;  %v485_v19 = vshll.u32 %v352_v2, 16 }
  0x21   : > { %6883 = vmatpush3.bf16.msra.mxu1 %v7869_v9  ;;  %6692 = vmatprep.subr.bf16.mxu0 %v7870_v10  ;;  %v475_v9 = vshll.u32 %v351_v59, 16  ;;  %v471_v14 = vrot.slane %v469_v4, 5  ;;  %v5987_v27 = vrot.slane %v350_v53, 9  ;;  %v2030_v28 = vrot.slane %v351_v59, 5 }
  0x22   : > { %6884 = vmatprep.subr.bf16.mxu1 %v7871_v11  ;;  %v464_v16 = vsel %vm8151_vm5, %v459_v5, %v463_v57  ;;  %v487_v26 = vrot.slane %v485_v19, 5  ;;  %v2033_v29 = vrot.slane %v352_v2, 5  ;;  %v499_v40 = vshll.u32 %v354_v25, 16  ;;  %v7881_v57 = vld [vmem:[%s9406_s2 + $0x110] sm:$0xff]   ;;  %v7883_v19 = vld [vmem:[%s9406_s2 + $0x118] sm:$0xff]  }
  0x23   : > { %v477_v18 = vrot.slane %v475_v9, 5  ;;  %v472_v23 = vor.u32 %v471_v14, %v468_v13  ;;  %v2031_v37 = vsel %vm8137_vm4, %v5987_v27, %v2030_v28  ;;  %v2032_v38 = vrot.slane %v2030_v28, 4  ;;  %v8246_v13 = vld [vmem:[%s8121_s20 + $0x3c] sm:$0xf]  ;;  %v8261_v27 = vld [vmem:[%s8121_s20 + $0x44] sm:$0x1] }
  0x24   : > { %6693 = vmatpush3.bf16.msra.mxu0 %v7870_v10  ;;  %v8178_v10 = vld [vmem:[%s8121_s20 + $0x24] sm:$0xf]  ;;  %v503_v41 = vshrl.u32 %v354_v25, 16  ;;  %v501_v49 = vrot.slane %v499_v40, 5  ;;  %v2037_v61 = vrot.slane %v354_v25, 5  ;;  %v514_v2 = vshrl.u32 %v8208_v42, 16 }
  0x25   : > { %6885 = vmatpush3.bf16.msra.mxu1 %v7871_v11  ;;  %6694 = vmatprep.subr.bf16.mxu0 %v7872_v17  ;;  %v454_v11 = vsel %vm8151_vm5, %v449_v1, %v453_v51  ;;  %v473_v31 = vrot.slane %v472_v23, 4  ;;  %v490_v34 = vshrl.u32 %v8178_v10, 16  ;;  %v493_v35 = vshll.u32 %v8178_v10, 16  ;;  %v358_v1 = vld [vmem:[%s8121_s20 + $0x38] sm:$0x1]  ;;  %v7884_v28 = vld [vmem:[%s9406_s2 + $0x20] sm:$0xff]  }
  0x26   : > { %6886 = vmatprep.subr.bf16.mxu1 %v7873_v24  ;;  %v8190_v20 = vcombine.low %v454_v11, %v464_v16  ;;  %v505_v50 = vrot.slane %v503_v41, 4  ;;  %v509_v51 = vshll.u32 %v355_v33, 16  ;;  %v5988_v56 = vrot.slane %v8178_v10, 9 }
  0x27   : > { %v478_v43 = vsel %vm8151_vm5, %v473_v31, %v477_v18  ;;  %v492_v45 = vrot.slane %v490_v34, 4  ;;  %v495_v46 = vrot.slane %v493_v35, 5  ;;  %v517_v3 = vshll.u32 %v8208_v42, 16 }
  0x28   : > { %6695 = vmatpush3.bf16.msra.mxu0 %v7872_v17  ;;  %v2027_v17 = vsel %vm8137_vm4, %v2025_v8, %v2026_v63  ;;  %v506_v59 = vor.u32 %v505_v50, %v501_v49  ;;  %v511_v60 = vrot.slane %v509_v51, 5  ;;  %v2040_v63 = vrot.slane %v355_v33, 5  ;;  %v7882_v8 = vld [vmem:[%s9406_s2 + $0x18] sm:$0xff]   ;;  %v8283_v51 = vld [vmem:[%s8121_s20 + $0x48] sm:$0xf] }
  0x29   : > { %6887 = vmatpush3.bf16.msra.mxu1 %v7873_v24  ;;  %6696 = vmatprep.subr.bf16.mxu0 %v7874_v48  ;;  %v8192_v22 = vcombine.low %v2024_v7, %v2027_v17  ;;  %v481_v24 = vrot.slane %v479_v15, 4  ;;  %v496_v55 = vor.u32 %v495_v46, %v492_v45  ;;  %v2038_v5 = vsel %vm8137_vm4, %v5988_v56, %v2037_v61 }
  0x2a   : > { %6888 = vmatprep.subr.bf16.mxu1 %v7875_v54  ;;  %v507_v4 = vrot.slane %v506_v59, 4  ;;  %v523_v7 = vshll.u32 %v8214_v47, 16  ;;  %v516_v10 = vrot.slane %v514_v2, 4  ;;  %v519_v11 = vrot.slane %v517_v3, 5  ;;  %v7886_v59 = vld [vmem:[%s9406_s2 + $0x28] sm:$0xff]  }
  0x2b   : > { %v482_v32 = vor.u32 %v481_v24, %v477_v18  ;;  %v497_v62 = vrot.slane %v496_v55, 4  ;;  %v533_v17 = vshll.u32 %v358_v1, 16  ;;  %v360_v18 = vld [vmem:[%s8121_s20 + $0x40] sm:$0xf]  ;;  %v2044_v31 = vrot.slane %v8214_v47, 5 }
  0x2c   : > { %6697 = vmatpush3.bf16.msra.mxu0 %v7874_v48  ;;  %v2034_v48 = vsel %vm8137_vm4, %v2032_v38, %v2033_v29  ;;  %v512_v14 = vsel %vm8151_vm5, %v507_v4, %v511_v60  ;;  %v525_v16 = vrot.slane %v523_v7, 5  ;;  %v520_v25 = vor.u32 %v519_v11, %v516_v10  ;;  %v7887_v60 = vld [vmem:[%s9406_s2 + $0x128] sm:$0xff]   ;;  %v364_v2 = vld [vmem:[%s8121_s20 + $0x50] sm:$0x1] }
  0x2d   : > { %6889 = vmatpush3.bf16.msra.mxu1 %v7875_v54  ;;  %6730 = vmatprep.subr.bf16.mxu0 %v7876_v6  ;;  %v483_v44 = vrot.slane %v482_v32, 4  ;;  %v8223_v54 = vcombine.low %v2031_v37, %v2034_v48  ;;  %v502_v9 = vsel %vm8151_vm5, %v497_v62, %v501_v49  ;;  %v535_v29 = vrot.slane %v533_v17, 5  ;;  %v7885_v37 = vld [vmem:[%s9406_s2 + $0x120] sm:$0xff]   ;;  %v7888_v11 = vld [vmem:[%s9406_s2 + $0x30] sm:$0xff]  }
  0x2e   : > { %6922 = vmatprep.subr.bf16.mxu1 %v7877_v12  ;;  %v8256_v23 = vcombine.low %v502_v9, %v512_v14  ;;  %v2047_v32 = vrot.slane %v358_v1, 5  ;;  %v521_v33 = vrot.slane %v520_v25, 4  ;;  %v538_v35 = vshrl.u32 %v8246_v13, 16  ;;  %v8321_v25 = vld [vmem:[%s8121_s20 + $0x54] sm:$0xf] }
  0x2f   : > { %6699 = vmatmul.mubr.bf16.vlgmr.msra.gmra.mrb[0].mxu0 %v8190_v20  ;;  %v488_v53 = vsel %vm8151_vm5, %v483_v44, %v487_v26  ;;  %v2046_v40 = vrot.slane %v2044_v31, 4  ;;  %v547_v41 = vshll.u32 %v360_v18, 16  ;;  %v557_v50 = vshll.u32 %v8261_v27, 16 }
  0x30   : > { %6891 = vmatmul.mubr.bf16.vlgmr.msra.gmra.mrb[0].mxu1 %v8192_v22  ;;  %6731 = vmatpush3.bf16.msra.mxu0 %v7876_v6  ;;  %v8229_v58 = vcombine.low %v478_v43, %v488_v53  ;;  %v2039_v6 = vrot.slane %v2037_v61, 4  ;;  %v526_v43 = vsel %vm8151_vm5, %v521_v33, %v525_v16  ;;  %v540_v45 = vrot.slane %v538_v35, 4 }
  0x31   : > { %6923 = vmatpush3.bf16.msra.mxu1 %v7877_v12  ;;  %6732 = vmatprep.subr.bf16.mxu0 %v7878_v30  ;;  %v527_v12 = vshrl.u32 %v8214_v47, 16  ;;  %v2048_v47 = vsel %vm8137_vm4, %v2046_v40, %v2047_v32  ;;  %v549_v48 = vrot.slane %v547_v41, 5  ;;  %v5990_v56 = vrot.slane %v8246_v13, 9  ;;  %v367_v40 = vld [vmem:[%s8121_s20 + $0x5c] sm:$0x1] }
  0x32   : > { %6924 = vmatprep.subr.bf16.mxu1 %v7879_v36  ;;  %6894 = vmatprep.mubr.bf16.mxu1 %v8223_v54  ;;  %v2041_v15 = vsel %vm8137_vm4, %v2039_v6, %v2040_v63  ;;  %v559_v63 = vrot.slane %v557_v50, 5  ;;  %v2051_v1 = vrot.slane %v360_v18, 5  ;;  %v2054_v4 = vrot.slane %v8261_v27, 5 }
  0x33   : > { %6702 = vmatprep.mubr.bf16.mxu0 %v8229_v58  ;;  %v8258_v24 = vcombine.low %v2038_v5, %v2041_v15  ;;  %v529_v26 = vrot.slane %v527_v12, 4  ;;  %v562_v5 = vshrl.u32 %v8283_v51, 16  ;;  %v565_v6 = vshll.u32 %v8283_v51, 16 }
  0x34   : > { %6733 = vmatpush3.bf16.msra.mxu0 %v7878_v30  ;;  %v5989_v30 = vrot.slane %v8208_v42, 9  ;;  %v551_v42 = vshrl.u32 %v360_v18, 16  ;;  %v2053_v9 = vrot.slane %v2051_v1, 4  ;;  %v5991_v33 = vrot.slane %v8283_v51, 9 }
  0x35   : > { %6925 = vmatpush3.bf16.msra.mxu1 %v7879_v36  ;;  %6734 = vmatprep.subr.bf16.mxu0 %v7880_v52  ;;  %9442 = vst [vmem:[#allocation3_spill] sm:$0xff] %v8258_v24  ;;  %v530_v34 = vor.u32 %v529_v26, %v525_v16  ;;  %v541_v36 = vshll.u32 %v8246_v13, 16  ;;  %v564_v13 = vrot.slane %v562_v5, 4  ;;  %v567_v14 = vrot.slane %v565_v6, 5  ;;  %v7889_v26 = vld [vmem:[%s9406_s2 + $0x130] sm:$0xff]   ;;  %v8373_v6 = vld [vmem:[%s9406_s2 + $0x180] sm:$0xff]  }
  0x36   : > { %6926 = vmatprep.subr.bf16.mxu1 %v7881_v57  ;;  %v2045_v38 = vsel %vm8137_vm4, %v5989_v30, %v2044_v31  ;;  %v553_v49 = vrot.slane %v551_v42, 4  ;;  %v2055_v17 = vsel %vm8137_vm4, %v2053_v9, %v2054_v4  ;;  %v8331_v31 = vld [vmem:[%s8121_s20 + $0x58] sm:$0xf]  ;;  %v2061_v35 = vrot.slane %v364_v2, 5  ;;  %v8368_v5 = vld [vmem:[%s8121_s20 + $0x64] sm:$0xf] }
  0x37   : > { %6703 = vmatmul.mubr.bf16.gmra.mrb[4].mxu0 %v8256_v23  ;;  %v531_v44 = vrot.slane %v530_v34, 4  ;;  %v543_v46 = vrot.slane %v541_v36, 5  ;;  %v8287_v53 = vcombine.low %v2045_v38, %v2048_v47  ;;  %v7890_v36 = vld [vmem:[%s9406_s2 + $0x38] sm:$0xff]   ;;  %v586_v41 = vshrl.u32 %v8321_v25, 16 }
  0x38   : > { %6735 = vmatpush3.bf16.msra.mxu0 %v7880_v52  ;;  %6895 = vmatmul.mubr.bf16.gmra.mrb[4].mxu1 %v8258_v24  ;;  %v554_v62 = vor.u32 %v553_v49, %v549_v48  ;;  %v589_v42 = vshll.u32 %v8321_v25, 16  ;;  %v599_v47 = vshrl.u32 %v8331_v31, 16  ;;  %v5992_v4 = vrot.slane %v8321_v25, 9 }
  0x39   : > { %6927 = vmatpush3.bf16.msra.mxu1 %v7881_v57  ;;  %6736 = vmatprep.subr.bf16.mxu0 %v7882_v8  ;;  %v536_v52 = vsel %vm8151_vm5, %v531_v44, %v535_v29  ;;  %9443 = vst [vmem:[#allocation4_spill] sm:$0xff] %v8287_v53  ;;  %v544_v55 = vor.u32 %v543_v46, %v540_v45  ;;  %v8291_v57 = vld [vmem:[%s8121_s20 + $0x4c] sm:$0xf]  ;;  %v595_v46 = vshll.u32 %v8331_v31, 16 }
  0x3a   : > { %6928 = vmatprep.subr.bf16.mxu1 %v7883_v19  ;;  %v8299_v61 = vcombine.low %v526_v43, %v536_v52  ;;  %6898 = vmatprep.mubr.bf16.mxu1 %v8287_v53  ;;  %v555_v7 = vrot.slane %v554_v62, 4  ;;  %v571_v10 = vshll.u32 %v8291_v57, 16  ;;  %v575_v15 = vshrl.u32 %v8291_v57, 16  ;;  %v7891_v43 = vld [vmem:[%s9406_s2 + $0x138] sm:$0xff]  }
  0x3b   : > { %v545_v3 = vrot.slane %v544_v55, 4  ;;  %v568_v29 = vor.u32 %v567_v14, %v564_v13  ;;  %v2058_v34 = vrot.slane %v8291_v57, 5  ;;  %v588_v52 = vrot.slane %v586_v41, 4  ;;  %v370_v13 = vld [vmem:[%s8121_s20 + $0x68] sm:$0x1] }
  0x3c   : > { %6737 = vmatpush3.bf16.msra.mxu0 %v7882_v8  ;;  %6706 = vmatprep.mubr.bf16.mxu0 %v8299_v61  ;;  %v2052_v8 = vsel %vm8137_vm4, %v5990_v56, %v2051_v1  ;;  %v560_v16 = vsel %vm8151_vm5, %v555_v7, %v559_v63  ;;  %v573_v18 = vrot.slane %v571_v10, 5  ;;  %v577_v30 = vrot.slane %v575_v15, 4  ;;  %v8360_v63 = vld [vmem:[%s9406_s2 + $0x80] sm:$0xff]  }
  0x3d   : > { %6929 = vmatpush3.bf16.msra.mxu1 %v7883_v19  ;;  %6738 = vmatprep.subr.bf16.mxu0 %v7884_v28  ;;  %v550_v12 = vsel %vm8151_vm5, %v545_v3, %v549_v48  ;;  %v581_v19 = vshll.u32 %v364_v2, 16  ;;  %v2059_v44 = vsel %vm8137_vm4, %v5991_v33, %v2058_v34  ;;  %v2060_v45 = vrot.slane %v2058_v34, 4  ;;  %v8351_v48 = vld [vmem:[%s8121_s20 + $0x60] sm:$0xf]  ;;  %v8393_v34 = vld [vmem:[%s8121_s20 + $0x70] sm:$0xf] }
  0x3e   : > { %6930 = vmatprep.subr.bf16.mxu1 %v7885_v37  ;;  %v8326_v27 = vcombine.low %v550_v12, %v560_v16  ;;  %v578_v38 = vor.u32 %v577_v30, %v573_v18  ;;  %v591_v55 = vrot.slane %v589_v42, 5  ;;  %v605_v62 = vshll.u32 %v367_v40, 16 }
  0x3f   : > { %v583_v32 = vrot.slane %v581_v19, 5  ;;  %v2062_v56 = vsel %vm8137_vm4, %v2060_v45, %v2061_v35  ;;  %v2065_v10 = vrot.slane %v8331_v31, 5  ;;  %v2068_v12 = vrot.slane %v367_v40, 5 }
  0x40   : > { %6739 = vmatpush3.bf16.msra.mxu0 %v7884_v28  ;;  %v8328_v28 = vcombine.low %v2052_v8, %v2055_v17  ;;  %v579_v50 = vrot.slane %v578_v38, 4  ;;  %v8364_v2 = vcombine.low %v2059_v44, %v2062_v56  ;;  %v592_v3 = vor.u32 %v591_v55, %v588_v52  ;;  %v373_v52 = vld [vmem:[%s8121_s20 + $0x74] sm:$0x1] }
  0x41   : > { %6931 = vmatpush3.bf16.msra.mxu1 %v7885_v37  ;;  %6740 = vmatprep.subr.bf16.mxu0 %v7886_v59  ;;  %v569_v37 = vrot.slane %v568_v29, 4  ;;  %v607_v9 = vrot.slane %v605_v62, 5  ;;  %v610_v14 = vshrl.u32 %v8351_v48, 16  ;;  %v613_v15 = vshll.u32 %v8351_v48, 16 }
  0x42   : > { %6932 = vmatprep.subr.bf16.mxu1 %v7887_v60  ;;  %9444 = vst [vmem:[#allocation5_spill] sm:$0xff] %v8328_v28  ;;  %6707 = vmatmul.mubr.bf16.gmra.mrb[8].mxu0 %v8326_v27  ;;  %v584_v1 = vsel %vm8151_vm5, %v579_v50, %v583_v32  ;;  %9445 = vst [vmem:[#allocation6_spill] sm:$0xff] %v8364_v2  ;;  %v2066_v17 = vsel %vm8137_vm4, %v5992_v4, %v2065_v10  ;;  %v619_v19 = vshll.u32 %v8368_v5, 16 }
  0x43   : > { %6899 = vmatmul.mubr.bf16.gmra.mrb[8].mxu1 %v8328_v28  ;;  %v574_v49 = vsel %vm8151_vm5, %v569_v37, %v573_v18  ;;  %v2067_v18 = vrot.slane %v2065_v10, 4  ;;  %v612_v30 = vrot.slane %v610_v14, 4  ;;  %v615_v32 = vrot.slane %v613_v15, 5  ;;  %v8419_v10 = vld [vmem:[%s8121_s20 + $0x78] sm:$0xf] }
  0x44   : > { %6741 = vmatpush3.bf16.msra.mxu0 %v7886_v59  ;;  %v597_v59 = vrot.slane %v595_v46, 5  ;;  %v8375_v7 = vcombine.low %v574_v49, %v584_v1  ;;  %6902 = vmatprep.mubr.bf16.mxu1 %v8364_v2  ;;  %v623_v33 = vshrl.u32 %v8368_v5, 16  ;;  %v621_v37 = vrot.slane %v619_v19, 5  ;;  %v8424_v15 = vld [vmem:[%s8121_s20 + $0x7c] sm:$0xf] }
  0x45   : > { %6933 = vmatpush3.bf16.msra.mxu1 %v7887_v60  ;;  %6742 = vmatprep.subr.bf16.mxu0 %v7888_v11  ;;  %v601_v60 = vrot.slane %v599_v47, 4  ;;  %v629_v38 = vshll.u32 %v370_v13, 16  ;;  %v616_v42 = vor.u32 %v615_v32, %v612_v30  ;;  %v5993_v45 = vrot.slane %v8351_v48, 9 }
  0x46   : > { %6934 = vmatprep.subr.bf16.mxu1 %v7889_v26  ;;  %6710 = vmatprep.mubr.bf16.mxu0 %v8375_v7  ;;  %v2072_v46 = vrot.slane %v8368_v5, 5  ;;  %v2075_v47 = vrot.slane %v370_v13, 5  ;;  %v643_v62 = vshll.u32 %v8393_v34, 16  ;;  %v647_v1 = vshrl.u32 %v8393_v34, 16 }
  0x47   : > { %v602_v8 = vor.u32 %v601_v60, %v597_v59  ;;  %v631_v44 = vrot.slane %v629_v38, 5  ;;  %v617_v49 = vrot.slane %v616_v42, 4  ;;  %v653_v14 = vshll.u32 %v373_v52, 16 }
  0x48   : > { %6743 = vmatpush3.bf16.msra.mxu0 %v7888_v11  ;;  %v593_v11 = vrot.slane %v592_v3, 4  ;;  %v2074_v60 = vrot.slane %v2072_v46, 4  ;;  %v649_v13 = vrot.slane %v647_v1, 4  ;;  %v658_v38 = vshrl.u32 %v8419_v10, 16 }
  0x49   : > { %6935 = vmatpush3.bf16.msra.mxu1 %v7889_v26  ;;  %6744 = vmatprep.subr.bf16.mxu0 %v7890_v36  ;;  %v603_v16 = vrot.slane %v602_v8, 4  ;;  %v8387_v26 = vld [vmem:[%s8121_s20 + $0x6c] sm:$0xf]  ;;  %v622_v3 = vsel %vm8151_vm5, %v617_v49, %v621_v37  ;;  %v661_v42 = vshll.u32 %v8419_v10, 16 }
  0x4a   : > { %6936 = vmatprep.subr.bf16.mxu1 %v7891_v43  ;;  %v598_v29 = vsel %vm8151_vm5, %v593_v11, %v597_v59  ;;  %v634_v55 = vshrl.u32 %v8387_v26, 16  ;;  %v637_v56 = vshll.u32 %v8387_v26, 16  ;;  %v2073_v59 = vsel %vm8137_vm4, %v5993_v45, %v2072_v46 }
  0x4b   : > { %v608_v35 = vsel %vm8151_vm5, %v603_v16, %v607_v9  ;;  %v2076_v11 = vsel %vm8137_vm4, %v2074_v60, %v2075_v47  ;;  %v5994_v19 = vrot.slane %v8387_v26, 9  ;;  %v667_v46 = vshll.u32 %v8424_v15, 16  ;;  %v8443_v47 = vld [vmem:[%s8121_s20 + $0x84] sm:$0xf] }
  0x4c   : > { %6745 = vmatpush3.bf16.msra.mxu0 %v7890_v36  ;;  %v2069_v36 = vsel %vm8137_vm4, %v2067_v18, %v2068_v12  ;;  %v8401_v40 = vcombine.low %v598_v29, %v608_v35  ;;  %v636_v8 = vrot.slane %v634_v55, 4  ;;  %v639_v9 = vrot.slane %v637_v56, 5  ;;  %v376_v29 = vld [vmem:[%s8121_s20 + $0x80] sm:$0x1]  ;;  %v8449_v56 = vld [vmem:[%s8121_s20 + $0x88] sm:$0xf] }
  0x4d   : > { %6937 = vmatpush3.bf16.msra.mxu1 %v7891_v43  ;;  %6778 = vmatprep.subr.bf16.mxu0 %v8360_v63  ;;  %v8403_v41 = vcombine.low %v2066_v17, %v2069_v36  ;;  %v625_v43 = vrot.slane %v623_v33, 4  ;;  %v645_v12 = vrot.slane %v643_v62, 5  ;;  %v8428_v17 = vcombine.low %v2073_v59, %v2076_v11  ;;  %v379_v11 = vld [vmem:[%s8121_s20 + $0x8c] sm:$0x1] }
  0x4e   : > { %6970 = vmatprep.subr.bf16.mxu1 %v8373_v6  ;;  %6711 = vmatmul.mubr.bf16.gmra.mrb[12].mxu0 %v8401_v40  ;;  %v640_v18 = vor.u32 %v639_v9, %v636_v8  ;;  %v655_v33 = vrot.slane %v653_v14, 5  ;;  %v2079_v35 = vrot.slane %v8393_v34, 5  ;;  %v671_v55 = vshrl.u32 %v8424_v15, 16 }
  0x4f   : > { %9446 = vst [vmem:[#allocation7_spill] sm:$0xff] %v8403_v41  ;;  %6903 = vmatmul.mubr.bf16.gmra.mrb[12].mxu1 %v8403_v41  ;;  %v626_v50 = vor.u32 %v625_v43, %v621_v37  ;;  %9447 = vst [vmem:[#allocation8_spill] sm:$0xff] %v8428_v17  ;;  %v650_v32 = vor.u32 %v649_v13, %v645_v12  ;;  %v2082_v37 = vrot.slane %v373_v52, 5  ;;  %v663_v52 = vrot.slane %v661_v42, 5 }
  0x50   : > { %6906 = vmatprep.mubr.bf16.mxu1 %v8428_v17  ;;  %v641_v36 = vrot.slane %v640_v18, 4  ;;  %v2081_v45 = vrot.slane %v2079_v35, 4  ;;  %v669_v62 = vrot.slane %v667_v46, 5  ;;  %v677_v1 = vshll.u32 %v376_v29, 16  ;;  %v8476_v46 = vld [vmem:[%s8121_s20 + $0x94] sm:$0xf] }
  0x51   : > { %v627_v4 = vrot.slane %v626_v50, 4  ;;  %v651_v43 = vrot.slane %v650_v32, 4  ;;  %v660_v50 = vrot.slane %v658_v38, 4  ;;  %v673_v9 = vrot.slane %v671_v55, 4  ;;  %v8471_v38 = vld [vmem:[%s8121_s20 + $0x90] sm:$0xf] }
  0x52   : > { %v646_v49 = vsel %vm8151_vm5, %v641_v36, %v645_v12  ;;  %v2083_v60 = vsel %vm8137_vm4, %v2081_v45, %v2082_v37  ;;  %v679_v12 = vrot.slane %v677_v1, 5  ;;  %v5995_v13 = vrot.slane %v8419_v10, 9 }
  0x53   : > { %v632_v16 = vsel %vm8151_vm5, %v627_v4, %v631_v44  ;;  %v2080_v44 = vsel %vm8137_vm4, %v5994_v19, %v2079_v35  ;;  %v656_v59 = vsel %vm8151_vm5, %v651_v43, %v655_v33  ;;  %v664_v8 = vor.u32 %v663_v52, %v660_v50 }
  0x54   : > { %v8432_v30 = vcombine.low %v622_v3, %v632_v16  ;;  %v8455_v3 = vcombine.low %v646_v49, %v656_v59  ;;  %v8457_v4 = vcombine.low %v2080_v44, %v2083_v60  ;;  %v2086_v14 = vrot.slane %v8424_v15, 5 }
  0x55   : > { %v2089_v16 = vrot.slane %v376_v29, 5  ;;  %v665_v18 = vrot.slane %v664_v8, 4  ;;  %v674_v19 = vor.u32 %v673_v9, %v669_v62  ;;  %v682_v32 = vshrl.u32 %v8443_v47, 16 }
  0x56   : > { %6714 = vmatprep.mubr.bf16.mxu0 %v8432_v30  ;;  %9448 = vst [vmem:[#allocation9_spill] sm:$0xff] %v8457_v4  ;;  %v685_v33 = vshll.u32 %v8443_v47, 16  ;;  %v2087_v35 = vsel %vm8137_vm4, %v5995_v13, %v2086_v14  ;;  %v2088_v36 = vrot.slane %v2086_v14, 4  ;;  %v691_v37 = vshll.u32 %v8449_v56, 16 }
  0x57   : > { %6715 = vmatmul.mubr.bf16.gmra.mrb[16].mxu0 %v8455_v3  ;;  %6907 = vmatmul.mubr.bf16.gmra.mrb[16].mxu1 %v8457_v4  ;;  %v695_v29 = vshrl.u32 %v8449_v56, 16  ;;  %v670_v42 = vsel %vm8151_vm5, %v665_v18, %v669_v62  ;;  %v675_v43 = vrot.slane %v674_v19, 4  ;;  %v684_v44 = vrot.slane %v682_v32, 4  ;;  %v382_v62 = vld [vmem:[%s8121_s20 + $0x98] sm:$0x1] }
  0x58   : > { %v687_v45 = vrot.slane %v685_v33, 5  ;;  %v2090_v49 = vsel %vm8137_vm4, %v2088_v36, %v2089_v16  ;;  %v693_v50 = vrot.slane %v691_v37, 5  ;;  %v701_v55 = vshll.u32 %v379_v11, 16 }
  0x59   : > { %v697_v52 = vrot.slane %v695_v29, 4  ;;  %v680_v59 = vsel %vm8151_vm5, %v675_v43, %v679_v12  ;;  %v8482_v60 = vcombine.low %v2087_v35, %v2090_v49  ;;  %v5996_v8 = vrot.slane %v8443_v47, 9  ;;  %v8497_v29 = vld [vmem:[%s8121_s20 + $0x9c] sm:$0xf] }
  0x5a   : > { %v688_v1 = vor.u32 %v687_v45, %v684_v44  ;;  %v8486_v9 = vcombine.low %v670_v42, %v680_v59  ;;  %v703_v14 = vrot.slane %v701_v55, 5  ;;  %v2093_v18 = vrot.slane %v8449_v56, 5  ;;  %v8503_v45 = vld [vmem:[%s8121_s20 + $0xa0] sm:$0xf] }
  0x5b   : > { %9449 = vst [vmem:[#allocation10_spill] sm:$0xff] %v8482_v60  ;;  %v698_v13 = vor.u32 %v697_v52, %v693_v50  ;;  %6910 = vmatprep.mubr.bf16.mxu1 %v8482_v60  ;;  %v2096_v19 = vrot.slane %v379_v11, 5  ;;  %v706_v12 = vshrl.u32 %v8471_v38, 16  ;;  %v709_v32 = vshll.u32 %v8471_v38, 16 }
  0x5c   : > { %v689_v16 = vrot.slane %v688_v1, 4  ;;  %6718 = vmatprep.mubr.bf16.mxu0 %v8486_v9  ;;  %v2094_v35 = vsel %vm8137_vm4, %v5996_v8, %v2093_v18  ;;  %v2095_v36 = vrot.slane %v2093_v18, 4  ;;  %v715_v37 = vshll.u32 %v8476_v46, 16  ;;  %v385_v18 = vld [vmem:[%s8121_s20 + $0xa4] sm:$0x1] }
  0x5d   : > { %v699_v33 = vrot.slane %v698_v13, 4  ;;  %v708_v11 = vrot.slane %v706_v12, 4  ;;  %v711_v43 = vrot.slane %v709_v32, 5  ;;  %v719_v44 = vshrl.u32 %v8476_v46, 16 }
  0x5e   : > { %v694_v42 = vsel %vm8151_vm5, %v689_v16, %v693_v50  ;;  %v2097_v52 = vsel %vm8137_vm4, %v2095_v36, %v2096_v19  ;;  %v717_v55 = vrot.slane %v715_v37, 5  ;;  %v725_v59 = vshll.u32 %v382_v62, 16 }
  0x5f   : > { %v704_v49 = vsel %vm8151_vm5, %v699_v33, %v703_v14  ;;  %v8511_v8 = vcombine.low %v2094_v35, %v2097_v52  ;;  %v712_v13 = vor.u32 %v711_v43, %v708_v11  ;;  %v721_v50 = vrot.slane %v719_v44, 4  ;;  %v8525_v11 = vld [vmem:[%s8121_s20 + $0xa8] sm:$0xf] }
  0x60   : > { %v8509_v1 = vcombine.low %v694_v42, %v704_v49  ;;  %v727_v16 = vrot.slane %v725_v59, 5  ;;  %v5997_v12 = vrot.slane %v8471_v38, 9  ;;  %v2100_v32 = vrot.slane %v8476_v46, 5  ;;  %v8530_v59 = vld [vmem:[%s8121_s20 + $0xac] sm:$0xf] }
  0x61   : > { %9450 = vst [vmem:[#allocation11_spill] sm:$0xff] %v8511_v8  ;;  %v2103_v60 = vrot.slane %v382_v62, 5  ;;  %6911 = vmatmul.mubr.bf16.gmra.mrb[20].mxu1 %v8511_v8  ;;  %v713_v14 = vrot.slane %v712_v13, 4  ;;  %v722_v19 = vor.u32 %v721_v50, %v717_v55  ;;  %v730_v33 = vshrl.u32 %v8497_v29, 16 }
  0x62   : > { %6719 = vmatmul.mubr.bf16.gmra.mrb[20].mxu0 %v8509_v1  ;;  %v733_v35 = vshll.u32 %v8497_v29, 16  ;;  %v2101_v36 = vsel %vm8137_vm4, %v5997_v12, %v2100_v32  ;;  %v2102_v37 = vrot.slane %v2100_v32, 4  ;;  %v739_v42 = vshll.u32 %v8503_v45, 16 }
  0x63   : > { %v743_v62 = vshrl.u32 %v8503_v45, 16  ;;  %v718_v43 = vsel %vm8151_vm5, %v713_v14, %v717_v55  ;;  %v723_v44 = vrot.slane %v722_v19, 4  ;;  %v732_v49 = vrot.slane %v730_v33, 4  ;;  %v388_v55 = vld [vmem:[%s8121_s20 + $0xb0] sm:$0x1] }
  0x64   : > { %v735_v52 = vrot.slane %v733_v35, 5  ;;  %v2104_v13 = vsel %vm8137_vm4, %v2102_v37, %v2103_v60  ;;  %v741_v50 = vrot.slane %v739_v42, 5  ;;  %v749_v32 = vshll.u32 %v385_v18, 16 }
  0x65   : > { %v745_v12 = vrot.slane %v743_v62, 4  ;;  %v728_v8 = vsel %vm8151_vm5, %v723_v44, %v727_v16  ;;  %v8536_v4 = vcombine.low %v2101_v36, %v2104_v13  ;;  %v5998_v41 = vrot.slane %v8497_v29, 9  ;;  %v8551_v44 = vld [vmem:[%s8121_s20 + $0xb4] sm:$0xf]  ;;  %v8557_v13 = vld [vmem:[%s8121_s20 + $0xb8] sm:$0xf] }
  0x66   : > { %v736_v17 = vor.u32 %v735_v52, %v732_v49  ;;  %v8540_v14 = vcombine.low %v718_v43, %v728_v8  ;;  %v751_v33 = vrot.slane %v749_v32, 5  ;;  %v2107_v35 = vrot.slane %v8503_v45, 5 }
  0x67   : > { %9451 = vst [vmem:[#allocation12_spill] sm:$0xff] %v8536_v4  ;;  %v746_v19 = vor.u32 %v745_v12, %v741_v50  ;;  %6914 = vmatprep.mubr.bf16.mxu1 %v8536_v4  ;;  %v2110_v37 = vrot.slane %v385_v18, 5  ;;  %v754_v16 = vshrl.u32 %v8525_v11, 16  ;;  %v757_v36 = vshll.u32 %v8525_v11, 16 }
  0x68   : > { %v737_v60 = vrot.slane %v736_v17, 4  ;;  %6722 = vmatprep.mubr.bf16.mxu0 %v8540_v14  ;;  %v2108_v8 = vsel %vm8137_vm4, %v5998_v41, %v2107_v35  ;;  %v2109_v62 = vrot.slane %v2107_v35, 4  ;;  %v763_v43 = vshll.u32 %v8530_v59, 16 }
  0x69   : > { %v747_v42 = vrot.slane %v746_v19, 4  ;;  %v756_v18 = vrot.slane %v754_v16, 4  ;;  %v759_v49 = vrot.slane %v757_v36, 5  ;;  %v767_v52 = vshrl.u32 %v8530_v59, 16 }
  0x6a   : > { %v742_v17 = vsel %vm8151_vm5, %v737_v60, %v741_v50  ;;  %v2111_v41 = vsel %vm8137_vm4, %v2109_v62, %v2110_v37  ;;  %v765_v32 = vrot.slane %v763_v43, 5  ;;  %v773_v19 = vshll.u32 %v388_v55, 16  ;;  %v391_v60 = vld [vmem:[%s8121_s20 + $0xbc] sm:$0x1] }
  0x6b   : > { %v752_v12 = vsel %vm8151_vm5, %v747_v42, %v751_v33  ;;  %v8565_v4 = vcombine.low %v2108_v8, %v2111_v41  ;;  %v760_v2 = vor.u32 %v759_v49, %v756_v18  ;;  %v769_v50 = vrot.slane %v767_v52, 4 }
  0x6c   : > { %v8563_v35 = vcombine.low %v742_v17, %v752_v12  ;;  %v775_v16 = vrot.slane %v773_v19, 5  ;;  %v5999_v36 = vrot.slane %v8525_v11, 9  ;;  %v2114_v28 = vrot.slane %v8530_v59, 5 }
  0x6d   : > { %9452 = vst [vmem:[#allocation13_spill] sm:$0xff] %v8565_v4  ;;  %v2117_v53 = vrot.slane %v388_v55, 5  ;;  %6915 = vmatmul.mubr.bf16.gmra.mrb[24].mxu1 %v8565_v4  ;;  %v761_v33 = vrot.slane %v760_v2, 4  ;;  %v770_v37 = vor.u32 %v769_v50, %v765_v32  ;;  %v778_v42 = vshrl.u32 %v8551_v44, 16 }
  0x6e   : > { %6723 = vmatmul.mubr.bf16.gmra.mrb[24].mxu0 %v8563_v35  ;;  %v781_v8 = vshll.u32 %v8551_v44, 16  ;;  %v2115_v62 = vsel %vm8137_vm4, %v5999_v36, %v2114_v28  ;;  %v2116_v43 = vrot.slane %v2114_v28, 4  ;;  %v787_v17 = vshll.u32 %v8557_v13, 16 }
  0x6f   : > { %v791_v18 = vshrl.u32 %v8557_v13, 16  ;;  %v766_v55 = vsel %vm8151_vm5, %v761_v33, %v765_v32  ;;  %v771_v49 = vrot.slane %v770_v37, 4  ;;  %v780_v52 = vrot.slane %v778_v42, 4 }
  0x70   : > { %v783_v12 = vrot.slane %v781_v8, 5  ;;  %v2118_v2 = vsel %vm8137_vm4, %v2116_v43, %v2117_v53  ;;  %v789_v41 = vrot.slane %v787_v17, 5  ;;  %v797_v50 = vshll.u32 %v391_v60, 16 }
  0x71   : > { %v793_v19 = vrot.slane %v791_v18, 4  ;;  %v776_v36 = vsel %vm8151_vm5, %v771_v49, %v775_v16  ;;  %v8584_v28 = vcombine.low %v2115_v62, %v2118_v2  ;;  %v6000_v24 = vrot.slane %v8551_v44, 9  ;;  %v8006_v18 = vld [vmem:[%s8121_s20] sm:$0xf] }
  0x72   : > { %v784_v4 = vor.u32 %v783_v12, %v780_v52  ;;  %v8587_v32 = vcombine.low %v766_v55, %v776_v36  ;;  %v799_v37 = vrot.slane %v797_v50, 5  ;;  %v2121_v42 = vrot.slane %v8557_v13, 5  ;;  %v8007_v55 = vld [vmem:[%s8121_s20 + $0x4] sm:$0xf]  ;;  %v7907_v50 = vld [vmem:[%s9406_s2 + $0x198] sm:$0xff]  }
  0x73   : > { %9453 = vst [vmem:[#allocation14_spill] sm:$0xff] %v8584_v28  ;;  %v794_v33 = vor.u32 %v793_v19, %v789_v41  ;;  %6918 = vmatprep.mubr.bf16.mxu1 %v8584_v28  ;;  %v2124_v8 = vrot.slane %v391_v60, 5  ;;  %v5895_v49 = vcombine.low %v8006_v18, %v8007_v55  ;;  %v8604_v60 = vcombine.low %v8283_v51, %v8291_v57  ;;  %v7910_v36 = vld [vmem:[%s9406_s2 + $0xa0] sm:$0xff]   ;;  %v7923_v18 = vld [vmem:[%s9406_s2 + $0x1b8] sm:$0xff]  }
  0x74   : > { %v785_v53 = vrot.slane %v784_v4, 4  ;;  %6726 = vmatprep.mubr.bf16.mxu0 %v8587_v32  ;;  %v2122_v62 = vsel %vm8137_vm4, %v6000_v24, %v2121_v42  ;;  %v2123_v43 = vrot.slane %v2121_v42, 4  ;;  %v8608_v24 = vcombine.low %v8321_v25, %v8331_v31  ;;  %v8017_v42 = vld [vmem:[%s8121_s20 + $0x40] sm:$0xf] }
  0x75   : > { %v795_v16 = vrot.slane %v794_v33, 4  ;;  %v8620_v19 = vcombine.low %v8387_v26, %v8393_v34  ;;  %v8624_v51 = vcombine.low %v8419_v10, %v8424_v15  ;;  %v8628_v57 = vcombine.low %v8443_v47, %v8449_v56  ;;  %v8008_v26 = vld [vmem:[%s8121_s20 + $0xc] sm:$0xf]  ;;  %v8009_v34 = vld [vmem:[%s8121_s20 + $0x10] sm:$0xf]  ;;  %v7911_v33 = vld [vmem:[%s9406_s2 + $0x1a0] sm:$0xff]  }
  0x76   : > { %v790_v17 = vsel %vm8151_vm5, %v785_v53, %v789_v41  ;;  %v2125_v4 = vsel %vm8137_vm4, %v2123_v43, %v2124_v8  ;;  %v8616_v41 = vcombine.low %v8351_v48, %v8368_v5  ;;  %v8632_v25 = vcombine.low %v8471_v38, %v8476_v46  ;;  %v7898_v15 = vld [vmem:[%s9406_s2 + $0x88] sm:$0xff]   ;;  %v8010_v47 = vld [vmem:[%s8121_s20 + $0x18] sm:$0xf]  ;;  %v8011_v56 = vld [vmem:[%s8121_s20 + $0x1c] sm:$0xf] }
  0x77   : > { %v800_v52 = vsel %vm8151_vm5, %v795_v16, %v799_v37  ;;  %v8612_v2 = vcombine.low %v2122_v62, %v2125_v4  ;;  %v8636_v31 = vcombine.low %v8497_v29, %v8503_v45  ;;  %v8642_v48 = vcombine.low %v8525_v11, %v8530_v59  ;;  %v7899_v46 = vld [vmem:[%s9406_s2 + $0x188] sm:$0xff]   ;;  %v7903_v29 = vld [vmem:[%s9406_s2 + $0x190] sm:$0xff]   ;;  %v8012_v45 = vld [vmem:[%s8121_s20 + $0x24] sm:$0xf] }
  0x78   : > { %v8610_v12 = vcombine.low %v790_v17, %v800_v52  ;;  %v8646_v5 = vcombine.low %v8551_v44, %v8557_v13  ;;  %v8651_v10 = vcombine.low %v8008_v26, %v8009_v34  ;;  %v8658_v38 = vcombine.low %v8010_v47, %v8011_v56  ;;  %v8013_v11 = vld [vmem:[%s8121_s20 + $0x28] sm:$0xf]  ;;  %v8014_v44 = vld [vmem:[%s8121_s20 + $0x30] sm:$0xf]  ;;  %v7906_v13 = vld [vmem:[%s9406_s2 + $0x98] sm:$0xff]  }
  0x79   : > { %9454 = vst [vmem:[#allocation15_spill] sm:$0xff] %v8612_v2  ;;  %6919 = vmatmul.mubr.bf16.gmra.mrb[28].mxu1 %v8612_v2  ;;  %v8677_v59 = vcombine.low %v8012_v45, %v8013_v11  ;;  %v8016_v37 = vld [vmem:[%s8121_s20 + $0x3c] sm:$0xf]  ;;  %v7914_v8 = vld [vmem:[%s9406_s2 + $0xa8] sm:$0xff]   ;;  %v7918_v62 = vld [vmem:[%s9406_s2 + $0xb0] sm:$0xff]  }
  0x7a   : > { %6727 = vmatmul.mubr.bf16.gmra.mrb[28].mxu0 %v8610_v12  ;;  %6938 = vmatprep.mubr.bf16.mxu1 %v8169_v0  ;;  %v7902_v0 = vld [vmem:[%s9406_s2 + $0x90] sm:$0xff]   ;;  %v8701_v53 = vcombine.low %v8016_v37, %v8017_v42  ;;  %v7915_v16 = vld [vmem:[%s9406_s2 + $0x1a8] sm:$0xff]   ;;  %v7922_v17 = vld [vmem:[%s9406_s2 + $0xb8] sm:$0xff]  }
  0x7b   : > { %6746 = vmatprep.mubr.bf16.mxu0 %v5895_v49  ;;  %v7919_v43 = vld [vmem:[%s9406_s2 + $0x1b0] sm:$0xff]   ;;  %v7924_v55 = vld [vmem:[%s9406_s2 + $0xc0] sm:$0xff]   ;;  %v8761_v34 = vld [vmem:[%s8747_s14 + $0x8] sm:$0x1] }
  0x7c   : > { %v7925_v49 = vld [vmem:[%s9406_s2 + $0x1c0] sm:$0xff]   ;;  %v2889_v56 = vrot.slane %v8761_v34, 5  ;;  %v7926_v45 = vld [vmem:[%s9406_s2 + $0xc8] sm:$0xff]  }
  0x7d   : > { %v8752_v52 = vld [vmem:[%s8747_s14 + $0x4] sm:$0xf]  ;;  %v8758_v26 = vld [vmem:[%s8747_s14] sm:$0xf]  ;;  %v7927_v11 = vld [vmem:[%s9406_s2 + $0x1c8] sm:$0xff]  }
  0x7e   : > { %v2886_v4 = vrot.slane %v8752_v52, 5  ;;  %v7934_v37 = vld [vmem:[%s9406_s2 + $0xe8] sm:$0xff]  }
  0x7f   : > { %v7935_v42 = vld [vmem:[%s9406_s2 + $0x1e8] sm:$0xff]  }
  0x80   : > { %v2888_v47 = vrot.slane %v2886_v4, 4 }
  0x81   : > { %6939 = vmatmul.mubr.bf16.vlgmr.msra.gmra.mrb[0].mxu1 %v8190_v20 }
  0x82   : > { %6747 = vmatmul.mubr.bf16.vlgmr.msra.gmra.mrb[0].mxu0 %v8651_v10  ;;  %6971 = vmatpush3.bf16.msra.mxu1 %v8373_v6 }
  0x83   : > { %6779 = vmatpush3.bf16.msra.mxu0 %v8360_v63  ;;  %6750 = vmatprep.mubr.bf16.mxu0 %v8658_v38  ;;  %v8015_v63 = vld [vmem:[%s8121_s20 + $0x34] sm:$0xf] }
  0x84   : > { %6942 = vmatprep.mubr.bf16.mxu1 %v8229_v58  ;;  %6780 = vmatprep.subr.bf16.mxu0 %v7898_v15  ;;  %v8681_v6 = vcombine.low %v8014_v44, %v8015_v63  ;;  %v7928_v44 = vld [vmem:[%s9406_s2 + $0xd0] sm:$0xff]  }
  0x85   : > { %6972 = vmatprep.subr.bf16.mxu1 %v7899_v46  ;;  %v7929_v63 = vld [vmem:[%s9406_s2 + $0x1d0] sm:$0xff]  }
  0x86   : > { %6973 = vmatpush3.bf16.msra.mxu1 %v7899_v46 }
  0x87   : > { %6781 = vmatpush3.bf16.msra.mxu0 %v7898_v15  ;;  %6974 = vmatprep.subr.bf16.mxu1 %v7903_v29  ;;  %v6073_v15 = vrot.slane %v8758_v26, 9 }
  0x88   : > { %6782 = vmatprep.subr.bf16.mxu0 %v7902_v0 }
  0x89   : > { %6943 = vmatmul.mubr.bf16.gmra.mrb[4].mxu1 %v8256_v23  ;;  %v2887_v46 = vsel %vm8137_vm4, %v6073_v15, %v2886_v4  ;;  %v1670_v4 = vshll.u32 %v8752_v52, 16  ;;  %v1674_v15 = vshrl.u32 %v8752_v52, 16 }
  0x8a   : > { %6751 = vmatmul.mubr.bf16.gmra.mrb[4].mxu0 %v8677_v59  ;;  %6946 = vmatprep.mubr.bf16.mxu1 %v8299_v61 }
  0x8b   : > { %6754 = vmatprep.mubr.bf16.mxu0 %v8681_v6  ;;  %6783 = vmatpush3.bf16.msra.mxu0 %v7902_v0  ;;  %v2890_v0 = vsel %vm8137_vm4, %v2888_v47, %v2889_v56 }
  0x8c   : > { %6975 = vmatpush3.bf16.msra.mxu1 %v7903_v29  ;;  %6784 = vmatprep.subr.bf16.mxu0 %v7906_v13  ;;  %v8769_v29 = vcombine.low %v2887_v46, %v2890_v0  ;;  %v1672_v46 = vrot.slane %v1670_v4, 5  ;;  %v1676_v0 = vrot.slane %v1674_v15, 4  ;;  %v7951_v4 = vld [vmem:[%s9406_s2 + $0x268] sm:$0xff]  }
  0x8d   : > { %6976 = vmatprep.subr.bf16.mxu1 %v7907_v50  ;;  %v7952_v15 = vld [vmem:[%s9406_s2 + $0x368] sm:$0xff]  }
  0x8e   : > { %9455 = vst [vmem:[#allocation16_spill] sm:$0xff] %v8769_v29 }
  0x8f   : > { %6785 = vmatpush3.bf16.msra.mxu0 %v7906_v13  ;;  %v7930_v13 = vld [vmem:[%s9406_s2 + $0xd8] sm:$0xff]  }
  0x90   : > { %6977 = vmatpush3.bf16.msra.mxu1 %v7907_v50  ;;  %6786 = vmatprep.subr.bf16.mxu0 %v7910_v36  ;;  %v7931_v50 = vld [vmem:[%s9406_s2 + $0x1d8] sm:$0xff]  }
  0x91   : > { %6978 = vmatprep.subr.bf16.mxu1 %v7911_v33  ;;  %6947 = vmatmul.mubr.bf16.gmra.mrb[8].mxu1 %v8326_v27 }
  0x92   : > { %6755 = vmatmul.mubr.bf16.gmra.mrb[8].mxu0 %v8701_v53  ;;  %6950 = vmatprep.mubr.bf16.mxu1 %v8375_v7 }
  0x93   : > { %6758 = vmatprep.mubr.bf16.mxu0 %v8604_v60  ;;  %6787 = vmatpush3.bf16.msra.mxu0 %v7910_v36  ;;  %v7932_v36 = vld [vmem:[%s9406_s2 + $0xe0] sm:$0xff]  }
  0x94   : > { %6979 = vmatpush3.bf16.msra.mxu1 %v7911_v33  ;;  %6788 = vmatprep.subr.bf16.mxu0 %v7914_v8  ;;  %v7933_v33 = vld [vmem:[%s9406_s2 + $0x1e0] sm:$0xff]  }
  0x95   : > { %6980 = vmatprep.subr.bf16.mxu1 %v7915_v16 }
  0x97   : > { %6789 = vmatpush3.bf16.msra.mxu0 %v7914_v8  ;;  %v7936_v8 = vld [vmem:[%s9406_s2 + $0xf0] sm:$0xff]  }
  0x98   : > { %6981 = vmatpush3.bf16.msra.mxu1 %v7915_v16  ;;  %6790 = vmatprep.subr.bf16.mxu0 %v7918_v62  ;;  %v7937_v16 = vld [vmem:[%s9406_s2 + $0x1f0] sm:$0xff]  }
  0x99   : > { %6982 = vmatprep.subr.bf16.mxu1 %v7919_v43  ;;  %6951 = vmatmul.mubr.bf16.gmra.mrb[12].mxu1 %v8401_v40 }
  0x9a   : > { %6759 = vmatmul.mubr.bf16.gmra.mrb[12].mxu0 %v8608_v24  ;;  %6954 = vmatprep.mubr.bf16.mxu1 %v8432_v30 }
  0x9b   : > { %6762 = vmatprep.mubr.bf16.mxu0 %v8616_v41  ;;  %6791 = vmatpush3.bf16.msra.mxu0 %v7918_v62  ;;  %v7939_v62 = vld [vmem:[%s9406_s2 + $0xf8] sm:$0xff]  }
  0x9c   : > { %6983 = vmatpush3.bf16.msra.mxu1 %v7919_v43  ;;  %6792 = vmatprep.subr.bf16.mxu0 %v7922_v17  ;;  %v7940_v43 = vld [vmem:[%s9406_s2 + $0x1f8] sm:$0xff]  }
  0x9d   : > { %6984 = vmatprep.subr.bf16.mxu1 %v7923_v18 }
  0x9f   : > { %6793 = vmatpush3.bf16.msra.mxu0 %v7922_v17  ;;  %v7941_v17 = vld [vmem:[%s9406_s2 + $0x240] sm:$0xff]  }
  0xa0   : > { %6985 = vmatpush3.bf16.msra.mxu1 %v7923_v18  ;;  %6826 = vmatprep.subr.bf16.mxu0 %v7924_v55  ;;  %v7942_v18 = vld [vmem:[%s9406_s2 + $0x340] sm:$0xff]  }
  0xa1   : > { %7018 = vmatprep.subr.bf16.mxu1 %v7925_v49  ;;  %6955 = vmatmul.mubr.bf16.gmra.mrb[16].mxu1 %v8455_v3 }
  0xa2   : > { %6763 = vmatmul.mubr.bf16.gmra.mrb[16].mxu0 %v8620_v19  ;;  %6958 = vmatprep.mubr.bf16.mxu1 %v8486_v9 }
  0xa3   : > { %6766 = vmatprep.mubr.bf16.mxu0 %v8624_v51 }
  0xa9   : > { %6959 = vmatmul.mubr.bf16.gmra.mrb[20].mxu1 %v8509_v1 }
  0xaa   : > { %6767 = vmatmul.mubr.bf16.gmra.mrb[20].mxu0 %v8628_v57  ;;  %6962 = vmatprep.mubr.bf16.mxu1 %v8540_v14 }
  0xab   : > { %6770 = vmatprep.mubr.bf16.mxu0 %v8632_v25 }
  0xb1   : > { %6963 = vmatmul.mubr.bf16.gmra.mrb[24].mxu1 %v8563_v35 }
  0xb2   : > { %6771 = vmatmul.mubr.bf16.gmra.mrb[24].mxu0 %v8636_v31  ;;  %6966 = vmatprep.mubr.bf16.mxu1 %v8587_v32 }
  0xb3   : > { %6774 = vmatprep.mubr.bf16.mxu0 %v8642_v48 }
  0xb9   : > { %6967 = vmatmul.mubr.bf16.gmra.mrb[28].mxu1 %v8610_v12 }
  0xba   : > { %6775 = vmatmul.mubr.bf16.gmra.mrb[28].mxu0 %v8646_v5  ;;  %6986 = vmatprep.mubr.bf16.mxu1 %v8190_v20 }
  0xbb   : > { %6794 = vmatprep.mubr.bf16.mxu0 %v8651_v10 }
  0xc1   : > { %6987 = vmatmul.mubr.bf16.vlgmr.msra.gmra.mrb[0].mxu1 %v8229_v58 }
  0xc2   : > { %6795 = vmatmul.mubr.bf16.vlgmr.msra.gmra.mrb[0].mxu0 %v8658_v38  ;;  %7019 = vmatpush3.bf16.msra.mxu1 %v7925_v49  ;;  %v1664_v49 = vshll.u32 %v8758_v26, 16 }
  0xc3   : > { %6827 = vmatpush3.bf16.msra.mxu0 %v7924_v55  ;;  %6798 = vmatprep.mubr.bf16.mxu0 %v8677_v59  ;;  %v1661_v55 = vshrl.u32 %v8758_v26, 16 }
  0xc4   : > { %6990 = vmatprep.mubr.bf16.mxu1 %v8256_v23  ;;  %6828 = vmatprep.subr.bf16.mxu0 %v7926_v45  ;;  %v1666_v56 = vrot.slane %v1664_v49, 5  ;;  %v7950_v49 = vld [vmem:[%s9406_s2 + $0x360] sm:$0xff]  }
  0xc5   : > { %7020 = vmatprep.subr.bf16.mxu1 %v7927_v11  ;;  %v1663_v47 = vrot.slane %v1661_v55, 4  ;;  %v7949_v55 = vld [vmem:[%s9406_s2 + $0x260] sm:$0xff]  }
  0xc6   : > { %7021 = vmatpush3.bf16.msra.mxu1 %v7927_v11  ;;  %v1677_v11 = vor.u32 %v1676_v0, %v1672_v46  ;;  %v7954_v0 = vld [vmem:[%s9406_s2 + $0x370] sm:$0xff]  }
  0xc7   : > { %6829 = vmatpush3.bf16.msra.mxu0 %v7926_v45  ;;  %7022 = vmatprep.subr.bf16.mxu1 %v7929_v63  ;;  %v1667_v45 = vor.u32 %v1666_v56, %v1663_v47  ;;  %v9459_v47 = vld [vmem:[#allocation6_spill] sm:$0xff]  ;;  %v9460_v56 = vld [vmem:[#allocation7_spill] sm:$0xff] }
  0xc8   : > { %6830 = vmatprep.subr.bf16.mxu0 %v7928_v44 }
  0xc9   : > { %6991 = vmatmul.mubr.bf16.gmra.mrb[4].mxu1 %v8299_v61 }
  0xca   : > { %6799 = vmatmul.mubr.bf16.gmra.mrb[4].mxu0 %v8681_v6  ;;  %6994 = vmatprep.mubr.bf16.mxu1 %v8326_v27 }
  0xcb   : > { %6802 = vmatprep.mubr.bf16.mxu0 %v8701_v53  ;;  %6831 = vmatpush3.bf16.msra.mxu0 %v7928_v44  ;;  %v1680_v44 = vshll.u32 %v8761_v34, 16  ;;  %v8862_v34 = vcombine.low %v8758_v26, %v8752_v52  ;;  %v9456_v52 = vld [vmem:[#allocation3_spill] sm:$0xff]  ;;  %v7945_v26 = vld [vmem:[%s9406_s2 + $0x250] sm:$0xff]  }
  0xcc   : > { %7023 = vmatpush3.bf16.msra.mxu1 %v7929_v63  ;;  %6832 = vmatprep.subr.bf16.mxu0 %v7930_v13  ;;  %v1668_v63 = vrot.slane %v1667_v45, 4  ;;  %v7955_v45 = vld [vmem:[%s9406_s2 + $0x278] sm:$0xff]  }
  0xcd   : > { %7024 = vmatprep.subr.bf16.mxu1 %v7931_v50 }
  0xcf   : > { %6833 = vmatpush3.bf16.msra.mxu0 %v7930_v13  ;;  %v1678_v13 = vrot.slane %v1677_v11, 4  ;;  %v7956_v11 = vld [vmem:[%s9406_s2 + $0x378] sm:$0xff]  }
  0xd0   : > { %7025 = vmatpush3.bf16.msra.mxu1 %v7931_v50  ;;  %6834 = vmatprep.subr.bf16.mxu0 %v7932_v36  ;;  %v1682_v50 = vrot.slane %v1680_v44, 5  ;;  %v9461_v44 = vld [vmem:[#allocation8_spill] sm:$0xff] }
  0xd1   : > { %7026 = vmatprep.subr.bf16.mxu1 %v7933_v33  ;;  %6995 = vmatmul.mubr.bf16.gmra.mrb[8].mxu1 %v8375_v7 }
  0xd2   : > { %6803 = vmatmul.mubr.bf16.gmra.mrb[8].mxu0 %v8604_v60  ;;  %6998 = vmatprep.mubr.bf16.mxu1 %v8401_v40 }
  0xd3   : > { %6806 = vmatprep.mubr.bf16.mxu0 %v8608_v24  ;;  %6835 = vmatpush3.bf16.msra.mxu0 %v7932_v36  ;;  %v1673_v36 = vsel %vm8151_vm5, %v1668_v63, %v1672_v46  ;;  %v7953_v46 = vld [vmem:[%s9406_s2 + $0x270] sm:$0xff]   ;;  %v9462_v63 = vld [vmem:[#allocation9_spill] sm:$0xff] }
  0xd4   : > { %7027 = vmatpush3.bf16.msra.mxu1 %v7933_v33  ;;  %6836 = vmatprep.subr.bf16.mxu0 %v7934_v37  ;;  %v1683_v33 = vsel %vm8151_vm5, %v1678_v13, %v1682_v50  ;;  %v7957_v13 = vld [vmem:[%s9406_s2 + $0x200] sm:$0xff]  }
  0xd5   : > { %7028 = vmatprep.subr.bf16.mxu1 %v7935_v42  ;;  %v7958_v50 = vld [vmem:[%s9406_s2 + $0x300] sm:$0xff]  }
  0xd7   : > { %6837 = vmatpush3.bf16.msra.mxu0 %v7934_v37  ;;  %v8864_v37 = vcombine.low %v1673_v36, %v1683_v33  ;;  %v9463_v36 = vld [vmem:[#allocation10_spill] sm:$0xff]  ;;  %v9464_v33 = vld [vmem:[#allocation11_spill] sm:$0xff] }
  0xd8   : > { %7029 = vmatpush3.bf16.msra.mxu1 %v7935_v42  ;;  %6838 = vmatprep.subr.bf16.mxu0 %v7936_v8  ;;  %v7943_v42 = vld [vmem:[%s9406_s2 + $0x248] sm:$0xff]  }
  0xd9   : > { %7030 = vmatprep.subr.bf16.mxu1 %v7937_v16  ;;  %6999 = vmatmul.mubr.bf16.gmra.mrb[12].mxu1 %v8432_v30 }
  0xda   : > { %6807 = vmatmul.mubr.bf16.gmra.mrb[12].mxu0 %v8616_v41  ;;  %7002 = vmatprep.mubr.bf16.mxu1 %v8455_v3 }
  0xdb   : > { %6810 = vmatprep.mubr.bf16.mxu0 %v8620_v19  ;;  %6839 = vmatpush3.bf16.msra.mxu0 %v7936_v8  ;;  %v7944_v8 = vld [vmem:[%s9406_s2 + $0x348] sm:$0xff]  }
  0xdc   : > { %7031 = vmatpush3.bf16.msra.mxu1 %v7937_v16  ;;  %6840 = vmatprep.subr.bf16.mxu0 %v7939_v62  ;;  %v7946_v16 = vld [vmem:[%s9406_s2 + $0x350] sm:$0xff]  }
  0xdd   : > { %7032 = vmatprep.subr.bf16.mxu1 %v7940_v43 }
  0xdf   : > { %6841 = vmatpush3.bf16.msra.mxu0 %v7939_v62  ;;  %v7947_v62 = vld [vmem:[%s9406_s2 + $0x258] sm:$0xff]  }
  0xe0   : > { %7033 = vmatpush3.bf16.msra.mxu1 %v7940_v43  ;;  %7066 = vmatprep.subr.bf16.mxu0 %v7941_v17  ;;  %v7948_v43 = vld [vmem:[%s9406_s2 + $0x358] sm:$0xff]  }
  0xe1   : > { %7258 = vmatprep.subr.bf16.mxu1 %v7942_v18  ;;  %7003 = vmatmul.mubr.bf16.gmra.mrb[16].mxu1 %v8486_v9 }
  0xe2   : > { %6811 = vmatmul.mubr.bf16.gmra.mrb[16].mxu0 %v8624_v51  ;;  %7006 = vmatprep.mubr.bf16.mxu1 %v8509_v1 }
  0xe3   : > { %6814 = vmatprep.mubr.bf16.mxu0 %v8628_v57 }
  0xe9   : > { %7007 = vmatmul.mubr.bf16.gmra.mrb[20].mxu1 %v8540_v14 }
  0xea   : > { %6815 = vmatmul.mubr.bf16.gmra.mrb[20].mxu0 %v8632_v25  ;;  %7010 = vmatprep.mubr.bf16.mxu1 %v8563_v35 }
  0xeb   : > { %6818 = vmatprep.mubr.bf16.mxu0 %v8636_v31 }
  0xf1   : > { %7011 = vmatmul.mubr.bf16.gmra.mrb[24].mxu1 %v8587_v32 }
  0xf2   : > { %6819 = vmatmul.mubr.bf16.gmra.mrb[24].mxu0 %v8642_v48  ;;  %7014 = vmatprep.mubr.bf16.mxu1 %v8610_v12 }
  0xf3   : > { %6822 = vmatprep.mubr.bf16.mxu0 %v8646_v5 }
  0xf9   : > { %7015 = vmatmul.mubr.bf16.gmra.mrb[28].mxu1 %v8864_v37 }
  0xfa   : > { %6823 = vmatmul.mubr.bf16.gmra.mrb[28].mxu0 %v8862_v34  ;;  %7034 = vmatprep.mubr.bf16.mxu1 %v8192_v22 }
  0xfb   : > { %6842 = vmatprep.mubr.bf16.mxu0 %v8190_v20 }
 0x101   : > { %7035 = vmatmul.mubr.bf16.vlgmr.msra.gmra.mrb[0].mxu1 %v8223_v54 }
 0x102   : > { %6843 = vmatmul.mubr.bf16.vlgmr.msra.gmra.mrb[0].mxu0 %v8229_v58  ;;  %7259 = vmatpush3.bf16.msra.mxu1 %v7942_v18  ;;  %v9458_v18 = vld [vmem:[#allocation5_spill] sm:$0xff] }
 0x103   : > { %7067 = vmatpush3.bf16.msra.mxu0 %v7941_v17  ;;  %6846 = vmatprep.mubr.bf16.mxu0 %v8256_v23  ;;  %v9457_v17 = vld [vmem:[#allocation4_spill] sm:$0xff] }
 0x104   : > { %7038 = vmatprep.mubr.bf16.mxu1 %v9456_v52  ;;  %7068 = vmatprep.subr.bf16.mxu0 %v7943_v42 }
 0x105   : > { %7260 = vmatprep.subr.bf16.mxu1 %v7944_v8 }
 0x106   : > { %7261 = vmatpush3.bf16.msra.mxu1 %v7944_v8  ;;  %v9466_v8 = vld [vmem:[#allocation13_spill] sm:$0xff] }
 0x107   : > { %7069 = vmatpush3.bf16.msra.mxu0 %v7943_v42  ;;  %7262 = vmatprep.subr.bf16.mxu1 %v7946_v16  ;;  %v9465_v42 = vld [vmem:[#allocation12_spill] sm:$0xff] }
 0x108   : > { %7070 = vmatprep.subr.bf16.mxu0 %v7945_v26 }
 0x109   : > { %7039 = vmatmul.mubr.bf16.gmra.mrb[4].mxu1 %v9457_v17 }
 0x10a   : > { %6847 = vmatmul.mubr.bf16.gmra.mrb[4].mxu0 %v8299_v61  ;;  %7042 = vmatprep.mubr.bf16.mxu1 %v9458_v18 }
 0x10b   : > { %6850 = vmatprep.mubr.bf16.mxu0 %v8326_v27  ;;  %7071 = vmatpush3.bf16.msra.mxu0 %v7945_v26  ;;  %v7959_v26 = vld [vmem:[%s9406_s2 + $0x208] sm:$0xff]  }
 0x10c   : > { %7263 = vmatpush3.bf16.msra.mxu1 %v7946_v16  ;;  %7072 = vmatprep.subr.bf16.mxu0 %v7947_v62  ;;  %v7960_v16 = vld [vmem:[%s9406_s2 + $0x308] sm:$0xff]  }
 0x10d   : > { %7264 = vmatprep.subr.bf16.mxu1 %v7948_v43 }
 0x10f   : > { %7073 = vmatpush3.bf16.msra.mxu0 %v7947_v62  ;;  %v7962_v62 = vld [vmem:[%s9406_s2 + $0x310] sm:$0xff]  }
 0x110   : > { %7265 = vmatpush3.bf16.msra.mxu1 %v7948_v43  ;;  %7074 = vmatprep.subr.bf16.mxu0 %v7949_v55  ;;  %v7963_v43 = vld [vmem:[%s9406_s2 + $0x218] sm:$0xff]  }
 0x111   : > { %7266 = vmatprep.subr.bf16.mxu1 %v7950_v49  ;;  %7043 = vmatmul.mubr.bf16.gmra.mrb[8].mxu1 %v9459_v47 }
 0x112   : > { %6851 = vmatmul.mubr.bf16.gmra.mrb[8].mxu0 %v8375_v7  ;;  %7046 = vmatprep.mubr.bf16.mxu1 %v9460_v56 }
 0x113   : > { %6854 = vmatprep.mubr.bf16.mxu0 %v8401_v40  ;;  %7075 = vmatpush3.bf16.msra.mxu0 %v7949_v55  ;;  %v7964_v55 = vld [vmem:[%s9406_s2 + $0x318] sm:$0xff]  }
 0x114   : > { %7267 = vmatpush3.bf16.msra.mxu1 %v7950_v49  ;;  %7076 = vmatprep.subr.bf16.mxu0 %v7951_v4  ;;  %v7965_v49 = vld [vmem:[%s9406_s2 + $0x220] sm:$0xff]  }
 0x115   : > { %7268 = vmatprep.subr.bf16.mxu1 %v7952_v15 }
 0x117   : > { %7077 = vmatpush3.bf16.msra.mxu0 %v7951_v4  ;;  %v7966_v4 = vld [vmem:[%s9406_s2 + $0x320] sm:$0xff]  }
 0x118   : > { %7269 = vmatpush3.bf16.msra.mxu1 %v7952_v15  ;;  %7078 = vmatprep.subr.bf16.mxu0 %v7953_v46  ;;  %v7967_v15 = vld [vmem:[%s9406_s2 + $0x228] sm:$0xff]  }
 0x119   : > { %7270 = vmatprep.subr.bf16.mxu1 %v7954_v0  ;;  %7047 = vmatmul.mubr.bf16.gmra.mrb[12].mxu1 %v9461_v44 }
 0x11a   : > { %6855 = vmatmul.mubr.bf16.gmra.mrb[12].mxu0 %v8432_v30  ;;  %7050 = vmatprep.mubr.bf16.mxu1 %v9462_v63 }
 0x11b   : > { %6858 = vmatprep.mubr.bf16.mxu0 %v8455_v3  ;;  %7079 = vmatpush3.bf16.msra.mxu0 %v7953_v46  ;;  %v7968_v46 = vld [vmem:[%s9406_s2 + $0x328] sm:$0xff]  }
 0x11c   : > { %7271 = vmatpush3.bf16.msra.mxu1 %v7954_v0  ;;  %7080 = vmatprep.subr.bf16.mxu0 %v7955_v45  ;;  %v7969_v0 = vld [vmem:[%s9406_s2 + $0x230] sm:$0xff]  }
 0x11d   : > { %7272 = vmatprep.subr.bf16.mxu1 %v7956_v11 }
 0x11f   : > { %7081 = vmatpush3.bf16.msra.mxu0 %v7955_v45  ;;  %v7970_v45 = vld [vmem:[%s9406_s2 + $0x330] sm:$0xff]  }
 0x120   : > { %7273 = vmatpush3.bf16.msra.mxu1 %v7956_v11  ;;  %7114 = vmatprep.subr.bf16.mxu0 %v7957_v13  ;;  %v7971_v11 = vld [vmem:[%s9406_s2 + $0x238] sm:$0xff]  }
 0x121   : > { %7306 = vmatprep.subr.bf16.mxu1 %v7958_v50  ;;  %7051 = vmatmul.mubr.bf16.gmra.mrb[16].mxu1 %v9463_v36 }
 0x122   : > { %6859 = vmatmul.mubr.bf16.gmra.mrb[16].mxu0 %v8486_v9  ;;  %7054 = vmatprep.mubr.bf16.mxu1 %v9464_v33 }
 0x123   : > { %6862 = vmatprep.mubr.bf16.mxu0 %v8509_v1 }
 0x129   : > { %7055 = vmatmul.mubr.bf16.gmra.mrb[20].mxu1 %v9465_v42 }
 0x12a   : > { %6863 = vmatmul.mubr.bf16.gmra.mrb[20].mxu0 %v8540_v14  ;;  %7058 = vmatprep.mubr.bf16.mxu1 %v9466_v8 }
 0x12b   : > { %6866 = vmatprep.mubr.bf16.mxu0 %v8563_v35 }
 0x131   : > { %7059 = vmatmul.mubr.bf16.gmra.mrb[24].mxu1 %v8584_v28 }
 0x132   : > { %6867 = vmatmul.mubr.bf16.gmra.mrb[24].mxu0 %v8587_v32  ;;  %7062 = vmatprep.mubr.bf16.mxu1 %v8612_v2 }
 0x133   : > { %6870 = vmatprep.mubr.bf16.mxu0 %v8610_v12 }
 0x139   : > { %7063 = vmatmul.mubr.bf16.gmra.mrb[28].mxu1 %v8769_v29 }
 0x13a   : > { %6871 = vmatmul.mubr.bf16.gmra.mrb[28].mxu0 %v8864_v37  ;;  %7274 = vmatprep.mubr.bf16.mxu1 %v8192_v22  ;;  %v7961_v22 = vld [vmem:[%s9406_s2 + $0x210] sm:$0xff]  }
 0x13b   : > { %7082 = vmatprep.mubr.bf16.mxu0 %v8190_v20 }
 0x141   : > { %7275 = vmatmul.mubr.bf16.vlgmr.msra.gmra.mrb[32].mxu1 %v8223_v54 }
 0x142   : > { %7083 = vmatmul.mubr.bf16.vlgmr.msra.gmra.mrb[32].mxu0 %v8229_v58  ;;  %7307 = vmatpush3.bf16.msra.mxu1 %v7958_v50  ;;  %v7973_v50 = vld [vmem:[%s9406_s2 + $0x280] sm:$0xff]  }
 0x143   : > { %7115 = vmatpush3.bf16.msra.mxu0 %v7957_v13  ;;  %7086 = vmatprep.mubr.bf16.mxu0 %v8256_v23  ;;  %v7972_v13 = vld [vmem:[%s9406_s2 + $0x338] sm:$0xff]  }
 0x144   : > { %7278 = vmatprep.mubr.bf16.mxu1 %v9456_v52  ;;  %7116 = vmatprep.subr.bf16.mxu0 %v7959_v26 }
 0x145   : > { %7308 = vmatprep.subr.bf16.mxu1 %v7960_v16 }
 0x146   : > { %7309 = vmatpush3.bf16.msra.mxu1 %v7960_v16  ;;  %v7975_v16 = vld [vmem:[%s9406_s2 + $0x288] sm:$0xff]  }
 0x147   : > { %7117 = vmatpush3.bf16.msra.mxu0 %v7959_v26  ;;  %7310 = vmatprep.subr.bf16.mxu1 %v7962_v62  ;;  %v7974_v26 = vld [vmem:[%s9406_s2 + $0x380] sm:$0xff]  }
 0x148   : > { %7118 = vmatprep.subr.bf16.mxu0 %v7961_v22 }
 0x149   : > { %7279 = vmatmul.mubr.bf16.gmra.mrb[36].mxu1 %v9457_v17 }
 0x14a   : > { %7087 = vmatmul.mubr.bf16.gmra.mrb[36].mxu0 %v8299_v61  ;;  %7282 = vmatprep.mubr.bf16.mxu1 %v9458_v18 }
 0x14b   : > { %7090 = vmatprep.mubr.bf16.mxu0 %v8326_v27  ;;  %7119 = vmatpush3.bf16.msra.mxu0 %v7961_v22  ;;  %v7976_v22 = vld [vmem:[%s9406_s2 + $0x388] sm:$0xff]  }
 0x14c   : > { %7311 = vmatpush3.bf16.msra.mxu1 %v7962_v62  ;;  %7120 = vmatprep.subr.bf16.mxu0 %v7963_v43  ;;  %v7979_v62 = vld [vmem:[%s9406_s2 + $0x298] sm:$0xff]  }
 0x14d   : > { %7312 = vmatprep.subr.bf16.mxu1 %v7964_v55 }
 0x14f   : > { %7121 = vmatpush3.bf16.msra.mxu0 %v7963_v43  ;;  %v7980_v43 = vld [vmem:[%s9406_s2 + $0x398] sm:$0xff]  }
 0x150   : > { %7313 = vmatpush3.bf16.msra.mxu1 %v7964_v55  ;;  %7122 = vmatprep.subr.bf16.mxu0 %v7965_v49  ;;  %v7981_v55 = vld [vmem:[%s9406_s2 + $0x2a0] sm:$0xff]  }
 0x151   : > { %7314 = vmatprep.subr.bf16.mxu1 %v7966_v4  ;;  %7283 = vmatmul.mubr.bf16.gmra.mrb[40].mxu1 %v9459_v47 }
 0x152   : > { %7091 = vmatmul.mubr.bf16.gmra.mrb[40].mxu0 %v8375_v7  ;;  %7286 = vmatprep.mubr.bf16.mxu1 %v9460_v56 }
 0x153   : > { %7094 = vmatprep.mubr.bf16.mxu0 %v8401_v40  ;;  %7123 = vmatpush3.bf16.msra.mxu0 %v7965_v49  ;;  %v7982_v49 = vld [vmem:[%s9406_s2 + $0x3a0] sm:$0xff]  }
 0x154   : > { %7315 = vmatpush3.bf16.msra.mxu1 %v7966_v4  ;;  %7124 = vmatprep.subr.bf16.mxu0 %v7967_v15  ;;  %v7983_v4 = vld [vmem:[%s9406_s2 + $0x2a8] sm:$0xff]  }
 0x155   : > { %7316 = vmatprep.subr.bf16.mxu1 %v7968_v46 }
 0x157   : > { %7125 = vmatpush3.bf16.msra.mxu0 %v7967_v15  ;;  %v7984_v15 = vld [vmem:[%s9406_s2 + $0x3a8] sm:$0xff]  }
 0x158   : > { %7317 = vmatpush3.bf16.msra.mxu1 %v7968_v46  ;;  %7126 = vmatprep.subr.bf16.mxu0 %v7969_v0  ;;  %v7985_v46 = vld [vmem:[%s9406_s2 + $0x2b0] sm:$0xff]  }
 0x159   : > { %7318 = vmatprep.subr.bf16.mxu1 %v7970_v45  ;;  %7287 = vmatmul.mubr.bf16.gmra.mrb[44].mxu1 %v9461_v44 }
 0x15a   : > { %7095 = vmatmul.mubr.bf16.gmra.mrb[44].mxu0 %v8432_v30  ;;  %7290 = vmatprep.mubr.bf16.mxu1 %v9462_v63 }
 0x15b   : > { %7098 = vmatprep.mubr.bf16.mxu0 %v8455_v3  ;;  %7127 = vmatpush3.bf16.msra.mxu0 %v7969_v0  ;;  %v7986_v0 = vld [vmem:[%s9406_s2 + $0x3b0] sm:$0xff]  }
 0x15c   : > { %7319 = vmatpush3.bf16.msra.mxu1 %v7970_v45  ;;  %7128 = vmatprep.subr.bf16.mxu0 %v7971_v11  ;;  %v7987_v45 = vld [vmem:[%s9406_s2 + $0x2b8] sm:$0xff]  }
 0x15d   : > { %7320 = vmatprep.subr.bf16.mxu1 %v7972_v13 }
 0x15f   : > { %7129 = vmatpush3.bf16.msra.mxu0 %v7971_v11  ;;  %v7988_v11 = vld [vmem:[%s9406_s2 + $0x3b8] sm:$0xff]  }
 0x160   : > { %7321 = vmatpush3.bf16.msra.mxu1 %v7972_v13  ;;  %7162 = vmatprep.subr.bf16.mxu0 %v7973_v50  ;;  %v7989_v13 = vld [vmem:[%s9406_s2 + $0x2c0] sm:$0xff]  }
 0x161   : > { %7354 = vmatprep.subr.bf16.mxu1 %v7974_v26  ;;  %7291 = vmatmul.mubr.bf16.gmra.mrb[48].mxu1 %v9463_v36 }
 0x162   : > { %7099 = vmatmul.mubr.bf16.gmra.mrb[48].mxu0 %v8486_v9  ;;  %7294 = vmatprep.mubr.bf16.mxu1 %v9464_v33 }
 0x163   : > { %7102 = vmatprep.mubr.bf16.mxu0 %v8509_v1 }
 0x169   : > { %7295 = vmatmul.mubr.bf16.gmra.mrb[52].mxu1 %v9465_v42 }
 0x16a   : > { %7103 = vmatmul.mubr.bf16.gmra.mrb[52].mxu0 %v8540_v14  ;;  %7298 = vmatprep.mubr.bf16.mxu1 %v9466_v8 }
 0x16b   : > { %7106 = vmatprep.mubr.bf16.mxu0 %v8563_v35 }
 0x171   : > { %7299 = vmatmul.mubr.bf16.gmra.mrb[56].mxu1 %v8584_v28 }
 0x172   : > { %7107 = vmatmul.mubr.bf16.gmra.mrb[56].mxu0 %v8587_v32  ;;  %7302 = vmatprep.mubr.bf16.mxu1 %v8612_v2 }
 0x173   : > { %7110 = vmatprep.mubr.bf16.mxu0 %v8610_v12 }
 0x179   : > { %7303 = vmatmul.mubr.bf16.gmra.mrb[60].mxu1 %v8769_v29 }
 0x17a   : > { %7111 = vmatmul.mubr.bf16.gmra.mrb[60].mxu0 %v8864_v37  ;;  %7322 = vmatprep.mubr.bf16.mxu1 %v8190_v20  ;;  %v7977_v20 = vld [vmem:[%s9406_s2 + $0x290] sm:$0xff]  }
 0x17b   : > { %7130 = vmatprep.mubr.bf16.mxu0 %v8651_v10  ;;  %v7978_v10 = vld [vmem:[%s9406_s2 + $0x390] sm:$0xff]  }
 0x181   : > { %7323 = vmatmul.mubr.bf16.vlgmr.msra.gmra.mrb[32].mxu1 %v8229_v58 }
 0x182   : > { %7131 = vmatmul.mubr.bf16.vlgmr.msra.gmra.mrb[32].mxu0 %v8658_v38  ;;  %7355 = vmatpush3.bf16.msra.mxu1 %v7974_v26  ;;  %v7991_v26 = vld [vmem:[%s9406_s2 + $0x2c8] sm:$0xff]  }
 0x183   : > { %7163 = vmatpush3.bf16.msra.mxu0 %v7973_v50  ;;  %7134 = vmatprep.mubr.bf16.mxu0 %v8677_v59  ;;  %v7990_v50 = vld [vmem:[%s9406_s2 + $0x3c0] sm:$0xff]  }
 0x184   : > { %7326 = vmatprep.mubr.bf16.mxu1 %v8256_v23  ;;  %7164 = vmatprep.subr.bf16.mxu0 %v7975_v16 }
 0x185   : > { %7356 = vmatprep.subr.bf16.mxu1 %v7976_v22 }
 0x186   : > { %7357 = vmatpush3.bf16.msra.mxu1 %v7976_v22  ;;  %v7994_v22 = vld [vmem:[%s9406_s2 + $0x3d0] sm:$0xff]  }
 0x187   : > { %7165 = vmatpush3.bf16.msra.mxu0 %v7975_v16  ;;  %7358 = vmatprep.subr.bf16.mxu1 %v7978_v10  ;;  %v7992_v16 = vld [vmem:[%s9406_s2 + $0x3c8] sm:$0xff]  }
 0x188   : > { %7166 = vmatprep.subr.bf16.mxu0 %v7977_v20 }
 0x189   : > { %7327 = vmatmul.mubr.bf16.gmra.mrb[36].mxu1 %v8299_v61 }
 0x18a   : > { %7135 = vmatmul.mubr.bf16.gmra.mrb[36].mxu0 %v8681_v6  ;;  %7330 = vmatprep.mubr.bf16.mxu1 %v8326_v27 }
 0x18b   : > { %7138 = vmatprep.mubr.bf16.mxu0 %v8701_v53  ;;  %7167 = vmatpush3.bf16.msra.mxu0 %v7977_v20  ;;  %v7997_v20 = vld [vmem:[%s9406_s2 + $0x2e0] sm:$0xff]  }
 0x18c   : > { %7359 = vmatpush3.bf16.msra.mxu1 %v7978_v10  ;;  %7168 = vmatprep.subr.bf16.mxu0 %v7979_v62  ;;  %v7998_v10 = vld [vmem:[%s9406_s2 + $0x3e0] sm:$0xff]  }
 0x18d   : > { %7360 = vmatprep.subr.bf16.mxu1 %v7980_v43 }
 0x18f   : > { %7169 = vmatpush3.bf16.msra.mxu0 %v7979_v62 }
 0x190   : > { %7361 = vmatpush3.bf16.msra.mxu1 %v7980_v43  ;;  %7170 = vmatprep.subr.bf16.mxu0 %v7981_v55  ;;  %v8001_v43 = vld [vmem:[%s9406_s2 + $0x2f0] sm:$0xff]  }
 0x191   : > { %7362 = vmatprep.subr.bf16.mxu1 %v7982_v49  ;;  %7331 = vmatmul.mubr.bf16.gmra.mrb[40].mxu1 %v8375_v7 }
 0x192   : > { %7139 = vmatmul.mubr.bf16.gmra.mrb[40].mxu0 %v8604_v60  ;;  %7334 = vmatprep.mubr.bf16.mxu1 %v8401_v40 }
 0x193   : > { %7142 = vmatprep.mubr.bf16.mxu0 %v8608_v24  ;;  %7171 = vmatpush3.bf16.msra.mxu0 %v7981_v55 }
 0x194   : > { %7363 = vmatpush3.bf16.msra.mxu1 %v7982_v49  ;;  %7172 = vmatprep.subr.bf16.mxu0 %v7983_v4 }
 0x195   : > { %7364 = vmatprep.subr.bf16.mxu1 %v7984_v15 }
 0x197   : > { %7173 = vmatpush3.bf16.msra.mxu0 %v7983_v4 }
 0x198   : > { %7365 = vmatpush3.bf16.msra.mxu1 %v7984_v15  ;;  %7174 = vmatprep.subr.bf16.mxu0 %v7985_v46 }
 0x199   : > { %7366 = vmatprep.subr.bf16.mxu1 %v7986_v0  ;;  %7335 = vmatmul.mubr.bf16.gmra.mrb[44].mxu1 %v8432_v30 }
 0x19a   : > { %7143 = vmatmul.mubr.bf16.gmra.mrb[44].mxu0 %v8616_v41  ;;  %7338 = vmatprep.mubr.bf16.mxu1 %v8455_v3 }
 0x19b   : > { %7146 = vmatprep.mubr.bf16.mxu0 %v8620_v19  ;;  %7175 = vmatpush3.bf16.msra.mxu0 %v7985_v46 }
 0x19c   : > { %7367 = vmatpush3.bf16.msra.mxu1 %v7986_v0  ;;  %7176 = vmatprep.subr.bf16.mxu0 %v7987_v45 }
 0x19d   : > { %7368 = vmatprep.subr.bf16.mxu1 %v7988_v11 }
 0x19f   : > { %7177 = vmatpush3.bf16.msra.mxu0 %v7987_v45 }
 0x1a0   : > { %7369 = vmatpush3.bf16.msra.mxu1 %v7988_v11  ;;  %7210 = vmatprep.subr.bf16.mxu0 %v7989_v13 }
 0x1a1   : > { %7402 = vmatprep.subr.bf16.mxu1 %v7990_v50  ;;  %7339 = vmatmul.mubr.bf16.gmra.mrb[48].mxu1 %v8486_v9 }
 0x1a2   : > { %7147 = vmatmul.mubr.bf16.gmra.mrb[48].mxu0 %v8624_v51  ;;  %7342 = vmatprep.mubr.bf16.mxu1 %v8509_v1 }
 0x1a3   : > { %7150 = vmatprep.mubr.bf16.mxu0 %v8628_v57 }
 0x1a9   : > { %7343 = vmatmul.mubr.bf16.gmra.mrb[52].mxu1 %v8540_v14 }
 0x1aa   : > { %7151 = vmatmul.mubr.bf16.gmra.mrb[52].mxu0 %v8632_v25  ;;  %7346 = vmatprep.mubr.bf16.mxu1 %v8563_v35 }
 0x1ab   : > { %7154 = vmatprep.mubr.bf16.mxu0 %v8636_v31 }
 0x1b1   : > { %7347 = vmatmul.mubr.bf16.gmra.mrb[56].mxu1 %v8587_v32 }
 0x1b2   : > { %7155 = vmatmul.mubr.bf16.gmra.mrb[56].mxu0 %v8642_v48  ;;  %7350 = vmatprep.mubr.bf16.mxu1 %v8610_v12 }
 0x1b3   : > { %7158 = vmatprep.mubr.bf16.mxu0 %v8646_v5 }
 0x1b9   : > { %7351 = vmatmul.mubr.bf16.gmra.mrb[60].mxu1 %v8864_v37 }
 0x1ba   : > { %7159 = vmatmul.mubr.bf16.gmra.mrb[60].mxu0 %v8862_v34  ;;  %7370 = vmatprep.mubr.bf16.mxu1 %v8229_v58 }
 0x1bb   : > { %7178 = vmatprep.mubr.bf16.mxu0 %v8658_v38  ;;  %v7993_v38 = vld [vmem:[%s9406_s2 + $0x2d0] sm:$0xff]  }
 0x1c1   : > { %7371 = vmatmul.mubr.bf16.vlgmr.msra.gmra.mrb[32].mxu1 %v8256_v23 }
 0x1c2   : > { %7179 = vmatmul.mubr.bf16.vlgmr.msra.gmra.mrb[32].mxu0 %v8677_v59  ;;  %7403 = vmatpush3.bf16.msra.mxu1 %v7990_v50  ;;  %v7995_v59 = vld [vmem:[%s9406_s2 + $0x2d8] sm:$0xff]  }
 0x1c3   : > { %7211 = vmatpush3.bf16.msra.mxu0 %v7989_v13  ;;  %7182 = vmatprep.mubr.bf16.mxu0 %v8681_v6  ;;  %v7996_v6 = vld [vmem:[%s9406_s2 + $0x3d8] sm:$0xff]  }
 0x1c4   : > { %7374 = vmatprep.mubr.bf16.mxu1 %v8299_v61  ;;  %7212 = vmatprep.subr.bf16.mxu0 %v7991_v26 }
 0x1c5   : > { %7404 = vmatprep.subr.bf16.mxu1 %v7992_v16 }
 0x1c6   : > { %7405 = vmatpush3.bf16.msra.mxu1 %v7992_v16  ;;  %v8002_v16 = vld [vmem:[%s9406_s2 + $0x3f0] sm:$0xff]  }
 0x1c7   : > { %7213 = vmatpush3.bf16.msra.mxu0 %v7991_v26  ;;  %7406 = vmatprep.subr.bf16.mxu1 %v7994_v22 }
 0x1c8   : > { %7214 = vmatprep.subr.bf16.mxu0 %v7993_v38 }
 0x1c9   : > { %7375 = vmatmul.mubr.bf16.gmra.mrb[36].mxu1 %v8326_v27 }
 0x1ca   : > { %7183 = vmatmul.mubr.bf16.gmra.mrb[36].mxu0 %v8701_v53  ;;  %7378 = vmatprep.mubr.bf16.mxu1 %v8375_v7  ;;  %v8000_v53 = vld [vmem:[%s9406_s2 + $0x3e8] sm:$0xff]  }
 0x1cb   : > { %7186 = vmatprep.mubr.bf16.mxu0 %v8604_v60  ;;  %7215 = vmatpush3.bf16.msra.mxu0 %v7993_v38  ;;  %v7999_v60 = vld [vmem:[%s9406_s2 + $0x2e8] sm:$0xff]  }
 0x1cc   : > { %7407 = vmatpush3.bf16.msra.mxu1 %v7994_v22  ;;  %7216 = vmatprep.subr.bf16.mxu0 %v7995_v59  ;;  %v9173_v38 = vld [vmem:[%s8747_s14 + $0xc] sm:$0xf] }
 0x1cd   : > { %7408 = vmatprep.subr.bf16.mxu1 %v7996_v6 }
 0x1cf   : > { %7217 = vmatpush3.bf16.msra.mxu0 %v7995_v59 }
 0x1d0   : > { %7409 = vmatpush3.bf16.msra.mxu1 %v7996_v6  ;;  %7218 = vmatprep.subr.bf16.mxu0 %v7997_v20  ;;  %v8004_v6 = vld [vmem:[%s9406_s2 + $0x2f8] sm:$0xff]  }
 0x1d1   : > { %7410 = vmatprep.subr.bf16.mxu1 %v7998_v10  ;;  %7379 = vmatmul.mubr.bf16.gmra.mrb[40].mxu1 %v8401_v40 }
 0x1d2   : > { %7187 = vmatmul.mubr.bf16.gmra.mrb[40].mxu0 %v8608_v24  ;;  %7382 = vmatprep.mubr.bf16.mxu1 %v8432_v30 }
 0x1d3   : > { %7190 = vmatprep.mubr.bf16.mxu0 %v8616_v41  ;;  %7219 = vmatpush3.bf16.msra.mxu0 %v7997_v20 }
 0x1d4   : > { %7411 = vmatpush3.bf16.msra.mxu1 %v7998_v10  ;;  %v7036_v24 = vpop.f32.mrb[0].mxu1  ;;  %7220 = vmatprep.subr.bf16.mxu0 %v7999_v60 }
 0x1d5   : > { %v6844_v62 = vpop.f32.mrb[0].mxu0  ;;  %7412 = vmatprep.subr.bf16.mxu1 %v8000_v53  ;;  %3155 = vst [vmem:[%s9154_s24 + $0x48] sm:$0xff] %v7036_v24  ;;  %v2994_v49 = vpop.f32.mrb[1].mxu1  ;;  %v5379_v59 = vmul.f32 %v7036_v24, %v7036_v24 }
 0x1d6   : > { %1948 = vst [vmem:[%s9154_s24 + $0x40] sm:$0xff] %v6844_v62  ;;  %v1787_v55 = vpop.f32.mrb[1].mxu0  ;;  %3153 = vst [vmem:[%s9154_s24 + $0x8] sm:$0xff] %v2994_v49  ;;  %v7037_v4 = vpop.f32.mrb[2].mxu1  ;;  %v5377_v46 = vmul.f32 %v2994_v49, %v2994_v49  ;;  %v5271_v22 = vmul.f32 %v6844_v62, %v6844_v62 }
 0x1d7   : > { %1946 = vst [vmem:[%s9154_s24] sm:$0xff] %v1787_v55  ;;  %v6845_v41 = vpop.f32.mrb[2].mxu0  ;;  %v5269_v15 = vmul.f32 %v1787_v55, %v1787_v55  ;;  %3156 = vst [vmem:[%s9154_s24 + $0x68] sm:$0xff] %v7037_v4  ;;  %v2997_v45 = vpop.f32.mrb[3].mxu1  ;;  %7221 = vmatpush3.bf16.msra.mxu0 %v7999_v60 }
 0x1d8   : > { %1949 = vst [vmem:[%s9154_s24 + $0x60] sm:$0xff] %v6845_v41  ;;  %v1790_v0 = vpop.f32.mrb[3].mxu0  ;;  %7413 = vmatpush3.bf16.msra.mxu1 %v8000_v53  ;;  %3154 = vst [vmem:[%s9154_s24 + $0x28] sm:$0xff] %v2997_v45  ;;  %v5339_v50 = vadd.f32 %v2997_v45, %v2994_v49  ;;  %v5378_v26 = vmul.f32 %v2997_v45, %v2997_v45  ;;  %7222 = vmatprep.subr.bf16.mxu0 %v8001_v43 }
 0x1d9   : > { %1947 = vst [vmem:[%s9154_s24 + $0x20] sm:$0xff] %v1790_v0  ;;  %v5231_v11 = vadd.f32 %v1790_v0, %v1787_v55  ;;  %v5270_v13 = vmul.f32 %v1790_v0, %v1790_v0  ;;  %7383 = vmatmul.mubr.bf16.gmra.mrb[44].mxu1 %v8455_v3  ;;  %v9182_v55 = vld [vmem:[%s8747_s14 + $0x10] sm:$0xf]  ;;  %v5272_v49 = vmul.f32 %v6845_v41, %v6845_v41  ;;  %v3902_v0 = vshrl.u32 %v9173_v38, 16 }
 0x1da   : > { %7191 = vmatmul.mubr.bf16.gmra.mrb[44].mxu0 %v8620_v19  ;;  %v5340_v60 = vadd.f32 %v7036_v24, %v5339_v50  ;;  %v5409_v53 = vadd.f32 %v5378_v26, %v5377_v46  ;;  %v8005_v19 = vld [vmem:[%s9406_s2 + $0x3f8] sm:$0xff]   ;;  %7386 = vmatprep.mubr.bf16.mxu1 %v8486_v9  ;;  %v3915_v26 = vshrl.u32 %v9182_v55, 16  ;;  %v3911_v2 = vshll.u32 %v9182_v55, 16 }
 0x1db   : > { %v5232_v20 = vadd.f32 %v6844_v62, %v5231_v11  ;;  %v5301_v10 = vadd.f32 %v5270_v13, %v5269_v15  ;;  %7194 = vmatprep.mubr.bf16.mxu0 %v8624_v51  ;;  %7223 = vmatpush3.bf16.msra.mxu0 %v8001_v43  ;;  %v5380_v11 = vmul.f32 %v7037_v4, %v7037_v4  ;;  %v3905_v43 = vshll.u32 %v9173_v38, 16 }
 0x1dc   : > { %v5410_v24 = vadd.f32 %v5409_v53, %v5379_v59  ;;  %v7040_v46 = vpop.f32.mrb[4].mxu1  ;;  %v5341_v51 = vadd.f32 %v7037_v4, %v5340_v60  ;;  %7414 = vmatprep.subr.bf16.mxu1 %v8002_v16  ;;  %7224 = vmatprep.subr.bf16.mxu0 %v8004_v6  ;;  %v9197_v29 = vrot.slane %v3902_v0, 4 }
 0x1dd   : > { %v5302_v62 = vadd.f32 %v5301_v10, %v5271_v22  ;;  %v6848_v15 = vpop.f32.mrb[4].mxu0  ;;  %v5233_v45 = vadd.f32 %v6845_v41, %v5232_v20  ;;  %3159 = vst [vmem:[%s9154_s24 + $0xc8] sm:$0xff] %v7040_v46  ;;  %v3010_v50 = vpop.f32.mrb[5].mxu1  ;;  %7415 = vmatpush3.bf16.msra.mxu1 %v8002_v16 }
 0x1de   : > { %1952 = vst [vmem:[%s9154_s24 + $0xc0] sm:$0xff] %v6848_v15  ;;  %v1803_v13 = vpop.f32.mrb[5].mxu0  ;;  %3157 = vst [vmem:[%s9154_s24 + $0x88] sm:$0xff] %v3010_v50  ;;  %v5342_v20 = vadd.f32 %v5341_v51, %v3010_v50  ;;  %v7041_v10 = vpop.f32.mrb[6].mxu1  ;;  %7416 = vmatprep.subr.bf16.mxu1 %v8005_v19  ;;  %v5381_v60 = vmul.f32 %v3010_v50, %v3010_v50  ;;  %v5411_v53 = vadd.f32 %v5410_v24, %v5380_v11 }
 0x1df   : > { %1950 = vst [vmem:[%s9154_s24 + $0x80] sm:$0xff] %v1803_v13  ;;  %v5234_v22 = vadd.f32 %v5233_v45, %v1803_v13  ;;  %v5273_v59 = vmul.f32 %v1803_v13, %v1803_v13  ;;  %v5303_v41 = vadd.f32 %v5302_v62, %v5272_v49  ;;  %v6849_v4 = vpop.f32.mrb[6].mxu0  ;;  %3160 = vst [vmem:[%s9154_s24 + $0xe8] sm:$0xff] %v7041_v10  ;;  %v3013_v21 = vpop.f32.mrb[7].mxu1  ;;  %7225 = vmatpush3.bf16.msra.mxu0 %v8004_v6 }
 0x1e0   : > { %1953 = vst [vmem:[%s9154_s24 + $0xe0] sm:$0xff] %v6849_v4  ;;  %v1806_v16 = vpop.f32.mrb[7].mxu0  ;;  %3158 = vst [vmem:[%s9154_s24 + $0xa8] sm:$0xff] %v3013_v21  ;;  %v5343_v51 = vadd.f32 %v5342_v20, %v3013_v21  ;;  %v5275_v13 = vmul.f32 %v6848_v15, %v6848_v15  ;;  %v5412_v28 = vadd.f32 %v5411_v53, %v5381_v60  ;;  %v3907_v24 = vrot.slane %v3905_v43, 5  ;;  %v9209_v53 = vld [vmem:[%s8747_s14 + $0x14] sm:$0x1] }
 0x1e1   : > { %v5304_v45 = vadd.f32 %v5303_v41, %v5273_v59  ;;  %1951 = vst [vmem:[%s9154_s24 + $0xa0] sm:$0xff] %v1806_v16  ;;  %v5235_v49 = vadd.f32 %v5234_v22, %v1806_v16  ;;  %v5274_v62 = vmul.f32 %v1806_v16, %v1806_v16  ;;  %v5382_v8 = vmul.f32 %v3013_v21, %v3013_v21  ;;  %s5854_s14 = sshll.u32 %s9477_s15, 1 }
 0x1e2   : > { %7195 = vmatmul.mubr.bf16.gmra.mrb[48].mxu0 %v8628_v57  ;;  %7387 = vmatmul.mubr.bf16.gmra.mrb[48].mxu1 %v8509_v1  ;;  %v5344_v50 = vadd.f32 %v7040_v46, %v5343_v51  ;;  %v5383_v6 = vmul.f32 %v7040_v46, %v7040_v46  ;;  %v9206_v59 = vrot.slane %v3911_v2, 5  ;;  %v3917_v21 = vrot.slane %v3915_v26, 4  ;;  %s342_s8 = scalar_lea.vmem %s9408_s4, %s5854_s14 }
 0x1e3   : > { %v5236_v11 = vadd.f32 %v6848_v15, %v5235_v49  ;;  %v5305_v0 = vadd.f32 %v5304_v45, %v5274_v62  ;;  %7198 = vmatprep.mubr.bf16.mxu0 %v8632_v25  ;;  %7390 = vmatprep.mubr.bf16.mxu1 %v8540_v14  ;;  %v5413_v22 = vadd.f32 %v5412_v28, %v5382_v8 }
 0x1e4   : > { %7417 = vmatpush3.bf16.msra.mxu1 %v8005_v19  ;;  %v5276_v57 = vmul.f32 %v6849_v4, %v6849_v4  ;;  %v7044_v15 = vpop.f32.mrb[8].mxu1  ;;  %v5345_v60 = vadd.f32 %v7041_v10, %v5344_v50  ;;  %v5384_v25 = vmul.f32 %v7041_v10, %v7041_v10  ;;  %v3908_v8 = vor.u32 %v3907_v24, %v9197_v29 }
 0x1e5   : > { %v5306_v41 = vadd.f32 %v5305_v0, %v5275_v13  ;;  %v6852_v43 = vpop.f32.mrb[8].mxu0  ;;  %v5237_v20 = vadd.f32 %v6849_v4, %v5236_v11  ;;  %v5414_v16 = vadd.f32 %v5413_v22, %v5383_v6  ;;  %3163 = vst [vmem:[%s9154_s24 + $0x148] sm:$0xff] %v7044_v15  ;;  %v3026_v2 = vpop.f32.mrb[9].mxu1  ;;  %v3918_v11 = vor.u32 %v3917_v21, %v9206_v59 }
 0x1e6   : > { %1956 = vst [vmem:[%s9154_s24 + $0x140] sm:$0xff] %v6852_v43  ;;  %v1819_v28 = vpop.f32.mrb[9].mxu0  ;;  %3161 = vst [vmem:[%s9154_s24 + $0x108] sm:$0xff] %v3026_v2  ;;  %v5346_v4 = vadd.f32 %v5345_v60, %v3026_v2  ;;  %v7045_v49 = vpop.f32.mrb[10].mxu1  ;;  %v5385_v10 = vmul.f32 %v3026_v2, %v3026_v2  ;;  %v3921_v29 = vshll.u32 %v9209_v53, 16  ;;  %v5279_v22 = vmul.f32 %v6852_v43, %v6852_v43 }
 0x1e7   : > { %1954 = vst [vmem:[%s9154_s24 + $0x100] sm:$0xff] %v1819_v28  ;;  %v5238_v19 = vadd.f32 %v5237_v20, %v1819_v28  ;;  %v5277_v46 = vmul.f32 %v1819_v28, %v1819_v28  ;;  %v5307_v26 = vadd.f32 %v5306_v41, %v5276_v57  ;;  %v6853_v45 = vpop.f32.mrb[10].mxu0  ;;  %v5415_v62 = vadd.f32 %v5414_v16, %v5384_v25  ;;  %v3029_v13 = vpop.f32.mrb[11].mxu1 }
 0x1e8   : > { %1957 = vst [vmem:[%s9154_s24 + $0x160] sm:$0xff] %v6853_v45  ;;  %3164 = vst [vmem:[%s9154_s24 + $0x168] sm:$0xff] %v7045_v49  ;;  %v1822_v51 = vpop.f32.mrb[11].mxu0  ;;  %v5347_v6 = vadd.f32 %v5346_v4, %v3029_v13  ;;  %v5386_v41 = vmul.f32 %v3029_v13, %v3029_v13  ;;  %v9226_v21 = vrot.slane %v3908_v8, 4  ;;  %v5387_v16 = vmul.f32 %v7044_v15, %v7044_v15 }
 0x1e9   : > { %v5308_v24 = vadd.f32 %v5307_v26, %v5277_v46  ;;  %1955 = vst [vmem:[%s9154_s24 + $0x120] sm:$0xff] %v1822_v51  ;;  %v5239_v0 = vadd.f32 %v5238_v19, %v1822_v51  ;;  %v5278_v50 = vmul.f32 %v1822_v51, %v1822_v51  ;;  %3162 = vst [vmem:[%s9154_s24 + $0x128] sm:$0xff] %v3029_v13  ;;  %v3919_v2 = vrot.slane %v3918_v11, 4 }
 0x1ea   : > { %v5416_v57 = vadd.f32 %v5415_v62, %v5385_v10  ;;  %7199 = vmatmul.mubr.bf16.gmra.mrb[52].mxu0 %v8636_v31  ;;  %7391 = vmatmul.mubr.bf16.gmra.mrb[52].mxu1 %v8563_v35  ;;  %v5348_v25 = vadd.f32 %v7044_v15, %v5347_v6  ;;  %v3923_v19 = vrot.slane %v3921_v29, 5  ;;  %v5280_v46 = vmul.f32 %v6853_v45, %v6853_v45 }
 0x1eb   : > { %v5240_v20 = vadd.f32 %v6852_v43, %v5239_v0  ;;  %v5309_v60 = vadd.f32 %v5308_v24, %v5278_v50  ;;  %7202 = vmatprep.mubr.bf16.mxu0 %v8642_v48  ;;  %7394 = vmatprep.mubr.bf16.mxu1 %v8587_v32  ;;  %v5388_v62 = vmul.f32 %v7045_v49, %v7045_v49 }
 0x1ec   : > { %v5417_v28 = vadd.f32 %v5416_v57, %v5386_v41  ;;  %v7048_v43 = vpop.f32.mrb[12].mxu1  ;;  %v5349_v10 = vadd.f32 %v7045_v49, %v5348_v25  ;;  %v3924_v57 = vsel %vm8151_vm5, %v3919_v2, %v3923_v19 }
 0x1ed   : > { %v5310_v31 = vadd.f32 %v5309_v60, %v5279_v22  ;;  %v6856_v26 = vpop.f32.mrb[12].mxu0  ;;  %v5241_v4 = vadd.f32 %v6853_v45, %v5240_v20  ;;  %3167 = vst [vmem:[%s9154_s24 + $0x1c8] sm:$0xff] %v7048_v43  ;;  %v3042_v51 = vpop.f32.mrb[13].mxu1  ;;  %v3914_v22 = vsel %vm8151_vm5, %v9226_v21, %v9206_v59  ;;  %v5391_v39 = vmul.f32 %v7048_v43, %v7048_v43 }
 0x1ee   : > { %v5418_v48 = vadd.f32 %v5417_v28, %v5387_v16  ;;  %1960 = vst [vmem:[%s9154_s24 + $0x1c0] sm:$0xff] %v6856_v26  ;;  %v1835_v8 = vpop.f32.mrb[13].mxu0  ;;  %3165 = vst [vmem:[%s9154_s24 + $0x188] sm:$0xff] %v3042_v51  ;;  %v5350_v29 = vadd.f32 %v5349_v10, %v3042_v51  ;;  %v7049_v0 = vpop.f32.mrb[14].mxu1  ;;  %v5389_v45 = vmul.f32 %v3042_v51, %v3042_v51 }
 0x1ef   : > { %1958 = vst [vmem:[%s9154_s24 + $0x180] sm:$0xff] %v1835_v8  ;;  %v5242_v15 = vadd.f32 %v5241_v4, %v1835_v8  ;;  %v5281_v13 = vmul.f32 %v1835_v8, %v1835_v8  ;;  %v5311_v11 = vadd.f32 %v5310_v31, %v5280_v46  ;;  %v6857_v24 = vpop.f32.mrb[14].mxu0  ;;  %3168 = vst [vmem:[%s9154_s24 + $0x1e8] sm:$0xff] %v7049_v0  ;;  %v3045_v6 = vpop.f32.mrb[15].mxu1 }
 0x1f0   : > { %v5419_v50 = vadd.f32 %v5418_v48, %v5388_v62  ;;  %1961 = vst [vmem:[%s9154_s24 + $0x1e0] sm:$0xff] %v6857_v24  ;;  %v1838_v49 = vpop.f32.mrb[15].mxu0  ;;  %3166 = vst [vmem:[%s9154_s24 + $0x1a8] sm:$0xff] %v3045_v6  ;;  %v5351_v25 = vadd.f32 %v5350_v29, %v3045_v6  ;;  %v5283_v16 = vmul.f32 %v6856_v26, %v6856_v26 }
 0x1f1   : > { %v5312_v41 = vadd.f32 %v5311_v11, %v5281_v13  ;;  %1959 = vst [vmem:[%s9154_s24 + $0x1a0] sm:$0xff] %v1838_v49  ;;  %v5243_v20 = vadd.f32 %v5242_v15, %v1838_v49  ;;  %v5282_v60 = vmul.f32 %v1838_v49, %v1838_v49  ;;  %v5390_v46 = vmul.f32 %v3045_v6, %v3045_v6 }
 0x1f2   : > { %v5420_v28 = vadd.f32 %v5419_v50, %v5389_v45  ;;  %7203 = vmatmul.mubr.bf16.gmra.mrb[56].mxu0 %v8646_v5  ;;  %7395 = vmatmul.mubr.bf16.gmra.mrb[56].mxu1 %v8610_v12  ;;  %v5352_v21 = vadd.f32 %v7048_v43, %v5351_v25  ;;  %v5284_v19 = vmul.f32 %v6857_v24, %v6857_v24 }
 0x1f3   : > { %v5244_v31 = vadd.f32 %v6856_v26, %v5243_v20  ;;  %v5313_v59 = vadd.f32 %v5312_v41, %v5282_v60  ;;  %7206 = vmatprep.mubr.bf16.mxu0 %v8862_v34  ;;  %7398 = vmatprep.mubr.bf16.mxu1 %v8864_v37  ;;  %v5392_v8 = vmul.f32 %v7049_v0, %v7049_v0 }
 0x1f4   : > { %v5421_v2 = vadd.f32 %v5420_v28, %v5390_v46  ;;  %v7052_v62 = vpop.f32.mrb[16].mxu1  ;;  %v5353_v48 = vadd.f32 %v7049_v0, %v5352_v21  ;;  %v6163_v43 = vcombine.low %v9173_v38, %v9182_v55  ;;  %v9250_v15 = vcombine.low %v3914_v22, %v3924_v57 }
 0x1f5   : > { %v5314_v4 = vadd.f32 %v5313_v59, %v5283_v16  ;;  %v6860_v10 = vpop.f32.mrb[16].mxu0  ;;  %v5245_v5 = vadd.f32 %v6857_v24, %v5244_v31  ;;  %3171 = vst [vmem:[%s9154_s24 + $0x248] sm:$0xff] %v7052_v62  ;;  %v3058_v34 = vpop.f32.mrb[17].mxu1  ;;  %v5395_v21 = vmul.f32 %v7052_v62, %v7052_v62 }
 0x1f6   : > { %v5422_v51 = vadd.f32 %v5421_v2, %v5391_v39  ;;  %1964 = vst [vmem:[%s9154_s24 + $0x240] sm:$0xff] %v6860_v10  ;;  %v1851_v26 = vpop.f32.mrb[17].mxu0  ;;  %3169 = vst [vmem:[%s9154_s24 + $0x208] sm:$0xff] %v3058_v34  ;;  %v5354_v24 = vadd.f32 %v5353_v48, %v3058_v34  ;;  %v7053_v45 = vpop.f32.mrb[18].mxu1  ;;  %v5393_v50 = vmul.f32 %v3058_v34, %v3058_v34 }
 0x1f7   : > { %1962 = vst [vmem:[%s9154_s24 + $0x200] sm:$0xff] %v1851_v26  ;;  %v5246_v13 = vadd.f32 %v5245_v5, %v1851_v26  ;;  %v5285_v11 = vmul.f32 %v1851_v26, %v1851_v26  ;;  %v5315_v29 = vadd.f32 %v5314_v4, %v5284_v19  ;;  %v6861_v0 = vpop.f32.mrb[18].mxu0  ;;  %3172 = vst [vmem:[%s9154_s24 + $0x268] sm:$0xff] %v7053_v45  ;;  %v3061_v41 = vpop.f32.mrb[19].mxu1 }
 0x1f8   : > { %v5423_v49 = vadd.f32 %v5422_v51, %v5392_v8  ;;  %1965 = vst [vmem:[%s9154_s24 + $0x260] sm:$0xff] %v6861_v0  ;;  %v1854_v6 = vpop.f32.mrb[19].mxu0  ;;  %3170 = vst [vmem:[%s9154_s24 + $0x228] sm:$0xff] %v3061_v41  ;;  %v5355_v60 = vadd.f32 %v5354_v24, %v3061_v41  ;;  %v5287_v25 = vmul.f32 %v6860_v10, %v6860_v10 }
 0x1f9   : > { %v5316_v20 = vadd.f32 %v5315_v29, %v5285_v11  ;;  %1963 = vst [vmem:[%s9154_s24 + $0x220] sm:$0xff] %v1854_v6  ;;  %v5247_v22 = vadd.f32 %v5246_v13, %v1854_v6  ;;  %v5286_v57 = vmul.f32 %v1854_v6, %v1854_v6  ;;  %v5394_v28 = vmul.f32 %v3061_v41, %v3061_v41 }
 0x1fa   : > { %v5424_v16 = vadd.f32 %v5423_v49, %v5393_v50  ;;  %7207 = vmatmul.mubr.bf16.gmra.mrb[60].mxu0 %v6163_v43  ;;  %7399 = vmatmul.mubr.bf16.gmra.mrb[60].mxu1 %v9250_v15  ;;  %v5356_v59 = vadd.f32 %v7052_v62, %v5355_v60  ;;  %v5288_v2 = vmul.f32 %v6861_v0, %v6861_v0 }
 0x1fb   : > { %v5248_v46 = vadd.f32 %v6860_v10, %v5247_v22  ;;  %v5317_v31 = vadd.f32 %v5316_v20, %v5286_v57  ;;  %7226 = vmatprep.mubr.bf16.mxu0 %v8229_v58  ;;  %7418 = vmatprep.mubr.bf16.mxu1 %v8223_v54  ;;  %v5396_v51 = vmul.f32 %v7053_v45, %v7053_v45 }
 0x1fc   : > { %v5425_v39 = vadd.f32 %v5424_v16, %v5394_v28  ;;  %v7056_v5 = vpop.f32.mrb[20].mxu1  ;;  %v5357_v8 = vadd.f32 %v7053_v45, %v5356_v59 }
 0x1fd   : > { %v5318_v19 = vadd.f32 %v5317_v31, %v5287_v25  ;;  %v6864_v4 = vpop.f32.mrb[20].mxu0  ;;  %v5249_v48 = vadd.f32 %v6861_v0, %v5248_v46  ;;  %3175 = vst [vmem:[%s9154_s24 + $0x2c8] sm:$0xff] %v7056_v5  ;;  %v3074_v58 = vpop.f32.mrb[21].mxu1  ;;  %v5399_v28 = vmul.f32 %v7056_v5, %v7056_v5 }
 0x1fe   : > { %v5426_v10 = vadd.f32 %v5425_v39, %v5395_v21  ;;  %1968 = vst [vmem:[%s9154_s24 + $0x2c0] sm:$0xff] %v6864_v4  ;;  %v1867_v26 = vpop.f32.mrb[21].mxu0  ;;  %3173 = vst [vmem:[%s9154_s24 + $0x288] sm:$0xff] %v3074_v58  ;;  %v5358_v43 = vadd.f32 %v5357_v8, %v3074_v58  ;;  %v7057_v11 = vpop.f32.mrb[22].mxu1  ;;  %v5397_v29 = vmul.f32 %v3074_v58, %v3074_v58 }
 0x1ff   : > { %1966 = vst [vmem:[%s9154_s24 + $0x280] sm:$0xff] %v1867_v26  ;;  %v5250_v54 = vadd.f32 %v5249_v48, %v1867_v26  ;;  %v5289_v62 = vmul.f32 %v1867_v26, %v1867_v26  ;;  %v5319_v34 = vadd.f32 %v5318_v19, %v5288_v2  ;;  %v6865_v13 = vpop.f32.mrb[22].mxu0  ;;  %3176 = vst [vmem:[%s9154_s24 + $0x2e8] sm:$0xff] %v7057_v11  ;;  %v3077_v45 = vpop.f32.mrb[23].mxu1 }
 0x200   : > { %v5427_v24 = vadd.f32 %v5426_v10, %v5396_v51  ;;  %1969 = vst [vmem:[%s9154_s24 + $0x2e0] sm:$0xff] %v6865_v13  ;;  %v1870_v0 = vpop.f32.mrb[23].mxu0  ;;  %3174 = vst [vmem:[%s9154_s24 + $0x2a8] sm:$0xff] %v3077_v45  ;;  %v5359_v41 = vadd.f32 %v5358_v43, %v3077_v45  ;;  %v5291_v20 = vmul.f32 %v6864_v4, %v6864_v4 }
 0x201   : > { %v5320_v50 = vadd.f32 %v5319_v34, %v5289_v62  ;;  %1967 = vst [vmem:[%s9154_s24 + $0x2a0] sm:$0xff] %v1870_v0  ;;  %v5251_v49 = vadd.f32 %v5250_v54, %v1870_v0  ;;  %v5290_v6 = vmul.f32 %v1870_v0, %v1870_v0  ;;  %v5398_v57 = vmul.f32 %v3077_v45, %v3077_v45 }
 0x202   : > { %v5428_v22 = vadd.f32 %v5427_v24, %v5397_v29  ;;  %7227 = vmatmul.mubr.bf16.vlgmr.msra.gmra.mrb[32].mxu0 %v8256_v23  ;;  %7419 = vmatmul.mubr.bf16.vlgmr.msra.gmra.mrb[32].mxu1 %v9456_v52  ;;  %v5360_v16 = vadd.f32 %v7056_v5, %v5359_v41  ;;  %v5292_v31 = vmul.f32 %v6865_v13, %v6865_v13 }
 0x203   : > { %v5252_v60 = vadd.f32 %v6864_v4, %v5251_v49  ;;  %v5321_v25 = vadd.f32 %v5320_v50, %v5290_v6  ;;  %7230 = vmatprep.mubr.bf16.mxu0 %v8299_v61  ;;  %7422 = vmatprep.mubr.bf16.mxu1 %v9457_v17  ;;  %v5400_v52 = vmul.f32 %v7057_v11, %v7057_v11 }
 0x204   : > { %v5429_v46 = vadd.f32 %v5428_v22, %v5398_v57  ;;  %v7060_v39 = vpop.f32.mrb[24].mxu1  ;;  %v5361_v2 = vadd.f32 %v7057_v11, %v5360_v16 }
 0x205   : > { %v5322_v59 = vadd.f32 %v5321_v25, %v5291_v20  ;;  %v6868_v21 = vpop.f32.mrb[24].mxu0  ;;  %v5253_v23 = vadd.f32 %v6865_v13, %v5252_v60  ;;  %3179 = vst [vmem:[%s9154_s24 + $0x348] sm:$0xff] %v7060_v39  ;;  %v3090_v61 = vpop.f32.mrb[25].mxu1  ;;  %v5403_v6 = vmul.f32 %v7060_v39, %v7060_v39 }
 0x206   : > { %v5430_v19 = vadd.f32 %v5429_v46, %v5399_v28  ;;  %1972 = vst [vmem:[%s9154_s24 + $0x340] sm:$0xff] %v6868_v21  ;;  %v1883_v4 = vpop.f32.mrb[25].mxu0  ;;  %3177 = vst [vmem:[%s9154_s24 + $0x308] sm:$0xff] %v3090_v61  ;;  %v5362_v8 = vadd.f32 %v5361_v2, %v3090_v61  ;;  %v7061_v10 = vpop.f32.mrb[26].mxu1  ;;  %v5401_v26 = vmul.f32 %v3090_v61, %v3090_v61 }
 0x207   : > { %1970 = vst [vmem:[%s9154_s24 + $0x300] sm:$0xff] %v1883_v4  ;;  %v5254_v17 = vadd.f32 %v5253_v23, %v1883_v4  ;;  %v5293_v5 = vmul.f32 %v1883_v4, %v1883_v4  ;;  %v5323_v48 = vadd.f32 %v5322_v59, %v5292_v31  ;;  %v6869_v51 = vpop.f32.mrb[26].mxu0  ;;  %3180 = vst [vmem:[%s9154_s24 + $0x368] sm:$0xff] %v7061_v10  ;;  %v3093_v62 = vpop.f32.mrb[27].mxu1 }
 0x208   : > { %v5431_v58 = vadd.f32 %v5430_v19, %v5400_v52  ;;  %1973 = vst [vmem:[%s9154_s24 + $0x360] sm:$0xff] %v6869_v51  ;;  %v1886_v54 = vpop.f32.mrb[27].mxu0  ;;  %3178 = vst [vmem:[%s9154_s24 + $0x328] sm:$0xff] %v3093_v62  ;;  %v5363_v11 = vadd.f32 %v5362_v8, %v3093_v62  ;;  %v5295_v29 = vmul.f32 %v6868_v21, %v6868_v21 }
 0x209   : > { %v5324_v34 = vadd.f32 %v5323_v48, %v5293_v5  ;;  %1971 = vst [vmem:[%s9154_s24 + $0x320] sm:$0xff] %v1886_v54  ;;  %v5255_v43 = vadd.f32 %v5254_v17, %v1886_v54  ;;  %v5294_v13 = vmul.f32 %v1886_v54, %v1886_v54  ;;  %v5402_v0 = vmul.f32 %v3093_v62, %v3093_v62 }
 0x20a   : > { %v5432_v24 = vadd.f32 %v5431_v58, %v5401_v26  ;;  %7231 = vmatmul.mubr.bf16.gmra.mrb[36].mxu0 %v8326_v27  ;;  %7423 = vmatmul.mubr.bf16.gmra.mrb[36].mxu1 %v9458_v18  ;;  %v5364_v49 = vadd.f32 %v7060_v39, %v5363_v11  ;;  %v5296_v20 = vmul.f32 %v6869_v51, %v6869_v51 }
 0x20b   : > { %v5256_v45 = vadd.f32 %v6868_v21, %v5255_v43  ;;  %v5325_v50 = vadd.f32 %v5324_v34, %v5294_v13  ;;  %7234 = vmatprep.mubr.bf16.mxu0 %v8375_v7  ;;  %7426 = vmatprep.mubr.bf16.mxu1 %v9459_v47  ;;  %v5404_v18 = vmul.f32 %v7061_v10, %v7061_v10 }
 0x20c   : > { %v5433_v41 = vadd.f32 %v5432_v24, %v5402_v0  ;;  %v7064_v60 = vpop.f32.mrb[28].mxu1  ;;  %v5365_v25 = vadd.f32 %v7061_v10, %v5364_v49 }
 0x20d   : > { %v5326_v22 = vadd.f32 %v5325_v50, %v5295_v29  ;;  %v6872_v57 = vpop.f32.mrb[28].mxu0  ;;  %v5257_v27 = vadd.f32 %v6869_v51, %v5256_v45  ;;  %3183 = vst [vmem:[%s9154_s24 + $0x3c8] sm:$0xff] %v7064_v60  ;;  %v3106_v7 = vpop.f32.mrb[29].mxu1  ;;  %v5407_v54 = vmul.f32 %v7064_v60, %v7064_v60 }
 0x20e   : > { %v5434_v16 = vadd.f32 %v5433_v41, %v5403_v6  ;;  %1976 = vst [vmem:[%s9154_s24 + $0x3c0] sm:$0xff] %v6872_v57  ;;  %v1899_v28 = vpop.f32.mrb[29].mxu0  ;;  %3181 = vst [vmem:[%s9154_s24 + $0x388] sm:$0xff] %v3106_v7  ;;  %v5366_v59 = vadd.f32 %v5365_v25, %v3106_v7  ;;  %v7065_v39 = vpop.f32.mrb[30].mxu1  ;;  %v5405_v23 = vmul.f32 %v3106_v7, %v3106_v7 }
 0x20f   : > { %1974 = vst [vmem:[%s9154_s24 + $0x380] sm:$0xff] %v1899_v28  ;;  %v5258_v47 = vadd.f32 %v5257_v27, %v1899_v28  ;;  %v5297_v46 = vmul.f32 %v1899_v28, %v1899_v28  ;;  %v5327_v31 = vadd.f32 %v5326_v22, %v5296_v20  ;;  %v6873_v21 = vpop.f32.mrb[30].mxu0  ;;  %3184 = vst [vmem:[%s9154_s24 + $0x3e8] sm:$0xff] %v7065_v39  ;;  %v3109_v19 = vpop.f32.mrb[31].mxu1 }
 0x210   : > { %v5435_v2 = vadd.f32 %v5434_v16, %v5404_v18  ;;  %1977 = vst [vmem:[%s9154_s24 + $0x3e0] sm:$0xff] %v6873_v21  ;;  %v1902_v52 = vpop.f32.mrb[31].mxu0  ;;  %3182 = vst [vmem:[%s9154_s24 + $0x3a8] sm:$0xff] %v3109_v19  ;;  %v5367_v5 = vadd.f32 %v5366_v59, %v3109_v19  ;;  %v5299_v48 = vmul.f32 %v6872_v57, %v6872_v57 }
 0x211   : > { %v5328_v4 = vadd.f32 %v5327_v31, %v5297_v46  ;;  %1975 = vst [vmem:[%s9154_s24 + $0x3a0] sm:$0xff] %v1902_v52  ;;  %v5259_v61 = vadd.f32 %v5258_v47, %v1902_v52  ;;  %v5298_v17 = vmul.f32 %v1902_v52, %v1902_v52  ;;  %v5406_v51 = vmul.f32 %v3109_v19, %v3109_v19 }
 0x212   : > { %v5436_v8 = vadd.f32 %v5435_v2, %v5405_v23  ;;  %7235 = vmatmul.mubr.bf16.gmra.mrb[40].mxu0 %v8401_v40  ;;  %7427 = vmatmul.mubr.bf16.gmra.mrb[40].mxu1 %v9460_v56  ;;  %v5368_v58 = vadd.f32 %v7064_v60, %v5367_v5  ;;  %v5300_v34 = vmul.f32 %v6873_v21, %v6873_v21  ;;  %v9469_v23 = vld [vmem:[#allocation15_spill] sm:$0xff] }
 0x213   : > { %v5260_v10 = vadd.f32 %v6872_v57, %v5259_v61  ;;  %v5329_v26 = vadd.f32 %v5328_v4, %v5298_v17  ;;  %7238 = vmatprep.mubr.bf16.mxu0 %v8432_v30  ;;  %7430 = vmatprep.mubr.bf16.mxu1 %v9461_v44  ;;  %v5408_v29 = vmul.f32 %v7065_v39, %v7065_v39 }
 0x214   : > { %v5437_v62 = vadd.f32 %v5436_v8, %v5406_v51  ;;  %v5369_v11 = vadd.f32 %v7065_v39, %v5368_v58  ;;  %v9468_v39 = vld [vmem:[#allocation14_spill] sm:$0xff] }
 0x215   : > { %v5261_v43 = vadd.f32 %v6873_v21, %v5260_v10  ;;  %v5330_v13 = vadd.f32 %v5329_v26, %v5299_v48  ;;  %v9467_v21 = vld [vmem:[#allocation13_spill] sm:$0xff] }
 0x216   : > { %v5438_v24 = vadd.f32 %v5437_v62, %v5407_v54  ;;  %v5370_v40 = vrot.slane %v5369_v11, 4 }
 0x217   : > { %v5262_v0 = vrot.slane %v5261_v43, 4  ;;  %v5331_v45 = vadd.f32 %v5330_v13, %v5300_v34 }
 0x218   : > { %v5439_v50 = vadd.f32 %v5438_v24, %v5408_v29  ;;  %v5371_v6 = vadd.f32 %v5370_v40, %v5369_v11 }
 0x219   : > { %v5263_v56 = vadd.f32 %v5262_v0, %v5261_v43  ;;  %v5332_v49 = vrot.slane %v5331_v45, 4 }
 0x21a   : > { %v5440_v41 = vrot.slane %v5439_v50, 4  ;;  %7239 = vmatmul.mubr.bf16.gmra.mrb[44].mxu0 %v8455_v3  ;;  %7431 = vmatmul.mubr.bf16.gmra.mrb[44].mxu1 %v9462_v63  ;;  %v5372_v20 = vrot.slane %v5371_v6, 2 }
 0x21b   : > { %v5264_v30 = vrot.slane %v5263_v56, 2  ;;  %v5333_v44 = vadd.f32 %v5332_v49, %v5331_v45  ;;  %7242 = vmatprep.mubr.bf16.mxu0 %v8486_v9  ;;  %7434 = vmatprep.mubr.bf16.mxu1 %v9463_v36 }
 0x21c   : > { %v5441_v22 = vadd.f32 %v5440_v41, %v5439_v50  ;;  %v5373_v27 = vadd.f32 %v5372_v20, %v5371_v6 }
 0x21d   : > { %v5265_v57 = vadd.f32 %v5264_v30, %v5263_v56  ;;  %v5334_v60 = vrot.slane %v5333_v44, 2 }
 0x21e   : > { %v5442_v25 = vrot.slane %v5441_v22, 2  ;;  %v5374_v28 = vrot.slane %v5373_v27, 1 }
 0x21f   : > { %v5266_v18 = vrot.slane %v5265_v57, 1  ;;  %v5335_v16 = vadd.f32 %v5334_v60, %v5333_v44 }
 0x220   : > { %v5443_v7 = vadd.f32 %v5442_v25, %v5441_v22  ;;  %v5375_v46 = vadd.f32 %v5374_v28, %v5373_v27 }
 0x221   : > { %v5267_v47 = vadd.f32 %v5266_v18, %v5265_v57  ;;  %v5336_v3 = vrot.slane %v5335_v16, 1 }
 0x222   : > { %v5444_v63 = vrot.slane %v5443_v7, 1  ;;  %7243 = vmatmul.mubr.bf16.gmra.mrb[48].mxu0 %v8509_v1  ;;  %7435 = vmatmul.mubr.bf16.gmra.mrb[48].mxu1 %v9464_v33  ;;  %v4932_v1 = vrot.slane %v9182_v55, 5  ;;  %v6269_v33 = vrot.slane %v9173_v38, 9 }
 0x223   : > { %v5337_v9 = vadd.f32 %v5336_v3, %v5335_v16  ;;  %v9303_v31 = vadd.f32 %v5375_v46, %v5267_v47  ;;  %7246 = vmatprep.mubr.bf16.mxu0 %v8540_v14  ;;  %7438 = vmatprep.mubr.bf16.mxu1 %v9465_v42  ;;  %v4935_v42 = vrot.slane %v9209_v53, 5 }
 0x224   : > { %v5445_v36 = vadd.f32 %v5444_v63, %v5443_v7  ;;  %v4934_v14 = vrot.slane %v4932_v1, 4  ;;  %v4933_v2 = vsel %vm8137_vm4, %v6269_v33, %v4932_v1 }
 0x226   : > { %v9307_v59 = vadd.f32 %v5445_v36, %v5337_v9  ;;  %v4936_v55 = vsel %vm8137_vm4, %v4934_v14, %v4935_v42 }
 0x227   : > { %v6286_v38 = vcombine.low %v4933_v2, %v4936_v55 }
 0x22a   : > { %7247 = vmatmul.mubr.bf16.gmra.mrb[52].mxu0 %v8563_v35  ;;  %7439 = vmatmul.mubr.bf16.gmra.mrb[52].mxu1 %v9467_v21  ;;  %v9470_v35 = vld [vmem:[#allocation16_spill] sm:$0xff] }
 0x22b   : > { %7250 = vmatprep.mubr.bf16.mxu0 %v8587_v32  ;;  %7442 = vmatprep.mubr.bf16.mxu1 %v9468_v39 }
 0x232   : > { %7251 = vmatmul.mubr.bf16.gmra.mrb[56].mxu0 %v8610_v12  ;;  %7443 = vmatmul.mubr.bf16.gmra.mrb[56].mxu1 %v9469_v23 }
 0x233   : > { %7254 = vmatprep.mubr.bf16.mxu0 %v8864_v37  ;;  %7446 = vmatprep.mubr.bf16.mxu1 %v9470_v35 }
 0x23a   : > { %7255 = vmatmul.mubr.bf16.gmra.mrb[60].mxu0 %v9250_v15  ;;  %7447 = vmatmul.mubr.bf16.gmra.mrb[60].mxu1 %v6286_v38 }
 0x2d5   : > { %v7228_v12 = vpop.f32.mrb[32].mxu0  ;;  %v7420_v53 = vpop.f32.mrb[32].mxu1 }
 0x2d6   : > { %4189 = vst [vmem:[%s9154_s24 + $0x50] sm:$0xff] %v7228_v12  ;;  %5201 = vst [vmem:[%s9154_s24 + $0x58] sm:$0xff] %v7420_v53  ;;  %v4028_v37 = vpop.f32.mrb[33].mxu0  ;;  %v5040_v52 = vpop.f32.mrb[33].mxu1  ;;  %v5487_v26 = vmul.f32 %v7228_v12, %v7228_v12  ;;  %v5595_v58 = vmul.f32 %v7420_v53, %v7420_v53 }
 0x2d7   : > { %4187 = vst [vmem:[%s9154_s24 + $0x10] sm:$0xff] %v4028_v37  ;;  %5199 = vst [vmem:[%s9154_s24 + $0x18] sm:$0xff] %v5040_v52  ;;  %v7229_v19 = vpop.f32.mrb[34].mxu0  ;;  %v7421_v4 = vpop.f32.mrb[34].mxu1  ;;  %v5485_v61 = vmul.f32 %v4028_v37, %v4028_v37  ;;  %v5593_v17 = vmul.f32 %v5040_v52, %v5040_v52 }
 0x2d8   : > { %4190 = vst [vmem:[%s9154_s24 + $0x70] sm:$0xff] %v7229_v19  ;;  %5202 = vst [vmem:[%s9154_s24 + $0x78] sm:$0xff] %v7421_v4  ;;  %v4031_v5 = vpop.f32.mrb[35].mxu0  ;;  %v5043_v48 = vpop.f32.mrb[35].mxu1  ;;  %v5488_v13 = vmul.f32 %v7229_v19, %v7229_v19  ;;  %v5596_v50 = vmul.f32 %v7421_v4, %v7421_v4 }
 0x2d9   : > { %4188 = vst [vmem:[%s9154_s24 + $0x30] sm:$0xff] %v4031_v5  ;;  %v5447_v15 = vadd.f32 %v4031_v5, %v4028_v37  ;;  %v5486_v8 = vmul.f32 %v4031_v5, %v4031_v5  ;;  %5200 = vst [vmem:[%s9154_s24 + $0x38] sm:$0xff] %v5043_v48  ;;  %v5555_v51 = vadd.f32 %v5043_v48, %v5040_v52 }
 0x2da   : > { %v5594_v10 = vmul.f32 %v5043_v48, %v5043_v48 }
 0x2db   : > { %v5448_v54 = vadd.f32 %v7228_v12, %v5447_v15  ;;  %v5517_v62 = vadd.f32 %v5486_v8, %v5485_v61  ;;  %v5556_v34 = vadd.f32 %v7420_v53, %v5555_v51 }
 0x2dc   : > { %v5625_v43 = vadd.f32 %v5594_v10, %v5593_v17 }
 0x2dd   : > { %v5518_v11 = vadd.f32 %v5517_v62, %v5487_v26  ;;  %v7232_v24 = vpop.f32.mrb[36].mxu0  ;;  %v7424_v0 = vpop.f32.mrb[36].mxu1  ;;  %v5449_v45 = vadd.f32 %v7229_v19, %v5448_v54  ;;  %v5557_v40 = vadd.f32 %v7421_v4, %v5556_v34 }
 0x2de   : > { %v5626_v29 = vadd.f32 %v5625_v43, %v5595_v58  ;;  %4193 = vst [vmem:[%s9154_s24 + $0xd0] sm:$0xff] %v7232_v24  ;;  %5205 = vst [vmem:[%s9154_s24 + $0xd8] sm:$0xff] %v7424_v0  ;;  %v4044_v56 = vpop.f32.mrb[37].mxu0  ;;  %v5056_v49 = vpop.f32.mrb[37].mxu1  ;;  %v5491_v46 = vmul.f32 %v7232_v24, %v7232_v24  ;;  %v5599_v21 = vmul.f32 %v7424_v0, %v7424_v0 }
 0x2df   : > { %4191 = vst [vmem:[%s9154_s24 + $0x90] sm:$0xff] %v4044_v56  ;;  %v5450_v6 = vadd.f32 %v5449_v45, %v4044_v56  ;;  %v5489_v41 = vmul.f32 %v4044_v56, %v4044_v56  ;;  %v5519_v30 = vadd.f32 %v5518_v11, %v5488_v13  ;;  %5203 = vst [vmem:[%s9154_s24 + $0x98] sm:$0xff] %v5056_v49  ;;  %v7233_v20 = vpop.f32.mrb[38].mxu0  ;;  %v7425_v22 = vpop.f32.mrb[38].mxu1 }
 0x2e0   : > { %v5558_v44 = vadd.f32 %v5557_v40, %v5056_v49  ;;  %v5597_v57 = vmul.f32 %v5056_v49, %v5056_v49  ;;  %v5627_v60 = vadd.f32 %v5626_v29, %v5596_v50  ;;  %4194 = vst [vmem:[%s9154_s24 + $0xf0] sm:$0xff] %v7233_v20  ;;  %5206 = vst [vmem:[%s9154_s24 + $0xf8] sm:$0xff] %v7425_v22  ;;  %v4047_v27 = vpop.f32.mrb[39].mxu0  ;;  %v5059_v25 = vpop.f32.mrb[39].mxu1 }
 0x2e1   : > { %v5520_v18 = vadd.f32 %v5519_v30, %v5489_v41  ;;  %4192 = vst [vmem:[%s9154_s24 + $0xb0] sm:$0xff] %v4047_v27  ;;  %v5451_v16 = vadd.f32 %v5450_v6, %v4047_v27  ;;  %v5490_v28 = vmul.f32 %v4047_v27, %v4047_v27  ;;  %5204 = vst [vmem:[%s9154_s24 + $0xb8] sm:$0xff] %v5059_v25 }
 0x2e2   : > { %v5559_v7 = vadd.f32 %v5558_v44, %v5059_v25  ;;  %v5628_v47 = vadd.f32 %v5627_v60, %v5597_v57  ;;  %v5598_v3 = vmul.f32 %v5059_v25, %v5059_v25  ;;  %v5492_v1 = vmul.f32 %v7233_v20, %v7233_v20 }
 0x2e3   : > { %v5452_v63 = vadd.f32 %v7232_v24, %v5451_v16  ;;  %v5521_v9 = vadd.f32 %v5520_v18, %v5490_v28  ;;  %v5600_v32 = vmul.f32 %v7425_v22, %v7425_v22 }
 0x2e4   : > { %v5560_v36 = vadd.f32 %v7424_v0, %v5559_v7  ;;  %v5629_v39 = vadd.f32 %v5628_v47, %v5598_v3 }
 0x2e5   : > { %v5522_v33 = vadd.f32 %v5521_v9, %v5491_v46  ;;  %v7236_v14 = vpop.f32.mrb[40].mxu0  ;;  %v7428_v42 = vpop.f32.mrb[40].mxu1  ;;  %v5453_v23 = vadd.f32 %v7233_v20, %v5452_v63 }
 0x2e6   : > { %v5561_v35 = vadd.f32 %v7425_v22, %v5560_v36  ;;  %v5630_v2 = vadd.f32 %v5629_v39, %v5599_v21  ;;  %4197 = vst [vmem:[%s9154_s24 + $0x150] sm:$0xff] %v7236_v14  ;;  %5209 = vst [vmem:[%s9154_s24 + $0x158] sm:$0xff] %v7428_v42  ;;  %v4060_v55 = vpop.f32.mrb[41].mxu0  ;;  %v5072_v38 = vpop.f32.mrb[41].mxu1  ;;  %v5495_v54 = vmul.f32 %v7236_v14, %v7236_v14 }
 0x2e7   : > { %4195 = vst [vmem:[%s9154_s24 + $0x110] sm:$0xff] %v4060_v55  ;;  %v5454_v12 = vadd.f32 %v5453_v23, %v4060_v55  ;;  %v5493_v53 = vmul.f32 %v4060_v55, %v4060_v55  ;;  %v5523_v37 = vadd.f32 %v5522_v33, %v5492_v1  ;;  %5207 = vst [vmem:[%s9154_s24 + $0x118] sm:$0xff] %v5072_v38  ;;  %v7237_v19 = vpop.f32.mrb[42].mxu0  ;;  %v7429_v4 = vpop.f32.mrb[42].mxu1 }
 0x2e8   : > { %v5562_v52 = vadd.f32 %v5561_v35, %v5072_v38  ;;  %v5601_v61 = vmul.f32 %v5072_v38, %v5072_v38  ;;  %v5631_v17 = vadd.f32 %v5630_v2, %v5600_v32  ;;  %4198 = vst [vmem:[%s9154_s24 + $0x170] sm:$0xff] %v7237_v19  ;;  %5210 = vst [vmem:[%s9154_s24 + $0x178] sm:$0xff] %v7429_v4  ;;  %v4063_v5 = vpop.f32.mrb[43].mxu0  ;;  %v5075_v48 = vpop.f32.mrb[43].mxu1 }
 0x2e9   : > { %v5524_v15 = vadd.f32 %v5523_v37, %v5493_v53  ;;  %4196 = vst [vmem:[%s9154_s24 + $0x130] sm:$0xff] %v4063_v5  ;;  %v5455_v8 = vadd.f32 %v5454_v12, %v4063_v5  ;;  %v5494_v51 = vmul.f32 %v4063_v5, %v4063_v5  ;;  %5208 = vst [vmem:[%s9154_s24 + $0x138] sm:$0xff] %v5075_v48 }
 0x2ea   : > { %v5563_v10 = vadd.f32 %v5562_v52, %v5075_v48  ;;  %v5632_v26 = vadd.f32 %v5631_v17, %v5601_v61  ;;  %v5602_v58 = vmul.f32 %v5075_v48, %v5075_v48  ;;  %v5603_v13 = vmul.f32 %v7428_v42, %v7428_v42 }
 0x2eb   : > { %v5456_v62 = vadd.f32 %v7236_v14, %v5455_v8  ;;  %v5525_v34 = vadd.f32 %v5524_v15, %v5494_v51  ;;  %v5496_v29 = vmul.f32 %v7237_v19, %v7237_v19  ;;  %v5604_v56 = vmul.f32 %v7429_v4, %v7429_v4 }
 0x2ec   : > { %v5564_v43 = vadd.f32 %v7428_v42, %v5563_v10  ;;  %v5633_v11 = vadd.f32 %v5632_v26, %v5602_v58 }
 0x2ed   : > { %v5526_v24 = vadd.f32 %v5525_v34, %v5495_v54  ;;  %v7240_v0 = vpop.f32.mrb[44].mxu0  ;;  %v7432_v45 = vpop.f32.mrb[44].mxu1  ;;  %v5457_v40 = vadd.f32 %v7237_v19, %v5456_v62 }
 0x2ee   : > { %v5565_v50 = vadd.f32 %v7429_v4, %v5564_v43  ;;  %v5634_v49 = vadd.f32 %v5633_v11, %v5603_v13  ;;  %4201 = vst [vmem:[%s9154_s24 + $0x1d0] sm:$0xff] %v7240_v0  ;;  %5213 = vst [vmem:[%s9154_s24 + $0x1d8] sm:$0xff] %v7432_v45  ;;  %v4076_v6 = vpop.f32.mrb[45].mxu0  ;;  %v5088_v41 = vpop.f32.mrb[45].mxu1  ;;  %v5499_v9 = vmul.f32 %v7240_v0, %v7240_v0 }
 0x2ef   : > { %4199 = vst [vmem:[%s9154_s24 + $0x190] sm:$0xff] %v4076_v6  ;;  %v5458_v30 = vadd.f32 %v5457_v40, %v4076_v6  ;;  %v5497_v44 = vmul.f32 %v4076_v6, %v4076_v6  ;;  %v5527_v20 = vadd.f32 %v5526_v24, %v5496_v29  ;;  %5211 = vst [vmem:[%s9154_s24 + $0x198] sm:$0xff] %v5088_v41  ;;  %v7241_v57 = vpop.f32.mrb[46].mxu0  ;;  %v7433_v60 = vpop.f32.mrb[46].mxu1 }
 0x2f0   : > { %v5566_v22 = vadd.f32 %v5565_v50, %v5088_v41  ;;  %v5605_v27 = vmul.f32 %v5088_v41, %v5088_v41  ;;  %v5635_v25 = vadd.f32 %v5634_v49, %v5604_v56  ;;  %4202 = vst [vmem:[%s9154_s24 + $0x1f0] sm:$0xff] %v7241_v57  ;;  %5214 = vst [vmem:[%s9154_s24 + $0x1f8] sm:$0xff] %v7433_v60  ;;  %v4079_v18 = vpop.f32.mrb[47].mxu0  ;;  %v5091_v16 = vpop.f32.mrb[47].mxu1 }
 0x2f1   : > { %v5528_v28 = vadd.f32 %v5527_v20, %v5497_v44  ;;  %4200 = vst [vmem:[%s9154_s24 + $0x1b0] sm:$0xff] %v4079_v18  ;;  %v5459_v7 = vadd.f32 %v5458_v30, %v4079_v18  ;;  %v5498_v47 = vmul.f32 %v4079_v18, %v4079_v18  ;;  %5212 = vst [vmem:[%s9154_s24 + $0x1b8] sm:$0xff] %v5091_v16 }
 0x2f2   : > { %v5567_v3 = vadd.f32 %v5566_v22, %v5091_v16  ;;  %v5636_v46 = vadd.f32 %v5635_v25, %v5605_v27  ;;  %v5606_v63 = vmul.f32 %v5091_v16, %v5091_v16  ;;  %v5607_v1 = vmul.f32 %v7432_v45, %v7432_v45 }
 0x2f3   : > { %v5460_v36 = vadd.f32 %v7240_v0, %v5459_v7  ;;  %v5529_v21 = vadd.f32 %v5528_v28, %v5498_v47  ;;  %v5500_v14 = vmul.f32 %v7241_v57, %v7241_v57  ;;  %v5608_v55 = vmul.f32 %v7433_v60, %v7433_v60 }
 0x2f4   : > { %v5568_v39 = vadd.f32 %v7432_v45, %v5567_v3  ;;  %v5637_v33 = vadd.f32 %v5636_v46, %v5606_v63 }
 0x2f5   : > { %v5530_v42 = vadd.f32 %v5529_v21, %v5499_v9  ;;  %v7244_v23 = vpop.f32.mrb[48].mxu0  ;;  %v7436_v35 = vpop.f32.mrb[48].mxu1  ;;  %v5461_v32 = vadd.f32 %v7241_v57, %v5460_v36 }
 0x2f6   : > { %v5569_v2 = vadd.f32 %v7433_v60, %v5568_v39  ;;  %v5638_v38 = vadd.f32 %v5637_v33, %v5607_v1  ;;  %4205 = vst [vmem:[%s9154_s24 + $0x250] sm:$0xff] %v7244_v23  ;;  %5217 = vst [vmem:[%s9154_s24 + $0x258] sm:$0xff] %v7436_v35  ;;  %v4092_v12 = vpop.f32.mrb[49].mxu0  ;;  %v5104_v53 = vpop.f32.mrb[49].mxu1  ;;  %v5503_v34 = vmul.f32 %v7244_v23, %v7244_v23 }
 0x2f7   : > { %4203 = vst [vmem:[%s9154_s24 + $0x210] sm:$0xff] %v4092_v12  ;;  %v5462_v37 = vadd.f32 %v5461_v32, %v4092_v12  ;;  %v5501_v52 = vmul.f32 %v4092_v12, %v4092_v12  ;;  %v5531_v19 = vadd.f32 %v5530_v42, %v5500_v14  ;;  %5215 = vst [vmem:[%s9154_s24 + $0x218] sm:$0xff] %v5104_v53  ;;  %v7245_v61 = vpop.f32.mrb[50].mxu0  ;;  %v7437_v17 = vpop.f32.mrb[50].mxu1 }
 0x2f8   : > { %v5570_v4 = vadd.f32 %v5569_v2, %v5104_v53  ;;  %v5609_v5 = vmul.f32 %v5104_v53, %v5104_v53  ;;  %v5639_v48 = vadd.f32 %v5638_v38, %v5608_v55  ;;  %4206 = vst [vmem:[%s9154_s24 + $0x270] sm:$0xff] %v7245_v61  ;;  %5218 = vst [vmem:[%s9154_s24 + $0x278] sm:$0xff] %v7437_v17  ;;  %v4095_v15 = vpop.f32.mrb[51].mxu0  ;;  %v5107_v8 = vpop.f32.mrb[51].mxu1 }
 0x2f9   : > { %v5532_v51 = vadd.f32 %v5531_v19, %v5501_v52  ;;  %4204 = vst [vmem:[%s9154_s24 + $0x230] sm:$0xff] %v4095_v15  ;;  %v5463_v10 = vadd.f32 %v5462_v37, %v4095_v15  ;;  %v5502_v26 = vmul.f32 %v4095_v15, %v4095_v15  ;;  %5216 = vst [vmem:[%s9154_s24 + $0x238] sm:$0xff] %v5107_v8 }
 0x2fa   : > { %v5571_v58 = vadd.f32 %v5570_v4, %v5107_v8  ;;  %v5640_v54 = vadd.f32 %v5639_v48, %v5609_v5  ;;  %v5610_v62 = vmul.f32 %v5107_v8, %v5107_v8  ;;  %v5611_v29 = vmul.f32 %v7436_v35, %v7436_v35 }
 0x2fb   : > { %v5464_v43 = vadd.f32 %v7244_v23, %v5463_v10  ;;  %v5533_v13 = vadd.f32 %v5532_v51, %v5502_v26  ;;  %v5504_v0 = vmul.f32 %v7245_v61, %v7245_v61  ;;  %v5612_v6 = vmul.f32 %v7437_v17, %v7437_v17 }
 0x2fc   : > { %v5572_v11 = vadd.f32 %v7436_v35, %v5571_v58  ;;  %v5641_v24 = vadd.f32 %v5640_v54, %v5610_v62 }
 0x2fd   : > { %v5534_v45 = vadd.f32 %v5533_v13, %v5503_v34  ;;  %v7248_v40 = vpop.f32.mrb[52].mxu0  ;;  %v7440_v50 = vpop.f32.mrb[52].mxu1  ;;  %v5465_v56 = vadd.f32 %v7245_v61, %v5464_v43 }
 0x2fe   : > { %v5573_v49 = vadd.f32 %v7437_v17, %v5572_v11  ;;  %v5642_v41 = vadd.f32 %v5641_v24, %v5611_v29  ;;  %4209 = vst [vmem:[%s9154_s24 + $0x2d0] sm:$0xff] %v7248_v40  ;;  %5221 = vst [vmem:[%s9154_s24 + $0x2d8] sm:$0xff] %v7440_v50  ;;  %v4108_v30 = vpop.f32.mrb[53].mxu0  ;;  %v5120_v44 = vpop.f32.mrb[53].mxu1  ;;  %v5507_v21 = vmul.f32 %v7248_v40, %v7248_v40 }
 0x2ff   : > { %4207 = vst [vmem:[%s9154_s24 + $0x290] sm:$0xff] %v4108_v30  ;;  %v5466_v20 = vadd.f32 %v5465_v56, %v4108_v30  ;;  %v5505_v22 = vmul.f32 %v4108_v30, %v4108_v30  ;;  %v5535_v57 = vadd.f32 %v5534_v45, %v5504_v0  ;;  %5219 = vst [vmem:[%s9154_s24 + $0x298] sm:$0xff] %v5120_v44  ;;  %v7249_v27 = vpop.f32.mrb[54].mxu0  ;;  %v7441_v25 = vpop.f32.mrb[54].mxu1 }
 0x300   : > { %v5574_v60 = vadd.f32 %v5573_v49, %v5120_v44  ;;  %v5613_v18 = vmul.f32 %v5120_v44, %v5120_v44  ;;  %v5643_v16 = vadd.f32 %v5642_v41, %v5612_v6  ;;  %4210 = vst [vmem:[%s9154_s24 + $0x2f0] sm:$0xff] %v7249_v27  ;;  %5222 = vst [vmem:[%s9154_s24 + $0x2f8] sm:$0xff] %v7441_v25  ;;  %v4111_v28 = vpop.f32.mrb[55].mxu0  ;;  %v5123_v7 = vpop.f32.mrb[55].mxu1 }
 0x301   : > { %v5536_v47 = vadd.f32 %v5535_v57, %v5505_v22  ;;  %4208 = vst [vmem:[%s9154_s24 + $0x2b0] sm:$0xff] %v4111_v28  ;;  %v5467_v3 = vadd.f32 %v5466_v20, %v4111_v28  ;;  %v5506_v46 = vmul.f32 %v4111_v28, %v4111_v28  ;;  %5220 = vst [vmem:[%s9154_s24 + $0x2b8] sm:$0xff] %v5123_v7 }
 0x302   : > { %v5575_v63 = vadd.f32 %v5574_v60, %v5123_v7  ;;  %v5644_v9 = vadd.f32 %v5643_v16, %v5613_v18  ;;  %v5614_v36 = vmul.f32 %v5123_v7, %v5123_v7  ;;  %v5615_v14 = vmul.f32 %v7440_v50, %v7440_v50 }
 0x303   : > { %v5468_v39 = vadd.f32 %v7248_v40, %v5467_v3  ;;  %v5537_v1 = vadd.f32 %v5536_v47, %v5506_v46  ;;  %v5508_v23 = vmul.f32 %v7249_v27, %v7249_v27  ;;  %v5616_v12 = vmul.f32 %v7441_v25, %v7441_v25 }
 0x304   : > { %v5576_v33 = vadd.f32 %v7440_v50, %v5575_v63  ;;  %v5645_v42 = vadd.f32 %v5644_v9, %v5614_v36 }
 0x305   : > { %v5538_v35 = vadd.f32 %v5537_v1, %v5507_v21  ;;  %v7252_v32 = vpop.f32.mrb[56].mxu0  ;;  %v7444_v2 = vpop.f32.mrb[56].mxu1  ;;  %v5469_v55 = vadd.f32 %v7249_v27, %v5468_v39 }
 0x306   : > { %v5577_v38 = vadd.f32 %v7441_v25, %v5576_v33  ;;  %v5646_v53 = vadd.f32 %v5645_v42, %v5615_v14  ;;  %4213 = vst [vmem:[%s9154_s24 + $0x350] sm:$0xff] %v7252_v32  ;;  %5225 = vst [vmem:[%s9154_s24 + $0x358] sm:$0xff] %v7444_v2  ;;  %v4124_v37 = vpop.f32.mrb[57].mxu0  ;;  %v5136_v52 = vpop.f32.mrb[57].mxu1  ;;  %v5511_v13 = vmul.f32 %v7252_v32, %v7252_v32 }
 0x307   : > { %4211 = vst [vmem:[%s9154_s24 + $0x310] sm:$0xff] %v4124_v37  ;;  %v5470_v19 = vadd.f32 %v5469_v55, %v4124_v37  ;;  %v5509_v4 = vmul.f32 %v4124_v37, %v4124_v37  ;;  %v5539_v61 = vadd.f32 %v5538_v35, %v5508_v23  ;;  %5223 = vst [vmem:[%s9154_s24 + $0x318] sm:$0xff] %v5136_v52  ;;  %v7253_v5 = vpop.f32.mrb[58].mxu0  ;;  %v7445_v48 = vpop.f32.mrb[58].mxu1 }
 0x308   : > { %v5578_v17 = vadd.f32 %v5577_v38, %v5136_v52  ;;  %v5617_v15 = vmul.f32 %v5136_v52, %v5136_v52  ;;  %v5647_v8 = vadd.f32 %v5646_v53, %v5616_v12  ;;  %4214 = vst [vmem:[%s9154_s24 + $0x370] sm:$0xff] %v7253_v5  ;;  %5226 = vst [vmem:[%s9154_s24 + $0x378] sm:$0xff] %v7445_v48  ;;  %v4127_v51 = vpop.f32.mrb[59].mxu0  ;;  %v5139_v10 = vpop.f32.mrb[59].mxu1 }
 0x309   : > { %v5540_v26 = vadd.f32 %v5539_v61, %v5509_v4  ;;  %4212 = vst [vmem:[%s9154_s24 + $0x330] sm:$0xff] %v4127_v51  ;;  %v5471_v58 = vadd.f32 %v5470_v19, %v4127_v51  ;;  %v5510_v54 = vmul.f32 %v4127_v51, %v4127_v51  ;;  %5224 = vst [vmem:[%s9154_s24 + $0x338] sm:$0xff] %v5139_v10 }
 0x30a   : > { %v5579_v62 = vadd.f32 %v5578_v17, %v5139_v10  ;;  %v5648_v34 = vadd.f32 %v5647_v8, %v5617_v15  ;;  %v5618_v43 = vmul.f32 %v5139_v10, %v5139_v10  ;;  %v5619_v0 = vmul.f32 %v7444_v2, %v7444_v2 }
 0x30b   : > { %v5472_v11 = vadd.f32 %v7252_v32, %v5471_v58  ;;  %v5541_v29 = vadd.f32 %v5540_v26, %v5510_v54  ;;  %v5512_v40 = vmul.f32 %v7253_v5, %v7253_v5  ;;  %v5620_v30 = vmul.f32 %v7445_v48, %v7445_v48 }
 0x30c   : > { %v5580_v24 = vadd.f32 %v7444_v2, %v5579_v62  ;;  %v5649_v45 = vadd.f32 %v5648_v34, %v5618_v43 }
 0x30d   : > { %v5542_v50 = vadd.f32 %v5541_v29, %v5511_v13  ;;  %v7256_v56 = vpop.f32.mrb[60].mxu0  ;;  %v7448_v49 = vpop.f32.mrb[60].mxu1  ;;  %v5473_v6 = vadd.f32 %v7253_v5, %v5472_v11 }
 0x30e   : > { %v5581_v41 = vadd.f32 %v7445_v48, %v5580_v24  ;;  %v5650_v44 = vadd.f32 %v5649_v45, %v5619_v0  ;;  %4217 = vst [vmem:[%s9154_s24 + $0x3d0] sm:$0xff] %v7256_v56  ;;  %5229 = vst [vmem:[%s9154_s24 + $0x3d8] sm:$0xff] %v7448_v49  ;;  %v4140_v20 = vpop.f32.mrb[61].mxu0  ;;  %v5152_v22 = vpop.f32.mrb[61].mxu1  ;;  %v5515_v1 = vmul.f32 %v7256_v56, %v7256_v56 }
 0x30f   : > { %4215 = vst [vmem:[%s9154_s24 + $0x390] sm:$0xff] %v4140_v20  ;;  %v5474_v57 = vadd.f32 %v5473_v6, %v4140_v20  ;;  %v5513_v60 = vmul.f32 %v4140_v20, %v4140_v20  ;;  %v5543_v27 = vadd.f32 %v5542_v50, %v5512_v40  ;;  %5227 = vst [vmem:[%s9154_s24 + $0x398] sm:$0xff] %v5152_v22  ;;  %v7257_v18 = vpop.f32.mrb[62].mxu0  ;;  %v7449_v16 = vpop.f32.mrb[62].mxu1 }
 0x310   : > { %v5582_v25 = vadd.f32 %v5581_v41, %v5152_v22  ;;  %v5621_v28 = vmul.f32 %v5152_v22, %v5152_v22  ;;  %v5651_v7 = vadd.f32 %v5650_v44, %v5620_v30  ;;  %4218 = vst [vmem:[%s9154_s24 + $0x3f0] sm:$0xff] %v7257_v18  ;;  %5230 = vst [vmem:[%s9154_s24 + $0x3f8] sm:$0xff] %v7449_v16  ;;  %v4143_v47 = vpop.f32.mrb[63].mxu0  ;;  %v5155_v3 = vpop.f32.mrb[63].mxu1 }
 0x311   : > { %v5544_v46 = vadd.f32 %v5543_v27, %v5513_v60  ;;  %4216 = vst [vmem:[%s9154_s24 + $0x3b0] sm:$0xff] %v4143_v47  ;;  %v5475_v63 = vadd.f32 %v5474_v57, %v4143_v47  ;;  %v5514_v9 = vmul.f32 %v4143_v47, %v4143_v47  ;;  %5228 = vst [vmem:[%s9154_s24 + $0x3b8] sm:$0xff] %v5155_v3 }
 0x312   : > { %v5583_v36 = vadd.f32 %v5582_v25, %v5155_v3  ;;  %v5652_v21 = vadd.f32 %v5651_v7, %v5621_v28  ;;  %v5622_v39 = vmul.f32 %v5155_v3, %v5155_v3  ;;  %v5623_v23 = vmul.f32 %v7448_v49, %v7448_v49 }
 0x313   : > { %v5476_v33 = vadd.f32 %v7256_v56, %v5475_v63  ;;  %v5545_v14 = vadd.f32 %v5544_v46, %v5514_v9  ;;  %v5516_v32 = vmul.f32 %v7257_v18, %v7257_v18  ;;  %v5624_v12 = vmul.f32 %v7449_v16, %v7449_v16 }
 0x314   : > { %v5584_v42 = vadd.f32 %v7448_v49, %v5583_v36  ;;  %v5653_v35 = vadd.f32 %v5652_v21, %v5622_v39 }
 0x315   : > { %v5477_v2 = vadd.f32 %v7257_v18, %v5476_v33  ;;  %v5546_v55 = vadd.f32 %v5545_v14, %v5515_v1 }
 0x316   : > { %v5585_v38 = vadd.f32 %v7449_v16, %v5584_v42  ;;  %v5654_v53 = vadd.f32 %v5653_v35, %v5623_v23 }
 0x317   : > { %v5478_v37 = vrot.slane %v5477_v2, 4  ;;  %v5547_v52 = vadd.f32 %v5546_v55, %v5516_v32 }
 0x318   : > { %v5586_v19 = vrot.slane %v5585_v38, 4  ;;  %v5655_v4 = vadd.f32 %v5654_v53, %v5624_v12 }
 0x319   : > { %v5479_v61 = vadd.f32 %v5478_v37, %v5477_v2  ;;  %v5548_v17 = vrot.slane %v5547_v52, 4 }
 0x31a   : > { %v5587_v5 = vadd.f32 %v5586_v19, %v5585_v38  ;;  %v5656_v48 = vrot.slane %v5655_v4, 4 }
 0x31b   : > { %v5480_v15 = vrot.slane %v5479_v61, 2  ;;  %v5549_v8 = vadd.f32 %v5548_v17, %v5547_v52 }
 0x31c   : > { %v5588_v51 = vrot.slane %v5587_v5, 2  ;;  %v5657_v10 = vadd.f32 %v5656_v48, %v5655_v4 }
 0x31d   : > { %v5481_v26 = vadd.f32 %v5480_v15, %v5479_v61  ;;  %v5550_v58 = vrot.slane %v5549_v8, 2 }
 0x31e   : > { %v5589_v54 = vadd.f32 %v5588_v51, %v5587_v5  ;;  %v5658_v62 = vrot.slane %v5657_v10, 2 }
 0x31f   : > { %v5482_v34 = vrot.slane %v5481_v26, 1  ;;  %v5551_v43 = vadd.f32 %v5550_v58, %v5549_v8 }
 0x320   : > { %v5590_v13 = vrot.slane %v5589_v54, 1  ;;  %v5659_v11 = vadd.f32 %v5658_v62, %v5657_v10 }
 0x321   : > { %v5483_v29 = vadd.f32 %v5482_v34, %v5481_v26  ;;  %v5552_v24 = vrot.slane %v5551_v43, 1 }
 0x322   : > { %v5660_v0 = vrot.slane %v5659_v11, 1  ;;  %v5591_v50 = vadd.f32 %v5590_v13, %v5589_v54 }
 0x323   : > { %v5484_v45 = vadd.f32 %v5483_v29, %v9303_v31  ;;  %v5553_v40 = vadd.f32 %v5552_v24, %v5551_v43 }
 0x324   : > { %v5661_v6 = vadd.f32 %v5660_v0, %v5659_v11 }
 0x325   : > { %v5554_v56 = vadd.f32 %v5553_v40, %v9307_v59  ;;  %v5592_v49 = vadd.f32 %v5591_v50, %v5484_v45 }
 0x327   : > { %v5662_v41 = vadd.f32 %v5661_v6, %v5554_v56  ;;  %5663 = vst [vmem:[%s342_s8] sm:$0x1] %v5592_v49 }
 0x329   : > { %5664 = vst [vmem:[%s342_s8 + $0x1] sm:$0x1] %v5662_v41 }
 0x32a PF: > { %s15_s17 = sadd.s32 1, %s8040_s17   ;;  %s9472_s15 = smov %s8036_s16 }
 0x32b   : > { %p12_p5 = scmp.ge.s32.totalorder %s15_s17, 4   ;;  %s9473_s16 = smov %s9475_s18 }
 0x32d   :  { %14 = sbr.rel (!%p12_p5) target bundleno = 2 (0x2), region = 95 }

</bundles_post_ra>
